<compile_context>
chip_gen: v6e
topology: v6e:2x2x1
jax: 0.10.0
libtpu: 0.0.40
codegen_flags: <defaults>
</compile_context>

<pallas_src>
import jax
import jax.numpy as jnp
from jax.experimental import pallas as pl
from jax.experimental.pallas import tpu as pltpu


def _se_gate_kernel(g_ref, x_ref, o_ref):
    # g_ref: (TR, 1) raw gate logits; x_ref / o_ref: (TR, TC).
    # Sigmoid on the tiny sliver runs on the otherwise-idle EUP; f32 for
    # accuracy, multiply in f32, cast once on the way out.
    gate = jax.nn.sigmoid(g_ref[...].astype(jnp.float32))
    o_ref[...] = (x_ref[...].astype(jnp.float32) * gate).astype(o_ref.dtype)


def _round_up(a, b):
    return ((a + b - 1) // b) * b


def _round_down(a, b):
    return (a // b) * b


# Below this (lane-padded) size the kernel is latency/overhead dominated:
# run a single grid step covering the whole tensor.
_SMALL_TOTAL_BYTES = 2 << 20
# For big tensors keep >= 8 steps (>= 4 per TensorCore on v7x's 2-TC chip).
_MIN_GRID_STEPS = 8


def _vmem_block_budget():
    """Per-block VMEM budget (double-buffered footprint is ~2x this)."""
    budget = 6 << 20  # v5e/v6e: already at the measured roofline plateau
    try:
        info = pltpu.get_tpu_info()
        if info.vmem_capacity_bytes <= (64 << 20):
            # v7x: ~3.2 TB/s HBM makes the ~0.35 us per-step overhead a larger
            # fraction of each step; bigger blocks amortize it and ~26 MiB of
            # double-buffered footprint still fits 64 MiB VMEM comfortably.
            budget = 12 << 20
    except Exception:
        pass
    return budget


def sigmoid_mul(x640, x644):
    """x640: (N, C, H, W), x644: (N, C, 1, 1) -> x640 * sigmoid(x644)."""
    N, C, H, W = x640.shape
    assert x644.shape == (N, C, 1, 1)
    rows, hw = N * C, H * W
    dtype = x640.dtype
    itemsize = jnp.dtype(dtype).itemsize
    g_itemsize = jnp.dtype(x644.dtype).itemsize
    sublane = {4: 8, 2: 16, 1: 32}.get(itemsize, 8)

    # Contiguous (free) views; raw gate logits go straight into the kernel.
    x2 = x640.reshape(rows, hw)
    g2 = x644.reshape(rows, 1)

    # Lane-padded footprint estimate (what actually lands in VMEM).
    padded_total = rows * _round_up(hw, 128) * itemsize

    if padded_total <= _SMALL_TOTAL_BYTES:
        # SE-gate case (e.g. (1, 2304, 7, 7)): one grid step, whole tensor.
        tr, tc = rows, hw
    else:
        budget = _vmem_block_budget()

        # ---- column tile ----------------------------------------------------
        # Prefer full rows (one contiguous HBM span per DMA, no column tails)
        # whenever a full-row block still leaves room for >= `sublane` rows.
        tc_cap = max(128, _round_down(budget // (2 * itemsize * sublane), 128))
        if hw <= tc_cap:
            tc = hw
        else:
            # Balanced lane-dense (128-multiple) column tiles: no tiny ragged
            # tail block wasting lanes / forcing masked stores.
            n_col_t = pl.cdiv(hw, tc_cap)
            tc = min(_round_up(pl.cdiv(hw, n_col_t), 128), tc_cap)
        n_col = pl.cdiv(hw, tc)

        # ---- row tile --------------------------------------------------------
        # VMEM bytes per block row (lanes padded to 128) for x + out + gate.
        per_row_vmem = 2 * _round_up(tc, 128) * itemsize + 128 * g_itemsize
        tr = max(sublane, budget // per_row_vmem)
        # Keep >= _MIN_GRID_STEPS steps so the pipeline has a steady state and
        # the ("parallel","parallel") grid shards across both v7x TensorCores.
        min_row_steps = max(1, pl.cdiv(_MIN_GRID_STEPS, n_col))
        tr = min(tr, pl.cdiv(rows, min_row_steps), rows)
        if rows <= sublane:
            tr = rows                              # block dim == array dim: legal
        elif tr < rows:
            # Round DOWN so the double-buffered footprint stays inside budget.
            tr = max(sublane, _round_down(tr, sublane))
        # TODO(synk): if the hw<128 path ever carries multi-MB tensors, fold
        # 128 rows into one lane-dense super-row to avoid ~(hw/128) lane waste.

    n_row = pl.cdiv(rows, tr)
    n_col = pl.cdiv(hw, tc)

    out = pl.pallas_call(
        _se_gate_kernel,
        out_shape=jax.ShapeDtypeStruct((rows, hw), dtype),
        grid_spec=pltpu.PrefetchScalarGridSpec(
            num_scalar_prefetch=0,
            grid=(n_row, n_col),
            in_specs=[
                # Gate sliver: block index only changes with the row block, so
                # it is re-DMA'd once per row block, not once per grid step.
                pl.BlockSpec((tr, 1), lambda i, j: (i, 0)),
                pl.BlockSpec((tr, tc), lambda i, j: (i, j)),
            ],
            out_specs=pl.BlockSpec((tr, tc), lambda i, j: (i, j)),
        ),
        compiler_params=pltpu.CompilerParams(
            dimension_semantics=("parallel", "parallel"),
            # Explicit limit: portable across v5e's 16 MiB scoped default and
            # v7x's 64 MiB physical VMEM, with headroom for internal scratch.
            vmem_limit_bytes=48 << 20,
        ),
    )(g2, x2)

    return out.reshape(N, C, H, W)


if __name__ == "__main__":
    key = jax.random.PRNGKey(0)

    def check(shape):
        N, C, H, W = shape
        k1, k2 = jax.random.split(
            jax.random.fold_in(key, N * 1000003 + C * 131 + H * 7 + W))
        x = jax.random.normal(k1, (N, C, H, W), dtype=jnp.float32)
        g = jax.random.normal(k2, (N, C, 1, 1), dtype=jnp.float32)
        out = jax.block_until_ready(sigmoid_mul(x, g))
        ref = x * jax.nn.sigmoid(g)
        assert out.shape == x.shape and out.dtype == x.dtype
        err = float(jnp.max(jnp.abs(out - ref)))
        assert jnp.allclose(out, ref, atol=1e-5, rtol=1e-5), err

    # Module's actual SE shape: single-step, latency-dominated path.
    check((1, 2304, 7, 7))
    # Smaller SE-style gate (also single-step path).
    check((2, 256, 7, 7))
    # >2 MiB tensor: tiled path (full-row tc, >=8 grid steps).
    check((2, 96, 64, 64))

    print("KERNEL_OK")
</pallas_src>

<mosaic_0001>
module attributes {stable_mosaic.version = 11 : i64} {
  func.func @_se_gate_kernel(%arg0: i32, %arg1: i32, %arg2: memref<2304x1xf32, #tpu.memory_space<vmem>>, %arg3: memref<2304x49xf32, #tpu.memory_space<vmem>>, %arg4: memref<2304x49xf32, #tpu.memory_space<vmem>>) attributes {dimension_semantics = [#tpu.dimension_semantics<parallel>, #tpu.dimension_semantics<parallel>], iteration_bounds = array<i64: 1, 1>, scalar_prefetch = 0 : i64, scratch_operands = 0 : i64, tpu.core_type = #tpu.core_type<tc>, window_params = [{transform_indices = @transform_0, window_bounds = array<i64: 2304, 1>}, {transform_indices = @transform_1, window_bounds = array<i64: 2304, 49>}, {transform_indices = @transform_2, window_bounds = array<i64: 2304, 49>}]} {
    %c0 = arith.constant 0 : index
    %c0_0 = arith.constant 0 : index
    %0 = vector.load %arg2[%c0, %c0_0] : memref<2304x1xf32, #tpu.memory_space<vmem>>, vector<2304x1xf32>
    %1 = arith.negf %0 : vector<2304x1xf32>
    %2 = math.exp %1 : vector<2304x1xf32>
    %cst = arith.constant 1.000000e+00 : f32
    %3 = vector.broadcast %cst : f32 to vector<2304x1xf32>
    %4 = arith.addf %3, %2 : vector<2304x1xf32>
    %5 = arith.divf %3, %4 : vector<2304x1xf32>
    %c0_1 = arith.constant 0 : index
    %c0_2 = arith.constant 0 : index
    %6 = vector.load %arg3[%c0_1, %c0_2] : memref<2304x49xf32, #tpu.memory_space<vmem>>, vector<2304x49xf32>
    %7 = vector.broadcast %5 : vector<2304x1xf32> to vector<2304x49xf32>
    %8 = arith.mulf %6, %7 : vector<2304x49xf32>
    %c0_3 = arith.constant 0 : index
    %c0_4 = arith.constant 0 : index
    %9 = vector.load %arg4[%c0_3, %c0_4] : memref<2304x49xf32, #tpu.memory_space<vmem>>, vector<2304x49xf32>
    tpu.vector_store %arg4[%c0_3, %c0_4], %8 {strides = array<i32>} : memref<2304x49xf32, #tpu.memory_space<vmem>>, vector<2304x49xf32>,
    return
  }
  func.func @transform_0(%arg0: i32, %arg1: i32) -> (i32, i32) {
    %c0_i32 = arith.constant 0 : i32
    %c0_i32_0 = arith.constant 0 : i32
    return %arg0, %c0_i32 : i32, i32
  }
  func.func @transform_1(%arg0: i32, %arg1: i32) -> (i32, i32) {
    %c0_i32 = arith.constant 0 : i32
    return %arg0, %arg1 : i32, i32
  }
  func.func @transform_2(%arg0: i32, %arg1: i32) -> (i32, i32) {
    %c0_i32 = arith.constant 0 : i32
    return %arg0, %arg1 : i32, i32
  }
}

</mosaic_0001>

<bundles_post_ra>
// kernel: tpu_custom_call.1
= control target key start
LH: loop header
LB: loop body
LE: loop exit
PB: predicated region body
PF: predicated region fallthrough
CT: control target
= control target key end

     0   :  { %v5779_v0 = vmov 0   ;;  %vm4043_vm0 = vcmask 400384   ;;  %s8819_s0 = inlined_call_operand.vmem [shape: f32[2304,1], index: 0, kind: input, shape index: {}]   ;;  %s8820_s1 = inlined_call_operand.vmem [shape: f32[2304,49], index: 1, kind: input, shape index: {}]   ;;  %s8821_s2 = inlined_call_operand.vmem [shape: f32[2304,49], index: 2, kind: output, shape index: {}]  }
   0x1   :  { %4626 = vset.pattern.permute.xlu1 %v5779_v0  ;;  %4625 = vset.pattern.permute.xlu0 %v5779_v0  ;;  %v13_v1 = vld [vmem:[%s8819_s0 + $0x10] sm:$0xff]  ;;  %v11_v2 = vld [vmem:[%s8819_s0] sm:$0xff]  ;;  %v14_v3 = vld [vmem:[%s8819_s0 + $0x18] sm:$0xff] }
   0x2   :  { %v4338_v4 = vmul.f32 -1.442695, %v13_v1  ;;  %v4336_v5 = vmul.f32 -1.442695, %v11_v2  ;;  %v4339_v6 = vmul.f32 -1.442695, %v14_v3 }
   0x3   :  { %v12_v7 = vld [vmem:[%s8819_s0 + $0x8] sm:$0xff]  ;;  %v15_v9 = vld [vmem:[%s8819_s0 + $0x20] sm:$0xff]  ;;  %v18_v13 = vld [vmem:[%s8819_s0 + $0x38] sm:$0xff] }
   0x4   :  { %v16_v8 = vld [vmem:[%s8819_s0 + $0x28] sm:$0xff]  ;;  %4627 = vpow2.f32 %v4338_v4  ;;  %v4337_v10 = vmul.f32 -1.442695, %v12_v7  ;;  %v4340_v12 = vmul.f32 -1.442695, %v15_v9  ;;  %v17_v14 = vld [vmem:[%s8819_s0 + $0x30] sm:$0xff] }
   0x5   :  { %v4341_v11 = vmul.f32 -1.442695, %v16_v8  ;;  %4629 = vpow2.f32 %v4336_v5  ;;  %v20_v15 = vld [vmem:[%s8819_s0 + $0x48] sm:$0xff]  ;;  %v4343_v16 = vmul.f32 -1.442695, %v18_v13  ;;  %v19_v18 = vld [vmem:[%s8819_s0 + $0x40] sm:$0xff] }
   0x6   :  { %4631 = vpow2.f32 %v4339_v6  ;;  %v4342_v17 = vmul.f32 -1.442695, %v17_v14  ;;  %v22_v19 = vld [vmem:[%s8819_s0 + $0x58] sm:$0xff]  ;;  %v4345_v20 = vmul.f32 -1.442695, %v20_v15  ;;  %v21_v21 = vld [vmem:[%s8819_s0 + $0x50] sm:$0xff] }
   0x7   :  { %4633 = vpow2.f32 %v4337_v10  ;;  %v4344_v22 = vmul.f32 -1.442695, %v19_v18  ;;  %v24_v23 = vld [vmem:[%s8819_s0 + $0x68] sm:$0xff]  ;;  %v4347_v24 = vmul.f32 -1.442695, %v22_v19  ;;  %v23_v25 = vld [vmem:[%s8819_s0 + $0x60] sm:$0xff] }
   0x8   :  { %4635 = vpow2.f32 %v4341_v11  ;;  %v4346_v26 = vmul.f32 -1.442695, %v21_v21  ;;  %v26_v27 = vld [vmem:[%s8819_s0 + $0x78] sm:$0xff]  ;;  %v4349_v28 = vmul.f32 -1.442695, %v24_v23  ;;  %v25_v29 = vld [vmem:[%s8819_s0 + $0x70] sm:$0xff] }
   0x9   :  { %4637 = vpow2.f32 %v4340_v12  ;;  %v4348_v30 = vmul.f32 -1.442695, %v23_v25  ;;  %v4351_v31 = vmul.f32 -1.442695, %v26_v27  ;;  %v4350_v32 = vmul.f32 -1.442695, %v25_v29 }
   0xa   :  { %4639 = vpow2.f32 %v4343_v16  ;;  %v28_v58 = vld [vmem:[%s8819_s0 + $0x88] sm:$0xff]  ;;  %v27_v61 = vld [vmem:[%s8819_s0 + $0x80] sm:$0xff]  ;;  %v30_v0 = vld [vmem:[%s8819_s0 + $0x98] sm:$0xff] }
   0xb   :  { %4641 = vpow2.f32 %v4342_v17  ;;  %v4353_v3 = vmul.f32 -1.442695, %v28_v58  ;;  %v29_v4 = vld [vmem:[%s8819_s0 + $0x90] sm:$0xff]  ;;  %v4352_v7 = vmul.f32 -1.442695, %v27_v61  ;;  %v32_v8 = vld [vmem:[%s8819_s0 + $0xa8] sm:$0xff] }
   0xc   :  { %4643 = vpow2.f32 %v4345_v20  ;;  %v4355_v10 = vmul.f32 -1.442695, %v30_v0  ;;  %v31_v11 = vld [vmem:[%s8819_s0 + $0xa0] sm:$0xff]  ;;  %v4354_v13 = vmul.f32 -1.442695, %v29_v4  ;;  %v34_v14 = vld [vmem:[%s8819_s0 + $0xb8] sm:$0xff] }
   0xd   :  { %4645 = vpow2.f32 %v4344_v22  ;;  %v4357_v16 = vmul.f32 -1.442695, %v32_v8  ;;  %v33_v17 = vld [vmem:[%s8819_s0 + $0xb0] sm:$0xff]  ;;  %v4356_v19 = vmul.f32 -1.442695, %v31_v11  ;;  %v36_v20 = vld [vmem:[%s8819_s0 + $0xc8] sm:$0xff] }
   0xe   :  { %4647 = vpow2.f32 %v4347_v24  ;;  %v4359_v22 = vmul.f32 -1.442695, %v34_v14  ;;  %v35_v23 = vld [vmem:[%s8819_s0 + $0xc0] sm:$0xff]  ;;  %v4358_v25 = vmul.f32 -1.442695, %v33_v17  ;;  %v37_v29 = vld [vmem:[%s8819_s0 + $0xd0] sm:$0xff] }
   0xf   :  { %4649 = vpow2.f32 %v4346_v26  ;;  %v38_v26 = vld [vmem:[%s8819_s0 + $0xd8] sm:$0xff] }
  0x10   :  { %4651 = vpow2.f32 %v4349_v28  ;;  %v4361_v28 = vmul.f32 -1.442695, %v36_v20  ;;  %v45_v20 = vld [vmem:[%s8819_s0 + $0x110] sm:$0xff] }
  0x11   :  { %v4628_v33 = vpop.eup %4627  ;;  %4653 = vpow2.f32 %v4348_v30 }
  0x12   :  { %v4630_v34 = vpop.eup %4629  ;;  %v1165_v35 = vadd.f32 1.0, %v4628_v33  ;;  %4655 = vpow2.f32 %v4351_v31  ;;  %v4360_v31 = vmul.f32 -1.442695, %v35_v23 }
  0x13   :  { %v4632_v36 = vpop.eup %4631  ;;  %v1163_v37 = vadd.f32 1.0, %v4630_v34  ;;  %4657 = vpow2.f32 %v4350_v32  ;;  %v40_v32 = vld [vmem:[%s8819_s0 + $0xe8] sm:$0xff]  ;;  %v4363_v34 = vmul.f32 -1.442695, %v38_v26 }
  0x14   :  { %v4634_v38 = vpop.eup %4633  ;;  %4659 = vrcp.f32 %v1165_v35  ;;  %v1166_v39 = vadd.f32 1.0, %v4632_v36  ;;  %v39_v35 = vld [vmem:[%s8819_s0 + $0xe0] sm:$0xff] }
  0x15   :  { %v4636_v40 = vpop.eup %4635  ;;  %4661 = vrcp.f32 %v1163_v37  ;;  %v1164_v41 = vadd.f32 1.0, %v4634_v38  ;;  %v4362_v37 = vmul.f32 -1.442695, %v37_v29  ;;  %v42_v38 = vld [vmem:[%s8819_s0 + $0xf8] sm:$0xff]  ;;  %v4370_v29 = vmul.f32 -1.442695, %v45_v20 }
  0x16   :  { %v4638_v42 = vpop.eup %4637  ;;  %4663 = vrcp.f32 %v1166_v39  ;;  %v1168_v43 = vadd.f32 1.0, %v4636_v40  ;;  %v4365_v40 = vmul.f32 -1.442695, %v40_v32 }
  0x17   :  { %v4640_v44 = vpop.eup %4639  ;;  %4665 = vrcp.f32 %v1164_v41  ;;  %v1167_v45 = vadd.f32 1.0, %v4638_v42  ;;  %v41_v41 = vld [vmem:[%s8819_s0 + $0xf0] sm:$0xff] }
  0x18   :  { %v4642_v46 = vpop.eup %4641  ;;  %4667 = vrcp.f32 %v1168_v43  ;;  %v1170_v47 = vadd.f32 1.0, %v4640_v44  ;;  %v4364_v43 = vmul.f32 -1.442695, %v39_v35 }
  0x19   :  { %v4644_v48 = vpop.eup %4643  ;;  %4669 = vrcp.f32 %v1167_v45  ;;  %v1169_v49 = vadd.f32 1.0, %v4642_v46  ;;  %v4367_v45 = vmul.f32 -1.442695, %v42_v38 }
  0x1a   :  { %v4646_v50 = vpop.eup %4645  ;;  %4671 = vrcp.f32 %v1170_v47  ;;  %v1172_v51 = vadd.f32 1.0, %v4644_v48  ;;  %v4366_v47 = vmul.f32 -1.442695, %v41_v41 }
  0x1b   :  { %v4648_v52 = vpop.eup %4647  ;;  %4673 = vrcp.f32 %v1169_v49  ;;  %v1171_v53 = vadd.f32 1.0, %v4646_v50 }
  0x1c   :  { %v4650_v54 = vpop.eup %4649  ;;  %4675 = vrcp.f32 %v1172_v51  ;;  %v1174_v55 = vadd.f32 1.0, %v4648_v52 }
  0x1d   :  { %v4652_v56 = vpop.eup %4651  ;;  %4677 = vrcp.f32 %v1171_v53  ;;  %v1173_v57 = vadd.f32 1.0, %v4650_v54 }
  0x1e   :  { %v4654_v59 = vpop.eup %4653  ;;  %4679 = vrcp.f32 %v1174_v55  ;;  %v1176_v60 = vadd.f32 1.0, %v4652_v56 }
  0x1f   :  { %v4656_v62 = vpop.eup %4655  ;;  %4681 = vrcp.f32 %v1173_v57  ;;  %v1175_v63 = vadd.f32 1.0, %v4654_v59 }
  0x20   :  { %v4658_v1 = vpop.eup %4657  ;;  %4683 = vrcp.f32 %v1176_v60  ;;  %v1178_v2 = vadd.f32 1.0, %v4656_v62 }
  0x21   :  { %v4660_v5 = vpop.eup %4659  ;;  %4685 = vrcp.f32 %v1175_v63  ;;  %v1177_v6 = vadd.f32 1.0, %v4658_v1 }
  0x22   :  { %v4662_v9 = vpop.eup %4661  ;;  %2327 = vperm.xlu1 %4626, %v4660_v5   ;;  %4687 = vrcp.f32 %v1178_v2 }
  0x23   :  { %v4664_v12 = vpop.eup %4663  ;;  %2317 = vperm.xlu0 %4625, %v4662_v9   ;;  %4689 = vrcp.f32 %v1177_v6 }
  0x24   :  { %v4666_v15 = vpop.eup %4665  ;;  %4691 = vpow2.f32 %v4353_v3 }
  0x25   :  { %v4668_v18 = vpop.eup %4667  ;;  %4693 = vpow2.f32 %v4352_v7 }
  0x26   :  { %v4670_v21 = vpop.eup %4669  ;;  %2332 = vperm.xlu1 %4626, %v4664_v12   ;;  %4695 = vpow2.f32 %v4355_v10  ;;  %v44_v10 = vld [vmem:[%s8819_s0 + $0x108] sm:$0xff] }
  0x27   :  { %v4672_v24 = vpop.eup %4671  ;;  %2322 = vperm.xlu0 %4625, %v4666_v15   ;;  %4697 = vpow2.f32 %v4354_v13  ;;  %v43_v13 = vld [vmem:[%s8819_s0 + $0x100] sm:$0xff] }
  0x28   :  { %v4674_v27 = vpop.eup %4673  ;;  %4699 = vpow2.f32 %v4357_v16  ;;  %v46_v16 = vld [vmem:[%s8819_s0 + $0x118] sm:$0xff]  ;;  %v4368_v23 = vmul.f32 -1.442695, %v43_v13 }
  0x29   :  { %v4676_v30 = vpop.eup %4675  ;;  %4701 = vpow2.f32 %v4356_v19  ;;  %v4369_v19 = vmul.f32 -1.442695, %v44_v10  ;;  %v4371_v26 = vmul.f32 -1.442695, %v46_v16 }
  0x2a   :  { %v4678_v33 = vpop.eup %4677  ;;  %2342 = vperm.xlu1 %4626, %v4668_v18   ;;  %4703 = vpow2.f32 %v4359_v22 }
  0x2b   :  { %v4680_v36 = vpop.eup %4679  ;;  %2337 = vperm.xlu0 %4625, %v4670_v21   ;;  %4705 = vpow2.f32 %v4358_v25 }
  0x2c   :  { %v4682_v39 = vpop.eup %4681  ;;  %4707 = vpow2.f32 %v4361_v28 }
  0x2d   :  { %v4684_v42 = vpop.eup %4683  ;;  %4709 = vpow2.f32 %v4360_v31 }
  0x2e   :  { %v4686_v44 = vpop.eup %4685  ;;  %2352 = vperm.xlu1 %4626, %v4672_v24   ;;  %4711 = vpow2.f32 %v4363_v34  ;;  %v48_v24 = vld [vmem:[%s8819_s0 + $0x128] sm:$0xff] }
  0x2f   :  { %v4688_v46 = vpop.eup %4687  ;;  %2347 = vperm.xlu0 %4625, %v4674_v27   ;;  %4713 = vpow2.f32 %v4362_v37  ;;  %v47_v27 = vld [vmem:[%s8819_s0 + $0x120] sm:$0xff]  ;;  %v4373_v32 = vmul.f32 -1.442695, %v48_v24 }
  0x30   :  { %v4690_v48 = vpop.eup %4689  ;;  %4715 = vpow2.f32 %v4365_v40  ;;  %v4372_v35 = vmul.f32 -1.442695, %v47_v27 }
  0x31   :  { %v4692_v49 = vpop.eup %4691  ;;  %4717 = vpow2.f32 %v4364_v43 }
  0x32   :  { %v4694_v50 = vpop.eup %4693  ;;  %2362 = vperm.xlu1 %4626, %v4676_v30   ;;  %v1180_v51 = vadd.f32 1.0, %v4692_v49  ;;  %4719 = vpow2.f32 %v4367_v45  ;;  %v50_v30 = vld [vmem:[%s8819_s0 + $0x138] sm:$0xff]  ;;  %v53_v45 = vld [vmem:[%s8819_s0 + $0x150] sm:$0xff] }
  0x33   :  { %v4696_v52 = vpop.eup %4695  ;;  %2357 = vperm.xlu0 %4625, %v4678_v33   ;;  %v1179_v53 = vadd.f32 1.0, %v4694_v50  ;;  %4721 = vpow2.f32 %v4366_v47  ;;  %v49_v33 = vld [vmem:[%s8819_s0 + $0x130] sm:$0xff]  ;;  %v4375_v38 = vmul.f32 -1.442695, %v50_v30 }
  0x34   :  { %v4698_v54 = vpop.eup %4697  ;;  %4723 = vrcp.f32 %v1180_v51  ;;  %v1182_v55 = vadd.f32 1.0, %v4696_v52  ;;  %v4374_v41 = vmul.f32 -1.442695, %v49_v33  ;;  %v55_v51 = vld [vmem:[%s8819_s0 + $0x160] sm:$0xff] }
  0x35   :  { %v4700_v56 = vpop.eup %4699  ;;  %4725 = vrcp.f32 %v1179_v53  ;;  %v1181_v57 = vadd.f32 1.0, %v4698_v54  ;;  %v4378_v53 = vmul.f32 -1.442695, %v53_v45  ;;  %v58_v54 = vld [vmem:[%s8819_s0 + $0x178] sm:$0xff] }
  0x36   :  { %v4702_v58 = vpop.eup %4701  ;;  %2372 = vperm.xlu1 %4626, %v4680_v36   ;;  %4727 = vrcp.f32 %v1182_v55  ;;  %v1184_v59 = vadd.f32 1.0, %v4700_v56  ;;  %v52_v36 = vld [vmem:[%s8819_s0 + $0x148] sm:$0xff] }
  0x37   :  { %v4704_v60 = vpop.eup %4703  ;;  %2367 = vperm.xlu0 %4625, %v4682_v39   ;;  %4729 = vrcp.f32 %v1181_v57  ;;  %v1183_v61 = vadd.f32 1.0, %v4702_v58  ;;  %v51_v39 = vld [vmem:[%s8819_s0 + $0x140] sm:$0xff]  ;;  %v57_v57 = vld [vmem:[%s8819_s0 + $0x170] sm:$0xff] }
  0x38   :  { %v4706_v62 = vpop.eup %4705  ;;  %4731 = vrcp.f32 %v1184_v59  ;;  %v1186_v63 = vadd.f32 1.0, %v4704_v60  ;;  %v4376_v47 = vmul.f32 -1.442695, %v51_v39  ;;  %v4380_v59 = vmul.f32 -1.442695, %v55_v51 }
  0x39   :  { %v4708_v0 = vpop.eup %4707  ;;  %4733 = vrcp.f32 %v1183_v61  ;;  %v1185_v1 = vadd.f32 1.0, %v4706_v62  ;;  %v4383_v61 = vmul.f32 -1.442695, %v58_v54 }
  0x3a   :  { %v4710_v2 = vpop.eup %4709  ;;  %2382 = vperm.xlu1 %4626, %v4684_v42   ;;  %4735 = vrcp.f32 %v1186_v63  ;;  %v1188_v3 = vadd.f32 1.0, %v4708_v0  ;;  %v54_v42 = vld [vmem:[%s8819_s0 + $0x158] sm:$0xff]  ;;  %v4382_v63 = vmul.f32 -1.442695, %v57_v57 }
  0x3b   :  { %v4712_v4 = vpop.eup %4711  ;;  %2377 = vperm.xlu0 %4625, %v4686_v44   ;;  %4737 = vrcp.f32 %v1185_v1  ;;  %v1187_v5 = vadd.f32 1.0, %v4710_v2  ;;  %v4377_v44 = vmul.f32 -1.442695, %v52_v36  ;;  %v4379_v50 = vmul.f32 -1.442695, %v54_v42  ;;  %v61_v36 = vld [vmem:[%s8819_s0 + $0x190] sm:$0xff] }
  0x3c   :  { %v4714_v6 = vpop.eup %4713  ;;  %4739 = vrcp.f32 %v1188_v3  ;;  %v1190_v7 = vadd.f32 1.0, %v4712_v4  ;;  %v4386_v45 = vmul.f32 -1.442695, %v61_v36 }
  0x3d   :  { %v4716_v8 = vpop.eup %4715  ;;  %4741 = vrcp.f32 %v1187_v5  ;;  %v1189_v9 = vadd.f32 1.0, %v4714_v6 }
  0x3e   :  { %v4718_v11 = vpop.eup %4717  ;;  %2392 = vperm.xlu1 %4626, %v4688_v46   ;;  %4743 = vrcp.f32 %v1190_v7  ;;  %v1192_v12 = vadd.f32 1.0, %v4716_v8 }
  0x3f   :  { %v4720_v14 = vpop.eup %4719  ;;  %2387 = vperm.xlu0 %4625, %v4690_v48   ;;  %4745 = vrcp.f32 %v1189_v9  ;;  %v1191_v15 = vadd.f32 1.0, %v4718_v11  ;;  %v56_v48 = vld [vmem:[%s8819_s0 + $0x168] sm:$0xff] }
  0x40   :  { %v4722_v17 = vpop.eup %4721  ;;  %4747 = vrcp.f32 %v1192_v12  ;;  %v1194_v18 = vadd.f32 1.0, %v4720_v14  ;;  %v4381_v56 = vmul.f32 -1.442695, %v56_v48 }
  0x41   :  { %v4724_v21 = vpop.eup %4723  ;;  %4749 = vrcp.f32 %v1191_v15  ;;  %v1193_v22 = vadd.f32 1.0, %v4722_v17 }
  0x42   :  { %v4726_v25 = vpop.eup %4725  ;;  %2402 = vperm.xlu1 %4626, %v4724_v21   ;;  %4751 = vrcp.f32 %v1194_v18 }
  0x43   :  { %v4728_v28 = vpop.eup %4727  ;;  %2397 = vperm.xlu0 %4625, %v4726_v25   ;;  %4753 = vrcp.f32 %v1193_v22 }
  0x44   :  { %v4730_v31 = vpop.eup %4729  ;;  %4755 = vpow2.f32 %v4369_v19 }
  0x45   :  { %v4732_v34 = vpop.eup %4731  ;;  %4757 = vpow2.f32 %v4368_v23 }
  0x46   :  { %v4734_v37 = vpop.eup %4733  ;;  %2412 = vperm.xlu1 %4626, %v4728_v28   ;;  %4759 = vpow2.f32 %v4371_v26  ;;  %v60_v26 = vld [vmem:[%s8819_s0 + $0x188] sm:$0xff] }
  0x47   :  { %v4736_v40 = vpop.eup %4735  ;;  %2407 = vperm.xlu0 %4625, %v4730_v31   ;;  %4761 = vpow2.f32 %v4370_v29  ;;  %v59_v29 = vld [vmem:[%s8819_s0 + $0x180] sm:$0xff] }
  0x48   :  { %v4738_v43 = vpop.eup %4737  ;;  %4763 = vpow2.f32 %v4373_v32  ;;  %v62_v32 = vld [vmem:[%s8819_s0 + $0x198] sm:$0xff]  ;;  %v4384_v39 = vmul.f32 -1.442695, %v59_v29 }
  0x49   :  { %v4740_v46 = vpop.eup %4739  ;;  %4765 = vpow2.f32 %v4372_v35  ;;  %v4385_v35 = vmul.f32 -1.442695, %v60_v26  ;;  %v4387_v42 = vmul.f32 -1.442695, %v62_v32 }
  0x4a   :  { %v4742_v49 = vpop.eup %4741  ;;  %2422 = vperm.xlu1 %4626, %v4732_v34   ;;  %4767 = vpow2.f32 %v4375_v38 }
  0x4b   :  { %v4744_v52 = vpop.eup %4743  ;;  %2417 = vperm.xlu0 %4625, %v4734_v37   ;;  %4769 = vpow2.f32 %v4374_v41 }
  0x4c   :  { %v4746_v55 = vpop.eup %4745  ;;  %4771 = vpow2.f32 %v4377_v44 }
  0x4d   :  { %v4748_v58 = vpop.eup %4747  ;;  %4773 = vpow2.f32 %v4376_v47 }
  0x4e   :  { %v4750_v60 = vpop.eup %4749  ;;  %2432 = vperm.xlu1 %4626, %v4736_v40   ;;  %4775 = vpow2.f32 %v4379_v50  ;;  %v64_v40 = vld [vmem:[%s8819_s0 + $0x1a8] sm:$0xff] }
  0x4f   :  { %v4752_v62 = vpop.eup %4751  ;;  %2427 = vperm.xlu0 %4625, %v4738_v43   ;;  %4777 = vpow2.f32 %v4378_v53  ;;  %v63_v43 = vld [vmem:[%s8819_s0 + $0x1a0] sm:$0xff]  ;;  %v4389_v48 = vmul.f32 -1.442695, %v64_v40 }
  0x50   :  { %v4754_v0 = vpop.eup %4753  ;;  %4779 = vpow2.f32 %v4381_v56  ;;  %v4388_v51 = vmul.f32 -1.442695, %v63_v43 }
  0x51   :  { %v4756_v1 = vpop.eup %4755  ;;  %4781 = vpow2.f32 %v4380_v59 }
  0x52   :  { %v4758_v2 = vpop.eup %4757  ;;  %2442 = vperm.xlu1 %4626, %v4740_v46   ;;  %v1196_v3 = vadd.f32 1.0, %v4756_v1  ;;  %4783 = vpow2.f32 %v4383_v61  ;;  %v66_v46 = vld [vmem:[%s8819_s0 + $0x1b8] sm:$0xff]  ;;  %v69_v61 = vld [vmem:[%s8819_s0 + $0x1d0] sm:$0xff] }
  0x53   :  { %v4760_v4 = vpop.eup %4759  ;;  %2437 = vperm.xlu0 %4625, %v4742_v49   ;;  %v1195_v5 = vadd.f32 1.0, %v4758_v2  ;;  %4785 = vpow2.f32 %v4382_v63  ;;  %v65_v49 = vld [vmem:[%s8819_s0 + $0x1b0] sm:$0xff]  ;;  %v4391_v54 = vmul.f32 -1.442695, %v66_v46 }
  0x54   :  { %v4762_v6 = vpop.eup %4761  ;;  %4787 = vrcp.f32 %v1196_v3  ;;  %v1198_v7 = vadd.f32 1.0, %v4760_v4  ;;  %v4390_v57 = vmul.f32 -1.442695, %v65_v49  ;;  %v71_v3 = vld [vmem:[%s8819_s0 + $0x1e0] sm:$0xff] }
  0x55   :  { %v4764_v8 = vpop.eup %4763  ;;  %4789 = vrcp.f32 %v1195_v5  ;;  %v1197_v9 = vadd.f32 1.0, %v4762_v6  ;;  %v4394_v5 = vmul.f32 -1.442695, %v69_v61  ;;  %v74_v6 = vld [vmem:[%s8819_s0 + $0x1f8] sm:$0xff] }
  0x56   :  { %v4766_v10 = vpop.eup %4765  ;;  %2452 = vperm.xlu1 %4626, %v4744_v52   ;;  %4791 = vrcp.f32 %v1198_v7  ;;  %v1200_v11 = vadd.f32 1.0, %v4764_v8  ;;  %v68_v52 = vld [vmem:[%s8819_s0 + $0x1c8] sm:$0xff] }
  0x57   :  { %v4768_v12 = vpop.eup %4767  ;;  %2447 = vperm.xlu0 %4625, %v4746_v55   ;;  %4793 = vrcp.f32 %v1197_v9  ;;  %v1199_v13 = vadd.f32 1.0, %v4766_v10  ;;  %v67_v55 = vld [vmem:[%s8819_s0 + $0x1c0] sm:$0xff]  ;;  %v73_v9 = vld [vmem:[%s8819_s0 + $0x1f0] sm:$0xff] }
  0x58   :  { %v4770_v14 = vpop.eup %4769  ;;  %4795 = vrcp.f32 %v1200_v11  ;;  %v1202_v15 = vadd.f32 1.0, %v4768_v12  ;;  %v4392_v63 = vmul.f32 -1.442695, %v67_v55  ;;  %v4396_v11 = vmul.f32 -1.442695, %v71_v3 }
  0x59   :  { %v4772_v16 = vpop.eup %4771  ;;  %4797 = vrcp.f32 %v1199_v13  ;;  %v1201_v17 = vadd.f32 1.0, %v4770_v14  ;;  %v4399_v13 = vmul.f32 -1.442695, %v74_v6 }
  0x5a   :  { %v4774_v18 = vpop.eup %4773  ;;  %2462 = vperm.xlu1 %4626, %v4748_v58   ;;  %4799 = vrcp.f32 %v1202_v15  ;;  %v1204_v19 = vadd.f32 1.0, %v4772_v16  ;;  %v70_v58 = vld [vmem:[%s8819_s0 + $0x1d8] sm:$0xff]  ;;  %v4398_v15 = vmul.f32 -1.442695, %v73_v9 }
  0x5b   :  { %v4776_v20 = vpop.eup %4775  ;;  %2457 = vperm.xlu0 %4625, %v4750_v60   ;;  %4801 = vrcp.f32 %v1201_v17  ;;  %v1203_v21 = vadd.f32 1.0, %v4774_v18  ;;  %v4393_v60 = vmul.f32 -1.442695, %v68_v52  ;;  %v4395_v2 = vmul.f32 -1.442695, %v70_v58  ;;  %v77_v52 = vld [vmem:[%s8819_s0 + $0x210] sm:$0xff] }
  0x5c   :  { %v4778_v22 = vpop.eup %4777  ;;  %4803 = vrcp.f32 %v1204_v19  ;;  %v1206_v23 = vadd.f32 1.0, %v4776_v20  ;;  %v4402_v61 = vmul.f32 -1.442695, %v77_v52 }
  0x5d   :  { %v4780_v24 = vpop.eup %4779  ;;  %4805 = vrcp.f32 %v1203_v21  ;;  %v1205_v25 = vadd.f32 1.0, %v4778_v22 }
  0x5e   :  { %v4782_v27 = vpop.eup %4781  ;;  %2472 = vperm.xlu1 %4626, %v4752_v62   ;;  %4807 = vrcp.f32 %v1206_v23  ;;  %v1208_v28 = vadd.f32 1.0, %v4780_v24 }
  0x5f   :  { %v4784_v30 = vpop.eup %4783  ;;  %2467 = vperm.xlu0 %4625, %v4754_v0   ;;  %4809 = vrcp.f32 %v1205_v25  ;;  %v1207_v31 = vadd.f32 1.0, %v4782_v27  ;;  %v72_v0 = vld [vmem:[%s8819_s0 + $0x1e8] sm:$0xff] }
  0x60   :  { %v4786_v33 = vpop.eup %4785  ;;  %4811 = vrcp.f32 %v1208_v28  ;;  %v1210_v34 = vadd.f32 1.0, %v4784_v30  ;;  %v4397_v8 = vmul.f32 -1.442695, %v72_v0 }
  0x61   :  { %v4788_v37 = vpop.eup %4787  ;;  %4813 = vrcp.f32 %v1207_v31  ;;  %v1209_v38 = vadd.f32 1.0, %v4786_v33 }
  0x62   :  { %v4790_v41 = vpop.eup %4789  ;;  %2482 = vperm.xlu1 %4626, %v4788_v37   ;;  %4815 = vrcp.f32 %v1210_v34 }
  0x63   :  { %v4792_v44 = vpop.eup %4791  ;;  %2477 = vperm.xlu0 %4625, %v4790_v41   ;;  %4817 = vrcp.f32 %v1209_v38 }
  0x64   :  { %v4794_v47 = vpop.eup %4793  ;;  %4819 = vpow2.f32 %v4385_v35 }
  0x65   :  { %v4796_v50 = vpop.eup %4795  ;;  %4821 = vpow2.f32 %v4384_v39 }
  0x66   :  { %v4798_v53 = vpop.eup %4797  ;;  %2492 = vperm.xlu1 %4626, %v4792_v44   ;;  %4823 = vpow2.f32 %v4387_v42  ;;  %v76_v42 = vld [vmem:[%s8819_s0 + $0x208] sm:$0xff] }
  0x67   :  { %v4800_v56 = vpop.eup %4799  ;;  %2487 = vperm.xlu0 %4625, %v4794_v47   ;;  %4825 = vpow2.f32 %v4386_v45  ;;  %v75_v45 = vld [vmem:[%s8819_s0 + $0x200] sm:$0xff] }
  0x68   :  { %v4802_v59 = vpop.eup %4801  ;;  %4827 = vpow2.f32 %v4389_v48  ;;  %v78_v48 = vld [vmem:[%s8819_s0 + $0x218] sm:$0xff]  ;;  %v4400_v55 = vmul.f32 -1.442695, %v75_v45 }
  0x69   :  { %v4804_v62 = vpop.eup %4803  ;;  %4829 = vpow2.f32 %v4388_v51  ;;  %v4401_v51 = vmul.f32 -1.442695, %v76_v42  ;;  %v4403_v58 = vmul.f32 -1.442695, %v78_v48 }
  0x6a   :  { %v4806_v1 = vpop.eup %4805  ;;  %2502 = vperm.xlu1 %4626, %v4796_v50   ;;  %4831 = vpow2.f32 %v4391_v54 }
  0x6b   :  { %v4808_v4 = vpop.eup %4807  ;;  %2497 = vperm.xlu0 %4625, %v4798_v53   ;;  %4833 = vpow2.f32 %v4390_v57 }
  0x6c   :  { %v4810_v7 = vpop.eup %4809  ;;  %4835 = vpow2.f32 %v4393_v60 }
  0x6d   :  { %v4812_v10 = vpop.eup %4811  ;;  %4837 = vpow2.f32 %v4392_v63 }
  0x6e   :  { %v4814_v12 = vpop.eup %4813  ;;  %2512 = vperm.xlu1 %4626, %v4800_v56   ;;  %4839 = vpow2.f32 %v4395_v2  ;;  %v80_v56 = vld [vmem:[%s8819_s0 + $0x228] sm:$0xff] }
  0x6f   :  { %v4816_v14 = vpop.eup %4815  ;;  %2507 = vperm.xlu0 %4625, %v4802_v59   ;;  %4841 = vpow2.f32 %v4394_v5  ;;  %v79_v59 = vld [vmem:[%s8819_s0 + $0x220] sm:$0xff]  ;;  %v4405_v0 = vmul.f32 -1.442695, %v80_v56 }
  0x70   :  { %v4818_v16 = vpop.eup %4817  ;;  %4843 = vpow2.f32 %v4397_v8  ;;  %v4404_v3 = vmul.f32 -1.442695, %v79_v59  ;;  %v2027_v56 = vld [vmem:[%s8820_s1] sm:$0xff] }
  0x71   :  { %v4820_v17 = vpop.eup %4819  ;;  %4845 = vpow2.f32 %v4396_v11 }
  0x72   :  { %v4822_v18 = vpop.eup %4821  ;;  %2522 = vperm.xlu1 %4626, %v4804_v62   ;;  %v1212_v19 = vadd.f32 1.0, %v4820_v17  ;;  %4847 = vpow2.f32 %v4399_v13  ;;  %v82_v62 = vld [vmem:[%s8819_s0 + $0x238] sm:$0xff]  ;;  %v85_v13 = vld [vmem:[%s8819_s0 + $0x250] sm:$0xff] }
  0x73   :  { %v4824_v20 = vpop.eup %4823  ;;  %2517 = vperm.xlu0 %4625, %v4806_v1   ;;  %v1211_v21 = vadd.f32 1.0, %v4822_v18  ;;  %4849 = vpow2.f32 %v4398_v15  ;;  %v81_v1 = vld [vmem:[%s8819_s0 + $0x230] sm:$0xff]  ;;  %v4407_v6 = vmul.f32 -1.442695, %v82_v62 }
  0x74   :  { %v4826_v22 = vpop.eup %4825  ;;  %4851 = vrcp.f32 %v1212_v19  ;;  %v1214_v23 = vadd.f32 1.0, %v4824_v20  ;;  %v4406_v9 = vmul.f32 -1.442695, %v81_v1  ;;  %v87_v19 = vld [vmem:[%s8819_s0 + $0x260] sm:$0xff] }
  0x75   :  { %v4828_v24 = vpop.eup %4827  ;;  %4853 = vrcp.f32 %v1211_v21  ;;  %v1213_v25 = vadd.f32 1.0, %v4826_v22  ;;  %v4410_v21 = vmul.f32 -1.442695, %v85_v13  ;;  %v90_v22 = vld [vmem:[%s8819_s0 + $0x278] sm:$0xff] }
  0x76   :  { %v4830_v26 = vpop.eup %4829  ;;  %2532 = vperm.xlu1 %4626, %v4808_v4   ;;  %4855 = vrcp.f32 %v1214_v23  ;;  %v1216_v27 = vadd.f32 1.0, %v4828_v24  ;;  %v84_v4 = vld [vmem:[%s8819_s0 + $0x248] sm:$0xff] }
  0x77   :  { %v4832_v28 = vpop.eup %4831  ;;  %2527 = vperm.xlu0 %4625, %v4810_v7   ;;  %4857 = vrcp.f32 %v1213_v25  ;;  %v1215_v29 = vadd.f32 1.0, %v4830_v26  ;;  %v83_v7 = vld [vmem:[%s8819_s0 + $0x240] sm:$0xff]  ;;  %v89_v25 = vld [vmem:[%s8819_s0 + $0x270] sm:$0xff] }
  0x78   :  { %v4834_v30 = vpop.eup %4833  ;;  %4859 = vrcp.f32 %v1216_v27  ;;  %v1218_v31 = vadd.f32 1.0, %v4832_v28  ;;  %v4408_v15 = vmul.f32 -1.442695, %v83_v7  ;;  %v4412_v27 = vmul.f32 -1.442695, %v87_v19  ;;  %v94_v7 = vld [vmem:[%s8819_s0 + $0x298] sm:$0xff] }
  0x79   :  { %v4836_v32 = vpop.eup %4835  ;;  %4861 = vrcp.f32 %v1215_v29  ;;  %v1217_v33 = vadd.f32 1.0, %v4834_v30  ;;  %v4415_v29 = vmul.f32 -1.442695, %v90_v22  ;;  %v95_v22 = vld [vmem:[%s8819_s0 + $0x2a0] sm:$0xff] }
  0x7a   :  { %v4838_v34 = vpop.eup %4837  ;;  %2542 = vperm.xlu1 %4626, %v4812_v10   ;;  %4863 = vrcp.f32 %v1218_v31  ;;  %v1220_v35 = vadd.f32 1.0, %v4836_v32  ;;  %v86_v10 = vld [vmem:[%s8819_s0 + $0x258] sm:$0xff]  ;;  %v4414_v31 = vmul.f32 -1.442695, %v89_v25  ;;  %v2032_v25 = vld [vmem:[%s8820_s1 + $0x28] sm:$0xff] }
  0x7b   :  { %v4840_v36 = vpop.eup %4839  ;;  %2537 = vperm.xlu0 %4625, %v4814_v12   ;;  %4865 = vrcp.f32 %v1217_v33  ;;  %v1219_v37 = vadd.f32 1.0, %v4838_v34  ;;  %v4409_v12 = vmul.f32 -1.442695, %v84_v4  ;;  %v4411_v18 = vmul.f32 -1.442695, %v86_v10 }
  0x7c   :  { %v4842_v38 = vpop.eup %4841  ;;  %4867 = vrcp.f32 %v1220_v35  ;;  %v1222_v39 = vadd.f32 1.0, %v4840_v36 }
  0x7d   :  { %v4844_v40 = vpop.eup %4843  ;;  %4869 = vrcp.f32 %v1219_v37  ;;  %v1221_v41 = vadd.f32 1.0, %v4842_v38 }
  0x7e   :  { %v4846_v43 = vpop.eup %4845  ;;  %2552 = vperm.xlu1 %4626, %v4816_v14   ;;  %4871 = vrcp.f32 %v1222_v39  ;;  %v1224_v44 = vadd.f32 1.0, %v4844_v40 }
  0x7f   :  { %v4848_v46 = vpop.eup %4847  ;;  %2547 = vperm.xlu0 %4625, %v4818_v16   ;;  %4873 = vrcp.f32 %v1221_v41  ;;  %v1223_v47 = vadd.f32 1.0, %v4846_v43  ;;  %v88_v16 = vld [vmem:[%s8819_s0 + $0x268] sm:$0xff] }
  0x80   :  { %v4850_v49 = vpop.eup %4849  ;;  %4875 = vrcp.f32 %v1224_v44  ;;  %v1226_v50 = vadd.f32 1.0, %v4848_v46  ;;  %v4413_v24 = vmul.f32 -1.442695, %v88_v16 }
  0x81   :  { %v4852_v53 = vpop.eup %4851  ;;  %4877 = vrcp.f32 %v1223_v47  ;;  %v1225_v54 = vadd.f32 1.0, %v4850_v49 }
  0x82   :  { %v4854_v57 = vpop.eup %4853  ;;  %2562 = vperm.xlu1 %4626, %v4852_v53   ;;  %4879 = vrcp.f32 %v1226_v50  ;;  %v2029_v53 = vld [vmem:[%s8820_s1 + $0x10] sm:$0xff] }
  0x83   :  { %v4856_v60 = vpop.eup %4855  ;;  %2557 = vperm.xlu0 %4625, %v4854_v57   ;;  %4881 = vrcp.f32 %v1225_v54 }
  0x84   :  { %v4858_v63 = vpop.eup %4857  ;;  %4883 = vpow2.f32 %v4401_v51 }
  0x85   :  { %v4860_v2 = vpop.eup %4859  ;;  %4885 = vpow2.f32 %v4400_v55 }
  0x86   :  { %v4862_v5 = vpop.eup %4861  ;;  %2572 = vperm.xlu1 %4626, %v4856_v60   ;;  %4887 = vpow2.f32 %v4403_v58 }
  0x87   :  { %v4864_v8 = vpop.eup %4863  ;;  %2567 = vperm.xlu0 %4625, %v4858_v63   ;;  %4889 = vpow2.f32 %v4402_v61  ;;  %v92_v61 = vld [vmem:[%s8819_s0 + $0x288] sm:$0xff] }
  0x88   :  { %v4866_v11 = vpop.eup %4865  ;;  %4891 = vpow2.f32 %v4405_v0 }
  0x89   :  { %v4868_v14 = vpop.eup %4867  ;;  %4893 = vpow2.f32 %v4404_v3 }
  0x8a   :  { %v4870_v17 = vpop.eup %4869  ;;  %2582 = vperm.xlu1 %4626, %v4860_v2   ;;  %4895 = vpow2.f32 %v4407_v6  ;;  %v91_v2 = vld [vmem:[%s8819_s0 + $0x280] sm:$0xff] }
  0x8b   :  { %v4872_v20 = vpop.eup %4871  ;;  %2577 = vperm.xlu0 %4625, %v4862_v5   ;;  %4897 = vpow2.f32 %v4406_v9  ;;  %v2030_v5 = vld [vmem:[%s8820_s1 + $0x18] sm:$0xff]  ;;  %v2028_v9 = vld [vmem:[%s8820_s1 + $0x8] sm:$0xff]  ;;  %v4416_v16 = vmul.f32 -1.442695, %v91_v2 }
  0x8c   :  { %v4874_v23 = vpop.eup %4873  ;;  %4899 = vpow2.f32 %v4409_v12  ;;  %v93_v12 = vld [vmem:[%s8819_s0 + $0x290] sm:$0xff] }
  0x8d   :  { %v4876_v26 = vpop.eup %4875  ;;  %4901 = vpow2.f32 %v4408_v15 }
  0x8e   :  { %v4878_v28 = vpop.eup %4877  ;;  %2592 = vperm.xlu1 %4626, %v4864_v8   ;;  %4903 = vpow2.f32 %v4411_v18 }
  0x8f   :  { %v4880_v30 = vpop.eup %4879  ;;  %2587 = vperm.xlu0 %4625, %v4866_v11   ;;  %4905 = vpow2.f32 %v4410_v21  ;;  %v4417_v11 = vmul.f32 -1.442695, %v92_v61  ;;  %v4419_v21 = vmul.f32 -1.442695, %v94_v7  ;;  %v2036_v61 = vld [vmem:[%s8820_s1 + $0x48] sm:$0xff] }
  0x90   :  { %v4882_v32 = vpop.eup %4881  ;;  %4907 = vpow2.f32 %v4413_v24 }
  0x91   :  { %v4884_v33 = vpop.eup %4883  ;;  %4909 = vpow2.f32 %v4412_v27  ;;  %v98_v27 = vld [vmem:[%s8819_s0 + $0x2b8] sm:$0xff] }
  0x92   :  { %v4886_v34 = vpop.eup %4885  ;;  %2602 = vperm.xlu1 %4626, %v4868_v14   ;;  %v1228_v35 = vadd.f32 1.0, %v4884_v33  ;;  %4911 = vpow2.f32 %v4415_v29  ;;  %v2031_v29 = vld [vmem:[%s8820_s1 + $0x20] sm:$0xff] }
  0x93   :  { %v4888_v36 = vpop.eup %4887  ;;  %2597 = vperm.xlu0 %4625, %v4870_v17   ;;  %v1227_v37 = vadd.f32 1.0, %v4886_v34  ;;  %4913 = vpow2.f32 %v4414_v31  ;;  %v96_v17 = vld [vmem:[%s8819_s0 + $0x2a8] sm:$0xff]  ;;  %v97_v31 = vld [vmem:[%s8819_s0 + $0x2b0] sm:$0xff]  ;;  %v4420_v34 = vmul.f32 -1.442695, %v95_v22 }
  0x94   :  { %v4890_v38 = vpop.eup %4889  ;;  %4915 = vrcp.f32 %v1228_v35  ;;  %v1230_v39 = vadd.f32 1.0, %v4888_v36  ;;  %v100_v35 = vld [vmem:[%s8819_s0 + $0x2c8] sm:$0xff] }
  0x95   :  { %v4892_v40 = vpop.eup %4891  ;;  %4917 = vrcp.f32 %v1227_v37  ;;  %v1229_v41 = vadd.f32 1.0, %v4890_v38 }
  0x96   :  { %v4894_v42 = vpop.eup %4893  ;;  %2612 = vperm.xlu1 %4626, %v4872_v20   ;;  %4919 = vrcp.f32 %v1230_v39  ;;  %v1232_v43 = vadd.f32 1.0, %v4892_v40  ;;  %v4423_v39 = vmul.f32 -1.442695, %v98_v27  ;;  %v99_v40 = vld [vmem:[%s8819_s0 + $0x2c0] sm:$0xff] }
  0x97   :  { %v4896_v44 = vpop.eup %4895  ;;  %2607 = vperm.xlu0 %4625, %v4874_v23   ;;  %4921 = vrcp.f32 %v1229_v41  ;;  %v1231_v45 = vadd.f32 1.0, %v4894_v42 }
  0x98   :  { %v4898_v46 = vpop.eup %4897  ;;  %4923 = vrcp.f32 %v1232_v43  ;;  %v1234_v47 = vadd.f32 1.0, %v4896_v44  ;;  %v2034_v43 = vld [vmem:[%s8820_s1 + $0x38] sm:$0xff]  ;;  %v4422_v44 = vmul.f32 -1.442695, %v97_v31 }
  0x99   :  { %v4900_v48 = vpop.eup %4899  ;;  %4925 = vrcp.f32 %v1231_v45  ;;  %v1233_v49 = vadd.f32 1.0, %v4898_v46  ;;  %v102_v45 = vld [vmem:[%s8819_s0 + $0x2d8] sm:$0xff] }
  0x9a   :  { %v4902_v50 = vpop.eup %4901  ;;  %2622 = vperm.xlu1 %4626, %v4876_v26   ;;  %4927 = vrcp.f32 %v1234_v47  ;;  %v1236_v51 = vadd.f32 1.0, %v4900_v48  ;;  %v4418_v26 = vmul.f32 -1.442695, %v93_v12  ;;  %v2033_v47 = vld [vmem:[%s8820_s1 + $0x30] sm:$0xff]  ;;  %v4425_v48 = vmul.f32 -1.442695, %v100_v35 }
  0x9b   :  { %v4904_v52 = vpop.eup %4903  ;;  %2617 = vperm.xlu0 %4625, %v4878_v28   ;;  %4929 = vrcp.f32 %v1233_v49  ;;  %v1235_v54 = vadd.f32 1.0, %v4902_v50  ;;  %v101_v49 = vld [vmem:[%s8819_s0 + $0x2d0] sm:$0xff] }
  0x9c   :  { %v4906_v55 = vpop.eup %4905  ;;  %4931 = vrcp.f32 %v1236_v51  ;;  %v1238_v57 = vadd.f32 1.0, %v4904_v52  ;;  %v4424_v52 = vmul.f32 -1.442695, %v99_v40 }
  0x9d   :  { %v4908_v58 = vpop.eup %4907  ;;  %v2328_v59 = vpop.permute.xlu1 %2327  ;;  %4933 = vrcp.f32 %v1235_v54  ;;  %v1237_v60 = vadd.f32 1.0, %v4906_v55 }
  0x9e   :  { %v4910_v62 = vpop.eup %4909  ;;  %v3757_v63 = vmul.f32 %v2328_v59, %v2029_v53  ;;  %v2318_v0 = vpop.permute.xlu0 %2317  ;;  %2632 = vperm.xlu1 %4626, %v4880_v30   ;;  %4935 = vrcp.f32 %v1238_v57  ;;  %v1240_v1 = vadd.f32 1.0, %v4908_v58  ;;  %v4421_v30 = vmul.f32 -1.442695, %v96_v17  ;;  %v104_v53 = vld [vmem:[%s8819_s0 + $0x2e8] sm:$0xff]  ;;  %v103_v58 = vld [vmem:[%s8819_s0 + $0x2e0] sm:$0xff] }
  0x9f   :  { %v4912_v3 = vpop.eup %4911  ;;  %v3755_v4 = vmul.f32 %v2318_v0, %v2027_v56  ;;  %2627 = vperm.xlu0 %4625, %v4882_v32   ;;  %4937 = vrcp.f32 %v1237_v60  ;;  %v1239_v6 = vadd.f32 1.0, %v4910_v62  ;;  %v4427_v57 = vmul.f32 -1.442695, %v102_v45 }
  0xa0   :  { %v4914_v8 = vpop.eup %4913  ;;  %4046 = vst.msk [vmem:[%s8821_s2 + $0x10] sm:$0xff] %vm4043_vm0, %v3757_v63  ;;  %4939 = vrcp.f32 %v1240_v1  ;;  %v1242_v10 = vadd.f32 1.0, %v4912_v3  ;;  %v4426_v62 = vmul.f32 -1.442695, %v101_v49  ;;  %v106_v63 = vld [vmem:[%s8819_s0 + $0x2f8] sm:$0xff]  ;;  %v2035_v1 = vld [vmem:[%s8820_s1 + $0x40] sm:$0xff] }
  0xa1   :  { %v4916_v13 = vpop.eup %4915  ;;  %4044 = vst.msk [vmem:[%s8821_s2] sm:$0xff] %vm4043_vm0, %v3755_v4  ;;  %v2333_v14 = vpop.permute.xlu1 %2332  ;;  %4941 = vrcp.f32 %v1239_v6  ;;  %v1241_v15 = vadd.f32 1.0, %v4914_v8  ;;  %v4429_v2 = vmul.f32 -1.442695, %v104_v53  ;;  %v105_v3 = vld [vmem:[%s8819_s0 + $0x2f0] sm:$0xff]  ;;  %v2044_v53 = vld [vmem:[%s8820_s1 + $0x88] sm:$0xff] }
  0xa2   :  { %v4918_v18 = vpop.eup %4917  ;;  %v3758_v19 = vmul.f32 %v2333_v14, %v2030_v5  ;;  %v2323_v20 = vpop.permute.xlu0 %2322  ;;  %2642 = vperm.xlu1 %4626, %v4916_v13   ;;  %4943 = vrcp.f32 %v1242_v10  ;;  %v4428_v6 = vmul.f32 -1.442695, %v103_v58  ;;  %v4431_v10 = vmul.f32 -1.442695, %v106_v63  ;;  %v2038_v13 = vld [vmem:[%s8820_s1 + $0x58] sm:$0xff] }
  0xa3   :  { %v4920_v23 = vpop.eup %4919  ;;  %v3756_v24 = vmul.f32 %v2323_v20, %v2028_v9  ;;  %2637 = vperm.xlu0 %4625, %v4918_v18   ;;  %4945 = vrcp.f32 %v1241_v15  ;;  %v4430_v14 = vmul.f32 -1.442695, %v105_v3 }
  0xa4   :  { %v4922_v28 = vpop.eup %4921  ;;  %4047 = vst.msk [vmem:[%s8821_s2 + $0x18] sm:$0xff] %vm4043_vm0, %v3758_v19  ;;  %4947 = vpow2.f32 %v4417_v11 }
  0xa5   :  { %v4924_v32 = vpop.eup %4923  ;;  %4045 = vst.msk [vmem:[%s8821_s2 + $0x8] sm:$0xff] %vm4043_vm0, %v3756_v24  ;;  %v2343_v33 = vpop.permute.xlu1 %2342  ;;  %4949 = vpow2.f32 %v4416_v16  ;;  %v2037_v16 = vld [vmem:[%s8820_s1 + $0x50] sm:$0xff] }
  0xa6   :  { %v4926_v36 = vpop.eup %4925  ;;  %v3760_v37 = vmul.f32 %v2343_v33, %v2032_v25  ;;  %v2338_v38 = vpop.permute.xlu0 %2337  ;;  %2652 = vperm.xlu1 %4626, %v4920_v23   ;;  %4951 = vpow2.f32 %v4419_v21  ;;  %v2040_v25 = vld [vmem:[%s8820_s1 + $0x68] sm:$0xff] }
  0xa7   :  { %v4928_v41 = vpop.eup %4927  ;;  %v3759_v42 = vmul.f32 %v2338_v38, %v2031_v29  ;;  %2647 = vperm.xlu0 %4625, %v4922_v28   ;;  %4953 = vpow2.f32 %v4418_v26  ;;  %v2039_v28 = vld [vmem:[%s8820_s1 + $0x60] sm:$0xff] }
  0xa8   :  { %v4930_v46 = vpop.eup %4929  ;;  %4049 = vst.msk [vmem:[%s8821_s2 + $0x28] sm:$0xff] %vm4043_vm0, %v3760_v37  ;;  %4955 = vpow2.f32 %v4421_v30 }
  0xa9   :  { %v4932_v50 = vpop.eup %4931  ;;  %4048 = vst.msk [vmem:[%s8821_s2 + $0x20] sm:$0xff] %vm4043_vm0, %v3759_v42  ;;  %v2353_v51 = vpop.permute.xlu1 %2352  ;;  %4957 = vpow2.f32 %v4420_v34  ;;  %v2041_v42 = vld [vmem:[%s8820_s1 + $0x70] sm:$0xff] }
  0xaa   :  { %v4934_v54 = vpop.eup %4933  ;;  %v3762_v55 = vmul.f32 %v2353_v51, %v2034_v43  ;;  %v2348_v56 = vpop.permute.xlu0 %2347  ;;  %2662 = vperm.xlu1 %4626, %v4924_v32   ;;  %4959 = vpow2.f32 %v4423_v39  ;;  %v2042_v39 = vld [vmem:[%s8820_s1 + $0x78] sm:$0xff] }
  0xab   :  { %v4936_v59 = vpop.eup %4935  ;;  %v3761_v60 = vmul.f32 %v2348_v56, %v2033_v47  ;;  %2657 = vperm.xlu0 %4625, %v4926_v36   ;;  %4961 = vpow2.f32 %v4422_v44  ;;  %v2043_v56 = vld [vmem:[%s8820_s1 + $0x80] sm:$0xff] }
  0xac   :  { %v4938_v0 = vpop.eup %4937  ;;  %4051 = vst.msk [vmem:[%s8821_s2 + $0x38] sm:$0xff] %vm4043_vm0, %v3762_v55  ;;  %4963 = vpow2.f32 %v4425_v48 }
  0xad   :  { %v6141_v4 = vpop.eup %4939  ;;  %4050 = vst.msk [vmem:[%s8821_s2 + $0x30] sm:$0xff] %vm4043_vm0, %v3761_v60  ;;  %v2363_v5 = vpop.permute.xlu1 %2362  ;;  %4965 = vpow2.f32 %v4424_v52 }
  0xae   :  { %v6147_v7 = vpop.eup %4941  ;;  %v3764_v8 = vmul.f32 %v2363_v5, %v2036_v61  ;;  %v2358_v9 = vpop.permute.xlu0 %2357  ;;  %2672 = vperm.xlu1 %4626, %v4928_v41   ;;  %4967 = vpow2.f32 %v4427_v57  ;;  %v108_v61 = vld [vmem:[%s8819_s0 + $0x308] sm:$0xff]  ;;  %v2046_v5 = vld [vmem:[%s8820_s1 + $0x98] sm:$0xff] }
  0xaf   :  { %v6149_v11 = vpop.eup %4943  ;;  %v3763_v12 = vmul.f32 %v2358_v9, %v2035_v1  ;;  %2667 = vperm.xlu0 %4625, %v4930_v46   ;;  %4969 = vpow2.f32 %v4426_v62  ;;  %v2045_v9 = vld [vmem:[%s8820_s1 + $0x90] sm:$0xff] }
  0xb0   :  { %v6154_v15 = vpop.eup %4945  ;;  %4053 = vst.msk [vmem:[%s8821_s2 + $0x48] sm:$0xff] %vm4043_vm0, %v3764_v8  ;;  %4971 = vpow2.f32 %v4429_v2  ;;  %v107_v2 = vld [vmem:[%s8819_s0 + $0x300] sm:$0xff] }
  0xb1   :  { %v4948_v17 = vpop.eup %4947  ;;  %4052 = vst.msk [vmem:[%s8821_s2 + $0x40] sm:$0xff] %vm4043_vm0, %v3763_v12  ;;  %v2373_v18 = vpop.permute.xlu1 %2372  ;;  %4973 = vpow2.f32 %v4428_v6  ;;  %v109_v12 = vld [vmem:[%s8819_s0 + $0x310] sm:$0xff] }
  0xb2   :  { %v4950_v19 = vpop.eup %4949  ;;  %v3766_v20 = vmul.f32 %v2373_v18, %v2038_v13  ;;  %v2368_v21 = vpop.permute.xlu0 %2367  ;;  %2682 = vperm.xlu1 %4626, %v4932_v50   ;;  %v1244_v22 = vadd.f32 1.0, %v4948_v17  ;;  %4975 = vpow2.f32 %v4431_v10  ;;  %v112_v17 = vld [vmem:[%s8819_s0 + $0x328] sm:$0xff] }
  0xb3   :  { %v4952_v23 = vpop.eup %4951  ;;  %v3765_v24 = vmul.f32 %v2368_v21, %v2037_v16  ;;  %2677 = vperm.xlu0 %4625, %v4934_v54   ;;  %v1243_v26 = vadd.f32 1.0, %v4950_v19  ;;  %4977 = vpow2.f32 %v4430_v14  ;;  %v4432_v16 = vmul.f32 -1.442695, %v107_v2 }
  0xb4   :  { %v4954_v27 = vpop.eup %4953  ;;  %4055 = vst.msk [vmem:[%s8821_s2 + $0x58] sm:$0xff] %vm4043_vm0, %v3766_v20  ;;  %4979 = vrcp.f32 %v1244_v22  ;;  %v1246_v29 = vadd.f32 1.0, %v4952_v23  ;;  %v111_v22 = vld [vmem:[%s8819_s0 + $0x320] sm:$0xff] }
  0xb5   :  { %v4956_v30 = vpop.eup %4955  ;;  %4054 = vst.msk [vmem:[%s8821_s2 + $0x50] sm:$0xff] %vm4043_vm0, %v3765_v24  ;;  %v2383_v31 = vpop.permute.xlu1 %2382  ;;  %4981 = vrcp.f32 %v1243_v26  ;;  %v1245_v32 = vadd.f32 1.0, %v4954_v27  ;;  %v4434_v26 = vmul.f32 -1.442695, %v109_v12  ;;  %v114_v27 = vld [vmem:[%s8819_s0 + $0x338] sm:$0xff] }
  0xb6   :  { %v4958_v33 = vpop.eup %4957  ;;  %v3768_v34 = vmul.f32 %v2383_v31, %v2040_v25  ;;  %v2378_v35 = vpop.permute.xlu0 %2377  ;;  %2692 = vperm.xlu1 %4626, %v4936_v59   ;;  %4983 = vrcp.f32 %v1246_v29  ;;  %v1248_v36 = vadd.f32 1.0, %v4956_v30  ;;  %v2048_v25 = vld [vmem:[%s8820_s1 + $0xa8] sm:$0xff]  ;;  %v2047_v29 = vld [vmem:[%s8820_s1 + $0xa0] sm:$0xff]  ;;  %v4437_v30 = vmul.f32 -1.442695, %v112_v17  ;;  %v113_v31 = vld [vmem:[%s8819_s0 + $0x330] sm:$0xff] }
  0xb7   :  { %v4960_v37 = vpop.eup %4959  ;;  %v3767_v38 = vmul.f32 %v2378_v35, %v2039_v28  ;;  %2687 = vperm.xlu0 %4625, %v4938_v0   ;;  %4985 = vrcp.f32 %v1245_v32  ;;  %v1247_v40 = vadd.f32 1.0, %v4958_v33  ;;  %v116_v35 = vld [vmem:[%s8819_s0 + $0x348] sm:$0xff] }
  0xb8   :  { %v4962_v41 = vpop.eup %4961  ;;  %4057 = vst.msk [vmem:[%s8821_s2 + $0x68] sm:$0xff] %vm4043_vm0, %v3768_v34  ;;  %4987 = vrcp.f32 %v1248_v36  ;;  %v1250_v43 = vadd.f32 1.0, %v4960_v37  ;;  %v4436_v34 = vmul.f32 -1.442695, %v111_v22 }
  0xb9   :  { %v4964_v44 = vpop.eup %4963  ;;  %4056 = vst.msk [vmem:[%s8821_s2 + $0x60] sm:$0xff] %vm4043_vm0, %v3767_v38  ;;  %v2393_v45 = vpop.permute.xlu1 %2392  ;;  %4989 = vrcp.f32 %v1247_v40  ;;  %v1249_v46 = vadd.f32 1.0, %v4962_v41  ;;  %v115_v40 = vld [vmem:[%s8819_s0 + $0x340] sm:$0xff] }
  0xba   :  { %v4966_v47 = vpop.eup %4965  ;;  %v3770_v48 = vmul.f32 %v2393_v45, %v2042_v39  ;;  %v2388_v49 = vpop.permute.xlu0 %2387  ;;  %2702 = vperm.xlu1 %4626, %v6141_v4   ;;  %4991 = vrcp.f32 %v1250_v43  ;;  %v1252_v50 = vadd.f32 1.0, %v4964_v44  ;;  %v4439_v39 = vmul.f32 -1.442695, %v114_v27  ;;  %v2050_v43 = vld [vmem:[%s8820_s1 + $0xb8] sm:$0xff] }
  0xbb   :  { %v4968_v51 = vpop.eup %4967  ;;  %v3769_v52 = vmul.f32 %v2388_v49, %v2041_v42  ;;  %2697 = vperm.xlu0 %4625, %v6147_v7   ;;  %4993 = vrcp.f32 %v1249_v46  ;;  %v1251_v54 = vadd.f32 1.0, %v4966_v47  ;;  %v110_v7 = vld [vmem:[%s8819_s0 + $0x318] sm:$0xff]  ;;  %v4438_v44 = vmul.f32 -1.442695, %v113_v31  ;;  %v2049_v47 = vld [vmem:[%s8820_s1 + $0xb0] sm:$0xff] }
  0xbc   :  { %v4970_v55 = vpop.eup %4969  ;;  %4059 = vst.msk [vmem:[%s8821_s2 + $0x78] sm:$0xff] %vm4043_vm0, %v3770_v48  ;;  %4995 = vrcp.f32 %v1252_v50  ;;  %v1254_v57 = vadd.f32 1.0, %v4968_v51  ;;  %v4435_v21 = vmul.f32 -1.442695, %v110_v7  ;;  %v118_v45 = vld [vmem:[%s8819_s0 + $0x358] sm:$0xff]  ;;  %v117_v49 = vld [vmem:[%s8819_s0 + $0x350] sm:$0xff] }
  0xbd   :  { %v4972_v58 = vpop.eup %4971  ;;  %4058 = vst.msk [vmem:[%s8821_s2 + $0x70] sm:$0xff] %vm4043_vm0, %v3769_v52  ;;  %v2403_v59 = vpop.permute.xlu1 %2402  ;;  %4997 = vrcp.f32 %v1251_v54  ;;  %v1253_v60 = vadd.f32 1.0, %v4970_v55  ;;  %v4441_v48 = vmul.f32 -1.442695, %v116_v35  ;;  %v4440_v52 = vmul.f32 -1.442695, %v115_v40 }
  0xbe   :  { %v4974_v62 = vpop.eup %4973  ;;  %v3772_v63 = vmul.f32 %v2403_v59, %v2044_v53  ;;  %v2398_v0 = vpop.permute.xlu0 %2397  ;;  %2712 = vperm.xlu1 %4626, %v6149_v11   ;;  %4999 = vrcp.f32 %v1254_v57  ;;  %v1256_v1 = vadd.f32 1.0, %v4972_v58  ;;  %v4433_v11 = vmul.f32 -1.442695, %v108_v61  ;;  %v120_v53 = vld [vmem:[%s8819_s0 + $0x368] sm:$0xff]  ;;  %v119_v58 = vld [vmem:[%s8819_s0 + $0x360] sm:$0xff] }
  0xbf   :  { %v4976_v3 = vpop.eup %4975  ;;  %v3771_v4 = vmul.f32 %v2398_v0, %v2043_v56  ;;  %2707 = vperm.xlu0 %4625, %v6154_v15   ;;  %5001 = vrcp.f32 %v1253_v60  ;;  %v1255_v6 = vadd.f32 1.0, %v4974_v62  ;;  %v4443_v57 = vmul.f32 -1.442695, %v118_v45  ;;  %v2052_v61 = vld [vmem:[%s8820_s1 + $0xc8] sm:$0xff] }
  0xc0   :  { %v4978_v8 = vpop.eup %4977  ;;  %4061 = vst.msk [vmem:[%s8821_s2 + $0x88] sm:$0xff] %vm4043_vm0, %v3772_v63  ;;  %5003 = vrcp.f32 %v1256_v1  ;;  %v1258_v10 = vadd.f32 1.0, %v4976_v3  ;;  %v4442_v62 = vmul.f32 -1.442695, %v117_v49  ;;  %v122_v63 = vld [vmem:[%s8819_s0 + $0x378] sm:$0xff]  ;;  %v2051_v1 = vld [vmem:[%s8820_s1 + $0xc0] sm:$0xff] }
  0xc1   :  { %v4980_v13 = vpop.eup %4979  ;;  %4060 = vst.msk [vmem:[%s8821_s2 + $0x80] sm:$0xff] %vm4043_vm0, %v3771_v4  ;;  %v2413_v14 = vpop.permute.xlu1 %2412  ;;  %5005 = vrcp.f32 %v1255_v6  ;;  %v1257_v15 = vadd.f32 1.0, %v4978_v8  ;;  %v4445_v2 = vmul.f32 -1.442695, %v120_v53  ;;  %v121_v3 = vld [vmem:[%s8819_s0 + $0x370] sm:$0xff]  ;;  %v2060_v53 = vld [vmem:[%s8820_s1 + $0x108] sm:$0xff] }
  0xc2   :  { %v4982_v18 = vpop.eup %4981  ;;  %v3774_v19 = vmul.f32 %v2413_v14, %v2046_v5  ;;  %v2408_v20 = vpop.permute.xlu0 %2407  ;;  %2722 = vperm.xlu1 %4626, %v4980_v13   ;;  %5007 = vrcp.f32 %v1258_v10  ;;  %v4444_v6 = vmul.f32 -1.442695, %v119_v58  ;;  %v4447_v10 = vmul.f32 -1.442695, %v122_v63  ;;  %v2054_v13 = vld [vmem:[%s8820_s1 + $0xd8] sm:$0xff] }
  0xc3   :  { %v4984_v23 = vpop.eup %4983  ;;  %v3773_v24 = vmul.f32 %v2408_v20, %v2045_v9  ;;  %2717 = vperm.xlu0 %4625, %v4982_v18   ;;  %5009 = vrcp.f32 %v1257_v15  ;;  %v4446_v14 = vmul.f32 -1.442695, %v121_v3 }
  0xc4   :  { %v4986_v28 = vpop.eup %4985  ;;  %4063 = vst.msk [vmem:[%s8821_s2 + $0x98] sm:$0xff] %vm4043_vm0, %v3774_v19  ;;  %5011 = vpow2.f32 %v4433_v11 }
  0xc5   :  { %v4988_v32 = vpop.eup %4987  ;;  %4062 = vst.msk [vmem:[%s8821_s2 + $0x90] sm:$0xff] %vm4043_vm0, %v3773_v24  ;;  %v2423_v33 = vpop.permute.xlu1 %2422  ;;  %5013 = vpow2.f32 %v4432_v16  ;;  %v2053_v16 = vld [vmem:[%s8820_s1 + $0xd0] sm:$0xff] }
  0xc6   :  { %v4990_v36 = vpop.eup %4989  ;;  %v3776_v37 = vmul.f32 %v2423_v33, %v2048_v25  ;;  %v2418_v38 = vpop.permute.xlu0 %2417  ;;  %2732 = vperm.xlu1 %4626, %v4984_v23   ;;  %5015 = vpow2.f32 %v4435_v21  ;;  %v2056_v25 = vld [vmem:[%s8820_s1 + $0xe8] sm:$0xff] }
  0xc7   :  { %v4992_v41 = vpop.eup %4991  ;;  %v3775_v42 = vmul.f32 %v2418_v38, %v2047_v29  ;;  %2727 = vperm.xlu0 %4625, %v4986_v28   ;;  %5017 = vpow2.f32 %v4434_v26  ;;  %v2055_v28 = vld [vmem:[%s8820_s1 + $0xe0] sm:$0xff] }
  0xc8   :  { %v4994_v46 = vpop.eup %4993  ;;  %4065 = vst.msk [vmem:[%s8821_s2 + $0xa8] sm:$0xff] %vm4043_vm0, %v3776_v37  ;;  %5019 = vpow2.f32 %v4437_v30 }
  0xc9   :  { %v4996_v50 = vpop.eup %4995  ;;  %4064 = vst.msk [vmem:[%s8821_s2 + $0xa0] sm:$0xff] %vm4043_vm0, %v3775_v42  ;;  %v2433_v51 = vpop.permute.xlu1 %2432  ;;  %5021 = vpow2.f32 %v4436_v34  ;;  %v2057_v42 = vld [vmem:[%s8820_s1 + $0xf0] sm:$0xff] }
  0xca   :  { %v4998_v54 = vpop.eup %4997  ;;  %v3778_v55 = vmul.f32 %v2433_v51, %v2050_v43  ;;  %v2428_v56 = vpop.permute.xlu0 %2427  ;;  %2742 = vperm.xlu1 %4626, %v4988_v32   ;;  %5023 = vpow2.f32 %v4439_v39  ;;  %v2058_v39 = vld [vmem:[%s8820_s1 + $0xf8] sm:$0xff] }
  0xcb   :  { %v5000_v59 = vpop.eup %4999  ;;  %v3777_v60 = vmul.f32 %v2428_v56, %v2049_v47  ;;  %2737 = vperm.xlu0 %4625, %v4990_v36   ;;  %5025 = vpow2.f32 %v4438_v44  ;;  %v2059_v56 = vld [vmem:[%s8820_s1 + $0x100] sm:$0xff] }
  0xcc   :  { %v5002_v0 = vpop.eup %5001  ;;  %4067 = vst.msk [vmem:[%s8821_s2 + $0xb8] sm:$0xff] %vm4043_vm0, %v3778_v55  ;;  %5027 = vpow2.f32 %v4441_v48 }
  0xcd   :  { %v6313_v4 = vpop.eup %5003  ;;  %4066 = vst.msk [vmem:[%s8821_s2 + $0xb0] sm:$0xff] %vm4043_vm0, %v3777_v60  ;;  %v2443_v5 = vpop.permute.xlu1 %2442  ;;  %5029 = vpow2.f32 %v4440_v52 }
  0xce   :  { %v6319_v7 = vpop.eup %5005  ;;  %v3780_v8 = vmul.f32 %v2443_v5, %v2052_v61  ;;  %v2438_v9 = vpop.permute.xlu0 %2437  ;;  %2752 = vperm.xlu1 %4626, %v4992_v41   ;;  %5031 = vpow2.f32 %v4443_v57  ;;  %v124_v61 = vld [vmem:[%s8819_s0 + $0x388] sm:$0xff]  ;;  %v2062_v5 = vld [vmem:[%s8820_s1 + $0x118] sm:$0xff] }
  0xcf   :  { %v6321_v11 = vpop.eup %5007  ;;  %v3779_v12 = vmul.f32 %v2438_v9, %v2051_v1  ;;  %2747 = vperm.xlu0 %4625, %v4994_v46   ;;  %5033 = vpow2.f32 %v4442_v62  ;;  %v2061_v9 = vld [vmem:[%s8820_s1 + $0x110] sm:$0xff] }
  0xd0   :  { %v6326_v15 = vpop.eup %5009  ;;  %4069 = vst.msk [vmem:[%s8821_s2 + $0xc8] sm:$0xff] %vm4043_vm0, %v3780_v8  ;;  %5035 = vpow2.f32 %v4445_v2  ;;  %v123_v2 = vld [vmem:[%s8819_s0 + $0x380] sm:$0xff] }
  0xd1   :  { %v5012_v17 = vpop.eup %5011  ;;  %4068 = vst.msk [vmem:[%s8821_s2 + $0xc0] sm:$0xff] %vm4043_vm0, %v3779_v12  ;;  %v2453_v18 = vpop.permute.xlu1 %2452  ;;  %5037 = vpow2.f32 %v4444_v6  ;;  %v125_v12 = vld [vmem:[%s8819_s0 + $0x390] sm:$0xff] }
  0xd2   :  { %v5014_v19 = vpop.eup %5013  ;;  %v3782_v20 = vmul.f32 %v2453_v18, %v2054_v13  ;;  %v2448_v21 = vpop.permute.xlu0 %2447  ;;  %2762 = vperm.xlu1 %4626, %v4996_v50   ;;  %v1260_v22 = vadd.f32 1.0, %v5012_v17  ;;  %5039 = vpow2.f32 %v4447_v10  ;;  %v128_v17 = vld [vmem:[%s8819_s0 + $0x3a8] sm:$0xff] }
  0xd3   :  { %v5016_v23 = vpop.eup %5015  ;;  %v3781_v24 = vmul.f32 %v2448_v21, %v2053_v16  ;;  %2757 = vperm.xlu0 %4625, %v4998_v54   ;;  %v1259_v26 = vadd.f32 1.0, %v5014_v19  ;;  %5041 = vpow2.f32 %v4446_v14  ;;  %v4448_v16 = vmul.f32 -1.442695, %v123_v2 }
  0xd4   :  { %v5018_v27 = vpop.eup %5017  ;;  %4071 = vst.msk [vmem:[%s8821_s2 + $0xd8] sm:$0xff] %vm4043_vm0, %v3782_v20  ;;  %5043 = vrcp.f32 %v1260_v22  ;;  %v1262_v29 = vadd.f32 1.0, %v5016_v23  ;;  %v127_v22 = vld [vmem:[%s8819_s0 + $0x3a0] sm:$0xff] }
  0xd5   :  { %v5020_v30 = vpop.eup %5019  ;;  %4070 = vst.msk [vmem:[%s8821_s2 + $0xd0] sm:$0xff] %vm4043_vm0, %v3781_v24  ;;  %v2463_v31 = vpop.permute.xlu1 %2462  ;;  %5045 = vrcp.f32 %v1259_v26  ;;  %v1261_v32 = vadd.f32 1.0, %v5018_v27  ;;  %v4450_v26 = vmul.f32 -1.442695, %v125_v12  ;;  %v130_v27 = vld [vmem:[%s8819_s0 + $0x3b8] sm:$0xff] }
  0xd6   :  { %v5022_v33 = vpop.eup %5021  ;;  %v3784_v34 = vmul.f32 %v2463_v31, %v2056_v25  ;;  %v2458_v35 = vpop.permute.xlu0 %2457  ;;  %2772 = vperm.xlu1 %4626, %v5000_v59   ;;  %5047 = vrcp.f32 %v1262_v29  ;;  %v1264_v36 = vadd.f32 1.0, %v5020_v30  ;;  %v2064_v25 = vld [vmem:[%s8820_s1 + $0x128] sm:$0xff]  ;;  %v2063_v29 = vld [vmem:[%s8820_s1 + $0x120] sm:$0xff]  ;;  %v4453_v30 = vmul.f32 -1.442695, %v128_v17  ;;  %v129_v31 = vld [vmem:[%s8819_s0 + $0x3b0] sm:$0xff] }
  0xd7   :  { %v5024_v37 = vpop.eup %5023  ;;  %v3783_v38 = vmul.f32 %v2458_v35, %v2055_v28  ;;  %2767 = vperm.xlu0 %4625, %v5002_v0   ;;  %5049 = vrcp.f32 %v1261_v32  ;;  %v1263_v40 = vadd.f32 1.0, %v5022_v33  ;;  %v132_v35 = vld [vmem:[%s8819_s0 + $0x3c8] sm:$0xff] }
  0xd8   :  { %v5026_v41 = vpop.eup %5025  ;;  %4073 = vst.msk [vmem:[%s8821_s2 + $0xe8] sm:$0xff] %vm4043_vm0, %v3784_v34  ;;  %5051 = vrcp.f32 %v1264_v36  ;;  %v1266_v43 = vadd.f32 1.0, %v5024_v37  ;;  %v4452_v34 = vmul.f32 -1.442695, %v127_v22 }
  0xd9   :  { %v5028_v44 = vpop.eup %5027  ;;  %4072 = vst.msk [vmem:[%s8821_s2 + $0xe0] sm:$0xff] %vm4043_vm0, %v3783_v38  ;;  %v2473_v45 = vpop.permute.xlu1 %2472  ;;  %5053 = vrcp.f32 %v1263_v40  ;;  %v1265_v46 = vadd.f32 1.0, %v5026_v41  ;;  %v131_v40 = vld [vmem:[%s8819_s0 + $0x3c0] sm:$0xff] }
  0xda   :  { %v5030_v47 = vpop.eup %5029  ;;  %v3786_v48 = vmul.f32 %v2473_v45, %v2058_v39  ;;  %v2468_v49 = vpop.permute.xlu0 %2467  ;;  %2782 = vperm.xlu1 %4626, %v6313_v4   ;;  %5055 = vrcp.f32 %v1266_v43  ;;  %v1268_v50 = vadd.f32 1.0, %v5028_v44  ;;  %v4455_v39 = vmul.f32 -1.442695, %v130_v27  ;;  %v2066_v43 = vld [vmem:[%s8820_s1 + $0x138] sm:$0xff] }
  0xdb   :  { %v5032_v51 = vpop.eup %5031  ;;  %v3785_v52 = vmul.f32 %v2468_v49, %v2057_v42  ;;  %2777 = vperm.xlu0 %4625, %v6319_v7   ;;  %5057 = vrcp.f32 %v1265_v46  ;;  %v1267_v54 = vadd.f32 1.0, %v5030_v47  ;;  %v126_v7 = vld [vmem:[%s8819_s0 + $0x398] sm:$0xff]  ;;  %v4454_v44 = vmul.f32 -1.442695, %v129_v31  ;;  %v2065_v47 = vld [vmem:[%s8820_s1 + $0x130] sm:$0xff] }
  0xdc   :  { %v5034_v55 = vpop.eup %5033  ;;  %4075 = vst.msk [vmem:[%s8821_s2 + $0xf8] sm:$0xff] %vm4043_vm0, %v3786_v48  ;;  %5059 = vrcp.f32 %v1268_v50  ;;  %v1270_v57 = vadd.f32 1.0, %v5032_v51  ;;  %v4451_v21 = vmul.f32 -1.442695, %v126_v7  ;;  %v134_v45 = vld [vmem:[%s8819_s0 + $0x3d8] sm:$0xff]  ;;  %v133_v49 = vld [vmem:[%s8819_s0 + $0x3d0] sm:$0xff] }
  0xdd   :  { %v5036_v58 = vpop.eup %5035  ;;  %4074 = vst.msk [vmem:[%s8821_s2 + $0xf0] sm:$0xff] %vm4043_vm0, %v3785_v52  ;;  %v2483_v59 = vpop.permute.xlu1 %2482  ;;  %5061 = vrcp.f32 %v1267_v54  ;;  %v1269_v60 = vadd.f32 1.0, %v5034_v55  ;;  %v4457_v48 = vmul.f32 -1.442695, %v132_v35  ;;  %v4456_v52 = vmul.f32 -1.442695, %v131_v40 }
  0xde   :  { %v5038_v62 = vpop.eup %5037  ;;  %v3788_v63 = vmul.f32 %v2483_v59, %v2060_v53  ;;  %v2478_v0 = vpop.permute.xlu0 %2477  ;;  %2792 = vperm.xlu1 %4626, %v6321_v11   ;;  %5063 = vrcp.f32 %v1270_v57  ;;  %v1272_v1 = vadd.f32 1.0, %v5036_v58  ;;  %v4449_v11 = vmul.f32 -1.442695, %v124_v61  ;;  %v136_v53 = vld [vmem:[%s8819_s0 + $0x3e8] sm:$0xff]  ;;  %v135_v58 = vld [vmem:[%s8819_s0 + $0x3e0] sm:$0xff] }
  0xdf   :  { %v5040_v3 = vpop.eup %5039  ;;  %v3787_v4 = vmul.f32 %v2478_v0, %v2059_v56  ;;  %2787 = vperm.xlu0 %4625, %v6326_v15   ;;  %5065 = vrcp.f32 %v1269_v60  ;;  %v1271_v6 = vadd.f32 1.0, %v5038_v62  ;;  %v4459_v57 = vmul.f32 -1.442695, %v134_v45  ;;  %v2068_v61 = vld [vmem:[%s8820_s1 + $0x148] sm:$0xff] }
  0xe0   :  { %v5042_v8 = vpop.eup %5041  ;;  %4077 = vst.msk [vmem:[%s8821_s2 + $0x108] sm:$0xff] %vm4043_vm0, %v3788_v63  ;;  %5067 = vrcp.f32 %v1272_v1  ;;  %v1274_v10 = vadd.f32 1.0, %v5040_v3  ;;  %v4458_v62 = vmul.f32 -1.442695, %v133_v49  ;;  %v138_v63 = vld [vmem:[%s8819_s0 + $0x3f8] sm:$0xff]  ;;  %v2067_v1 = vld [vmem:[%s8820_s1 + $0x140] sm:$0xff] }
  0xe1   :  { %v5044_v13 = vpop.eup %5043  ;;  %4076 = vst.msk [vmem:[%s8821_s2 + $0x100] sm:$0xff] %vm4043_vm0, %v3787_v4  ;;  %v2493_v14 = vpop.permute.xlu1 %2492  ;;  %5069 = vrcp.f32 %v1271_v6  ;;  %v1273_v15 = vadd.f32 1.0, %v5042_v8  ;;  %v4461_v2 = vmul.f32 -1.442695, %v136_v53  ;;  %v137_v3 = vld [vmem:[%s8819_s0 + $0x3f0] sm:$0xff]  ;;  %v2076_v53 = vld [vmem:[%s8820_s1 + $0x188] sm:$0xff] }
  0xe2   :  { %v5046_v18 = vpop.eup %5045  ;;  %v3790_v19 = vmul.f32 %v2493_v14, %v2062_v5  ;;  %v2488_v20 = vpop.permute.xlu0 %2487  ;;  %2802 = vperm.xlu1 %4626, %v5044_v13   ;;  %5071 = vrcp.f32 %v1274_v10  ;;  %v4460_v6 = vmul.f32 -1.442695, %v135_v58  ;;  %v4463_v10 = vmul.f32 -1.442695, %v138_v63  ;;  %v2070_v13 = vld [vmem:[%s8820_s1 + $0x158] sm:$0xff] }
  0xe3   :  { %v5048_v23 = vpop.eup %5047  ;;  %v3789_v24 = vmul.f32 %v2488_v20, %v2061_v9  ;;  %2797 = vperm.xlu0 %4625, %v5046_v18   ;;  %5073 = vrcp.f32 %v1273_v15  ;;  %v4462_v14 = vmul.f32 -1.442695, %v137_v3 }
  0xe4   :  { %v5050_v28 = vpop.eup %5049  ;;  %4079 = vst.msk [vmem:[%s8821_s2 + $0x118] sm:$0xff] %vm4043_vm0, %v3790_v19  ;;  %5075 = vpow2.f32 %v4449_v11 }
  0xe5   :  { %v5052_v32 = vpop.eup %5051  ;;  %4078 = vst.msk [vmem:[%s8821_s2 + $0x110] sm:$0xff] %vm4043_vm0, %v3789_v24  ;;  %v2503_v33 = vpop.permute.xlu1 %2502  ;;  %5077 = vpow2.f32 %v4448_v16  ;;  %v2069_v16 = vld [vmem:[%s8820_s1 + $0x150] sm:$0xff] }
  0xe6   :  { %v5054_v36 = vpop.eup %5053  ;;  %v3792_v37 = vmul.f32 %v2503_v33, %v2064_v25  ;;  %v2498_v38 = vpop.permute.xlu0 %2497  ;;  %2812 = vperm.xlu1 %4626, %v5048_v23   ;;  %5079 = vpow2.f32 %v4451_v21  ;;  %v2072_v25 = vld [vmem:[%s8820_s1 + $0x168] sm:$0xff] }
  0xe7   :  { %v5056_v41 = vpop.eup %5055  ;;  %v3791_v42 = vmul.f32 %v2498_v38, %v2063_v29  ;;  %2807 = vperm.xlu0 %4625, %v5050_v28   ;;  %5081 = vpow2.f32 %v4450_v26  ;;  %v2071_v28 = vld [vmem:[%s8820_s1 + $0x160] sm:$0xff] }
  0xe8   :  { %v5058_v46 = vpop.eup %5057  ;;  %4081 = vst.msk [vmem:[%s8821_s2 + $0x128] sm:$0xff] %vm4043_vm0, %v3792_v37  ;;  %5083 = vpow2.f32 %v4453_v30 }
  0xe9   :  { %v5060_v50 = vpop.eup %5059  ;;  %4080 = vst.msk [vmem:[%s8821_s2 + $0x120] sm:$0xff] %vm4043_vm0, %v3791_v42  ;;  %v2513_v51 = vpop.permute.xlu1 %2512  ;;  %5085 = vpow2.f32 %v4452_v34  ;;  %v2073_v42 = vld [vmem:[%s8820_s1 + $0x170] sm:$0xff] }
  0xea   :  { %v5062_v54 = vpop.eup %5061  ;;  %v3794_v55 = vmul.f32 %v2513_v51, %v2066_v43  ;;  %v2508_v56 = vpop.permute.xlu0 %2507  ;;  %2822 = vperm.xlu1 %4626, %v5052_v32   ;;  %5087 = vpow2.f32 %v4455_v39  ;;  %v2074_v39 = vld [vmem:[%s8820_s1 + $0x178] sm:$0xff] }
  0xeb   :  { %v5064_v59 = vpop.eup %5063  ;;  %v3793_v60 = vmul.f32 %v2508_v56, %v2065_v47  ;;  %2817 = vperm.xlu0 %4625, %v5054_v36   ;;  %5089 = vpow2.f32 %v4454_v44  ;;  %v2075_v56 = vld [vmem:[%s8820_s1 + $0x180] sm:$0xff] }
  0xec   :  { %v5066_v0 = vpop.eup %5065  ;;  %4083 = vst.msk [vmem:[%s8821_s2 + $0x138] sm:$0xff] %vm4043_vm0, %v3794_v55  ;;  %5091 = vpow2.f32 %v4457_v48 }
  0xed   :  { %v6485_v4 = vpop.eup %5067  ;;  %4082 = vst.msk [vmem:[%s8821_s2 + $0x130] sm:$0xff] %vm4043_vm0, %v3793_v60  ;;  %v2523_v5 = vpop.permute.xlu1 %2522  ;;  %5093 = vpow2.f32 %v4456_v52 }
  0xee   :  { %v6491_v7 = vpop.eup %5069  ;;  %v3796_v8 = vmul.f32 %v2523_v5, %v2068_v61  ;;  %v2518_v9 = vpop.permute.xlu0 %2517  ;;  %2832 = vperm.xlu1 %4626, %v5056_v41   ;;  %5095 = vpow2.f32 %v4459_v57  ;;  %v140_v61 = vld [vmem:[%s8819_s0 + $0x408] sm:$0xff]  ;;  %v2078_v5 = vld [vmem:[%s8820_s1 + $0x198] sm:$0xff] }
  0xef   :  { %v6493_v11 = vpop.eup %5071  ;;  %v3795_v12 = vmul.f32 %v2518_v9, %v2067_v1  ;;  %2827 = vperm.xlu0 %4625, %v5058_v46   ;;  %5097 = vpow2.f32 %v4458_v62  ;;  %v2077_v9 = vld [vmem:[%s8820_s1 + $0x190] sm:$0xff] }
  0xf0   :  { %v6498_v15 = vpop.eup %5073  ;;  %4085 = vst.msk [vmem:[%s8821_s2 + $0x148] sm:$0xff] %vm4043_vm0, %v3796_v8  ;;  %5099 = vpow2.f32 %v4461_v2  ;;  %v139_v2 = vld [vmem:[%s8819_s0 + $0x400] sm:$0xff] }
  0xf1   :  { %v5076_v17 = vpop.eup %5075  ;;  %4084 = vst.msk [vmem:[%s8821_s2 + $0x140] sm:$0xff] %vm4043_vm0, %v3795_v12  ;;  %v2533_v18 = vpop.permute.xlu1 %2532  ;;  %5101 = vpow2.f32 %v4460_v6  ;;  %v141_v12 = vld [vmem:[%s8819_s0 + $0x410] sm:$0xff] }
  0xf2   :  { %v5078_v19 = vpop.eup %5077  ;;  %v3798_v20 = vmul.f32 %v2533_v18, %v2070_v13  ;;  %v2528_v21 = vpop.permute.xlu0 %2527  ;;  %2842 = vperm.xlu1 %4626, %v5060_v50   ;;  %v1276_v22 = vadd.f32 1.0, %v5076_v17  ;;  %5103 = vpow2.f32 %v4463_v10  ;;  %v144_v17 = vld [vmem:[%s8819_s0 + $0x428] sm:$0xff] }
  0xf3   :  { %v5080_v23 = vpop.eup %5079  ;;  %v3797_v24 = vmul.f32 %v2528_v21, %v2069_v16  ;;  %2837 = vperm.xlu0 %4625, %v5062_v54   ;;  %v1275_v26 = vadd.f32 1.0, %v5078_v19  ;;  %5105 = vpow2.f32 %v4462_v14  ;;  %v4464_v16 = vmul.f32 -1.442695, %v139_v2 }
  0xf4   :  { %v5082_v27 = vpop.eup %5081  ;;  %4087 = vst.msk [vmem:[%s8821_s2 + $0x158] sm:$0xff] %vm4043_vm0, %v3798_v20  ;;  %5107 = vrcp.f32 %v1276_v22  ;;  %v1278_v29 = vadd.f32 1.0, %v5080_v23  ;;  %v143_v22 = vld [vmem:[%s8819_s0 + $0x420] sm:$0xff] }
  0xf5   :  { %v5084_v30 = vpop.eup %5083  ;;  %4086 = vst.msk [vmem:[%s8821_s2 + $0x150] sm:$0xff] %vm4043_vm0, %v3797_v24  ;;  %v2543_v31 = vpop.permute.xlu1 %2542  ;;  %5109 = vrcp.f32 %v1275_v26  ;;  %v1277_v32 = vadd.f32 1.0, %v5082_v27  ;;  %v4466_v26 = vmul.f32 -1.442695, %v141_v12  ;;  %v146_v27 = vld [vmem:[%s8819_s0 + $0x438] sm:$0xff] }
  0xf6   :  { %v5086_v33 = vpop.eup %5085  ;;  %v3800_v34 = vmul.f32 %v2543_v31, %v2072_v25  ;;  %v2538_v35 = vpop.permute.xlu0 %2537  ;;  %2852 = vperm.xlu1 %4626, %v5064_v59   ;;  %5111 = vrcp.f32 %v1278_v29  ;;  %v1280_v36 = vadd.f32 1.0, %v5084_v30  ;;  %v2080_v25 = vld [vmem:[%s8820_s1 + $0x1a8] sm:$0xff]  ;;  %v2079_v29 = vld [vmem:[%s8820_s1 + $0x1a0] sm:$0xff]  ;;  %v4469_v30 = vmul.f32 -1.442695, %v144_v17  ;;  %v145_v31 = vld [vmem:[%s8819_s0 + $0x430] sm:$0xff] }
  0xf7   :  { %v5088_v37 = vpop.eup %5087  ;;  %v3799_v38 = vmul.f32 %v2538_v35, %v2071_v28  ;;  %2847 = vperm.xlu0 %4625, %v5066_v0   ;;  %5113 = vrcp.f32 %v1277_v32  ;;  %v1279_v40 = vadd.f32 1.0, %v5086_v33  ;;  %v148_v35 = vld [vmem:[%s8819_s0 + $0x448] sm:$0xff] }
  0xf8   :  { %v5090_v41 = vpop.eup %5089  ;;  %4089 = vst.msk [vmem:[%s8821_s2 + $0x168] sm:$0xff] %vm4043_vm0, %v3800_v34  ;;  %5115 = vrcp.f32 %v1280_v36  ;;  %v1282_v43 = vadd.f32 1.0, %v5088_v37  ;;  %v4468_v34 = vmul.f32 -1.442695, %v143_v22 }
  0xf9   :  { %v5092_v44 = vpop.eup %5091  ;;  %4088 = vst.msk [vmem:[%s8821_s2 + $0x160] sm:$0xff] %vm4043_vm0, %v3799_v38  ;;  %v2553_v45 = vpop.permute.xlu1 %2552  ;;  %5117 = vrcp.f32 %v1279_v40  ;;  %v1281_v46 = vadd.f32 1.0, %v5090_v41  ;;  %v147_v40 = vld [vmem:[%s8819_s0 + $0x440] sm:$0xff] }
  0xfa   :  { %v5094_v47 = vpop.eup %5093  ;;  %v3802_v48 = vmul.f32 %v2553_v45, %v2074_v39  ;;  %v2548_v49 = vpop.permute.xlu0 %2547  ;;  %2862 = vperm.xlu1 %4626, %v6485_v4   ;;  %5119 = vrcp.f32 %v1282_v43  ;;  %v1284_v50 = vadd.f32 1.0, %v5092_v44  ;;  %v4471_v39 = vmul.f32 -1.442695, %v146_v27  ;;  %v2082_v43 = vld [vmem:[%s8820_s1 + $0x1b8] sm:$0xff] }
  0xfb   :  { %v5096_v51 = vpop.eup %5095  ;;  %v3801_v52 = vmul.f32 %v2548_v49, %v2073_v42  ;;  %2857 = vperm.xlu0 %4625, %v6491_v7   ;;  %5121 = vrcp.f32 %v1281_v46  ;;  %v1283_v54 = vadd.f32 1.0, %v5094_v47  ;;  %v142_v7 = vld [vmem:[%s8819_s0 + $0x418] sm:$0xff]  ;;  %v4470_v44 = vmul.f32 -1.442695, %v145_v31  ;;  %v2081_v47 = vld [vmem:[%s8820_s1 + $0x1b0] sm:$0xff] }
  0xfc   :  { %v5098_v55 = vpop.eup %5097  ;;  %4091 = vst.msk [vmem:[%s8821_s2 + $0x178] sm:$0xff] %vm4043_vm0, %v3802_v48  ;;  %5123 = vrcp.f32 %v1284_v50  ;;  %v1286_v57 = vadd.f32 1.0, %v5096_v51  ;;  %v4467_v21 = vmul.f32 -1.442695, %v142_v7  ;;  %v150_v45 = vld [vmem:[%s8819_s0 + $0x458] sm:$0xff]  ;;  %v149_v49 = vld [vmem:[%s8819_s0 + $0x450] sm:$0xff] }
  0xfd   :  { %v5100_v58 = vpop.eup %5099  ;;  %4090 = vst.msk [vmem:[%s8821_s2 + $0x170] sm:$0xff] %vm4043_vm0, %v3801_v52  ;;  %v2563_v59 = vpop.permute.xlu1 %2562  ;;  %5125 = vrcp.f32 %v1283_v54  ;;  %v1285_v60 = vadd.f32 1.0, %v5098_v55  ;;  %v4473_v48 = vmul.f32 -1.442695, %v148_v35  ;;  %v4472_v52 = vmul.f32 -1.442695, %v147_v40 }
  0xfe   :  { %v5102_v62 = vpop.eup %5101  ;;  %v3804_v63 = vmul.f32 %v2563_v59, %v2076_v53  ;;  %v2558_v0 = vpop.permute.xlu0 %2557  ;;  %2872 = vperm.xlu1 %4626, %v6493_v11   ;;  %5127 = vrcp.f32 %v1286_v57  ;;  %v1288_v1 = vadd.f32 1.0, %v5100_v58  ;;  %v4465_v11 = vmul.f32 -1.442695, %v140_v61  ;;  %v152_v53 = vld [vmem:[%s8819_s0 + $0x468] sm:$0xff]  ;;  %v151_v58 = vld [vmem:[%s8819_s0 + $0x460] sm:$0xff] }
  0xff   :  { %v5104_v3 = vpop.eup %5103  ;;  %v3803_v4 = vmul.f32 %v2558_v0, %v2075_v56  ;;  %2867 = vperm.xlu0 %4625, %v6498_v15   ;;  %5129 = vrcp.f32 %v1285_v60  ;;  %v1287_v6 = vadd.f32 1.0, %v5102_v62  ;;  %v4475_v57 = vmul.f32 -1.442695, %v150_v45  ;;  %v2084_v61 = vld [vmem:[%s8820_s1 + $0x1c8] sm:$0xff] }
 0x100   :  { %v5106_v8 = vpop.eup %5105  ;;  %4093 = vst.msk [vmem:[%s8821_s2 + $0x188] sm:$0xff] %vm4043_vm0, %v3804_v63  ;;  %5131 = vrcp.f32 %v1288_v1  ;;  %v1290_v10 = vadd.f32 1.0, %v5104_v3  ;;  %v4474_v62 = vmul.f32 -1.442695, %v149_v49  ;;  %v154_v63 = vld [vmem:[%s8819_s0 + $0x478] sm:$0xff]  ;;  %v2083_v1 = vld [vmem:[%s8820_s1 + $0x1c0] sm:$0xff] }
 0x101   :  { %v5108_v13 = vpop.eup %5107  ;;  %4092 = vst.msk [vmem:[%s8821_s2 + $0x180] sm:$0xff] %vm4043_vm0, %v3803_v4  ;;  %v2573_v14 = vpop.permute.xlu1 %2572  ;;  %5133 = vrcp.f32 %v1287_v6  ;;  %v1289_v15 = vadd.f32 1.0, %v5106_v8  ;;  %v4477_v2 = vmul.f32 -1.442695, %v152_v53  ;;  %v153_v3 = vld [vmem:[%s8819_s0 + $0x470] sm:$0xff]  ;;  %v2092_v53 = vld [vmem:[%s8820_s1 + $0x208] sm:$0xff] }
 0x102   :  { %v5110_v18 = vpop.eup %5109  ;;  %v3806_v19 = vmul.f32 %v2573_v14, %v2078_v5  ;;  %v2568_v20 = vpop.permute.xlu0 %2567  ;;  %2882 = vperm.xlu1 %4626, %v5108_v13   ;;  %5135 = vrcp.f32 %v1290_v10  ;;  %v4476_v6 = vmul.f32 -1.442695, %v151_v58  ;;  %v4479_v10 = vmul.f32 -1.442695, %v154_v63  ;;  %v2086_v13 = vld [vmem:[%s8820_s1 + $0x1d8] sm:$0xff] }
 0x103   :  { %v5112_v23 = vpop.eup %5111  ;;  %v3805_v24 = vmul.f32 %v2568_v20, %v2077_v9  ;;  %2877 = vperm.xlu0 %4625, %v5110_v18   ;;  %5137 = vrcp.f32 %v1289_v15  ;;  %v4478_v14 = vmul.f32 -1.442695, %v153_v3 }
 0x104   :  { %v5114_v28 = vpop.eup %5113  ;;  %4095 = vst.msk [vmem:[%s8821_s2 + $0x198] sm:$0xff] %vm4043_vm0, %v3806_v19  ;;  %5139 = vpow2.f32 %v4465_v11 }
 0x105   :  { %v5116_v32 = vpop.eup %5115  ;;  %4094 = vst.msk [vmem:[%s8821_s2 + $0x190] sm:$0xff] %vm4043_vm0, %v3805_v24  ;;  %v2583_v33 = vpop.permute.xlu1 %2582  ;;  %5141 = vpow2.f32 %v4464_v16  ;;  %v2085_v16 = vld [vmem:[%s8820_s1 + $0x1d0] sm:$0xff] }
 0x106   :  { %v5118_v36 = vpop.eup %5117  ;;  %v3808_v37 = vmul.f32 %v2583_v33, %v2080_v25  ;;  %v2578_v38 = vpop.permute.xlu0 %2577  ;;  %2892 = vperm.xlu1 %4626, %v5112_v23   ;;  %5143 = vpow2.f32 %v4467_v21  ;;  %v2088_v25 = vld [vmem:[%s8820_s1 + $0x1e8] sm:$0xff] }
 0x107   :  { %v5120_v41 = vpop.eup %5119  ;;  %v3807_v42 = vmul.f32 %v2578_v38, %v2079_v29  ;;  %2887 = vperm.xlu0 %4625, %v5114_v28   ;;  %5145 = vpow2.f32 %v4466_v26  ;;  %v2087_v28 = vld [vmem:[%s8820_s1 + $0x1e0] sm:$0xff] }
 0x108   :  { %v5122_v46 = vpop.eup %5121  ;;  %4097 = vst.msk [vmem:[%s8821_s2 + $0x1a8] sm:$0xff] %vm4043_vm0, %v3808_v37  ;;  %5147 = vpow2.f32 %v4469_v30 }
 0x109   :  { %v5124_v50 = vpop.eup %5123  ;;  %4096 = vst.msk [vmem:[%s8821_s2 + $0x1a0] sm:$0xff] %vm4043_vm0, %v3807_v42  ;;  %v2593_v51 = vpop.permute.xlu1 %2592  ;;  %5149 = vpow2.f32 %v4468_v34  ;;  %v2089_v42 = vld [vmem:[%s8820_s1 + $0x1f0] sm:$0xff] }
 0x10a   :  { %v5126_v54 = vpop.eup %5125  ;;  %v3810_v55 = vmul.f32 %v2593_v51, %v2082_v43  ;;  %v2588_v56 = vpop.permute.xlu0 %2587  ;;  %2902 = vperm.xlu1 %4626, %v5116_v32   ;;  %5151 = vpow2.f32 %v4471_v39  ;;  %v2090_v39 = vld [vmem:[%s8820_s1 + $0x1f8] sm:$0xff] }
 0x10b   :  { %v5128_v59 = vpop.eup %5127  ;;  %v3809_v60 = vmul.f32 %v2588_v56, %v2081_v47  ;;  %2897 = vperm.xlu0 %4625, %v5118_v36   ;;  %5153 = vpow2.f32 %v4470_v44  ;;  %v2091_v56 = vld [vmem:[%s8820_s1 + $0x200] sm:$0xff] }
 0x10c   :  { %v5130_v0 = vpop.eup %5129  ;;  %4099 = vst.msk [vmem:[%s8821_s2 + $0x1b8] sm:$0xff] %vm4043_vm0, %v3810_v55  ;;  %5155 = vpow2.f32 %v4473_v48 }
 0x10d   :  { %v6657_v4 = vpop.eup %5131  ;;  %4098 = vst.msk [vmem:[%s8821_s2 + $0x1b0] sm:$0xff] %vm4043_vm0, %v3809_v60  ;;  %v2603_v5 = vpop.permute.xlu1 %2602  ;;  %5157 = vpow2.f32 %v4472_v52 }
 0x10e   :  { %v6663_v7 = vpop.eup %5133  ;;  %v3812_v8 = vmul.f32 %v2603_v5, %v2084_v61  ;;  %v2598_v9 = vpop.permute.xlu0 %2597  ;;  %2912 = vperm.xlu1 %4626, %v5120_v41   ;;  %5159 = vpow2.f32 %v4475_v57  ;;  %v156_v61 = vld [vmem:[%s8819_s0 + $0x488] sm:$0xff]  ;;  %v2094_v5 = vld [vmem:[%s8820_s1 + $0x218] sm:$0xff] }
 0x10f   :  { %v6665_v11 = vpop.eup %5135  ;;  %v3811_v12 = vmul.f32 %v2598_v9, %v2083_v1  ;;  %2907 = vperm.xlu0 %4625, %v5122_v46   ;;  %5161 = vpow2.f32 %v4474_v62  ;;  %v2093_v9 = vld [vmem:[%s8820_s1 + $0x210] sm:$0xff] }
 0x110   :  { %v6670_v15 = vpop.eup %5137  ;;  %4101 = vst.msk [vmem:[%s8821_s2 + $0x1c8] sm:$0xff] %vm4043_vm0, %v3812_v8  ;;  %5163 = vpow2.f32 %v4477_v2  ;;  %v155_v2 = vld [vmem:[%s8819_s0 + $0x480] sm:$0xff] }
 0x111   :  { %v5140_v17 = vpop.eup %5139  ;;  %4100 = vst.msk [vmem:[%s8821_s2 + $0x1c0] sm:$0xff] %vm4043_vm0, %v3811_v12  ;;  %v2613_v18 = vpop.permute.xlu1 %2612  ;;  %5165 = vpow2.f32 %v4476_v6  ;;  %v157_v12 = vld [vmem:[%s8819_s0 + $0x490] sm:$0xff] }
 0x112   :  { %v5142_v19 = vpop.eup %5141  ;;  %v3814_v20 = vmul.f32 %v2613_v18, %v2086_v13  ;;  %v2608_v21 = vpop.permute.xlu0 %2607  ;;  %2922 = vperm.xlu1 %4626, %v5124_v50   ;;  %v1292_v22 = vadd.f32 1.0, %v5140_v17  ;;  %5167 = vpow2.f32 %v4479_v10  ;;  %v160_v17 = vld [vmem:[%s8819_s0 + $0x4a8] sm:$0xff] }
 0x113   :  { %v5144_v23 = vpop.eup %5143  ;;  %v3813_v24 = vmul.f32 %v2608_v21, %v2085_v16  ;;  %2917 = vperm.xlu0 %4625, %v5126_v54   ;;  %v1291_v26 = vadd.f32 1.0, %v5142_v19  ;;  %5169 = vpow2.f32 %v4478_v14  ;;  %v4480_v16 = vmul.f32 -1.442695, %v155_v2 }
 0x114   :  { %v5146_v27 = vpop.eup %5145  ;;  %4103 = vst.msk [vmem:[%s8821_s2 + $0x1d8] sm:$0xff] %vm4043_vm0, %v3814_v20  ;;  %5171 = vrcp.f32 %v1292_v22  ;;  %v1294_v29 = vadd.f32 1.0, %v5144_v23  ;;  %v159_v22 = vld [vmem:[%s8819_s0 + $0x4a0] sm:$0xff] }
 0x115   :  { %v5148_v30 = vpop.eup %5147  ;;  %4102 = vst.msk [vmem:[%s8821_s2 + $0x1d0] sm:$0xff] %vm4043_vm0, %v3813_v24  ;;  %v2623_v31 = vpop.permute.xlu1 %2622  ;;  %5173 = vrcp.f32 %v1291_v26  ;;  %v1293_v32 = vadd.f32 1.0, %v5146_v27  ;;  %v4482_v26 = vmul.f32 -1.442695, %v157_v12  ;;  %v162_v27 = vld [vmem:[%s8819_s0 + $0x4b8] sm:$0xff] }
 0x116   :  { %v5150_v33 = vpop.eup %5149  ;;  %v3816_v34 = vmul.f32 %v2623_v31, %v2088_v25  ;;  %v2618_v35 = vpop.permute.xlu0 %2617  ;;  %2932 = vperm.xlu1 %4626, %v5128_v59   ;;  %5175 = vrcp.f32 %v1294_v29  ;;  %v1296_v36 = vadd.f32 1.0, %v5148_v30  ;;  %v2096_v25 = vld [vmem:[%s8820_s1 + $0x228] sm:$0xff]  ;;  %v2095_v29 = vld [vmem:[%s8820_s1 + $0x220] sm:$0xff]  ;;  %v4485_v30 = vmul.f32 -1.442695, %v160_v17  ;;  %v161_v31 = vld [vmem:[%s8819_s0 + $0x4b0] sm:$0xff] }
 0x117   :  { %v5152_v37 = vpop.eup %5151  ;;  %v3815_v38 = vmul.f32 %v2618_v35, %v2087_v28  ;;  %2927 = vperm.xlu0 %4625, %v5130_v0   ;;  %5177 = vrcp.f32 %v1293_v32  ;;  %v1295_v40 = vadd.f32 1.0, %v5150_v33  ;;  %v164_v35 = vld [vmem:[%s8819_s0 + $0x4c8] sm:$0xff] }
 0x118   :  { %v5154_v41 = vpop.eup %5153  ;;  %4105 = vst.msk [vmem:[%s8821_s2 + $0x1e8] sm:$0xff] %vm4043_vm0, %v3816_v34  ;;  %5179 = vrcp.f32 %v1296_v36  ;;  %v1298_v43 = vadd.f32 1.0, %v5152_v37  ;;  %v4484_v34 = vmul.f32 -1.442695, %v159_v22 }
 0x119   :  { %v5156_v44 = vpop.eup %5155  ;;  %4104 = vst.msk [vmem:[%s8821_s2 + $0x1e0] sm:$0xff] %vm4043_vm0, %v3815_v38  ;;  %v2633_v45 = vpop.permute.xlu1 %2632  ;;  %5181 = vrcp.f32 %v1295_v40  ;;  %v1297_v46 = vadd.f32 1.0, %v5154_v41  ;;  %v163_v40 = vld [vmem:[%s8819_s0 + $0x4c0] sm:$0xff] }
 0x11a   :  { %v5158_v47 = vpop.eup %5157  ;;  %v3818_v48 = vmul.f32 %v2633_v45, %v2090_v39  ;;  %v2628_v49 = vpop.permute.xlu0 %2627  ;;  %2942 = vperm.xlu1 %4626, %v6657_v4   ;;  %5183 = vrcp.f32 %v1298_v43  ;;  %v1300_v50 = vadd.f32 1.0, %v5156_v44  ;;  %v4487_v39 = vmul.f32 -1.442695, %v162_v27  ;;  %v2098_v43 = vld [vmem:[%s8820_s1 + $0x238] sm:$0xff] }
 0x11b   :  { %v5160_v51 = vpop.eup %5159  ;;  %v3817_v52 = vmul.f32 %v2628_v49, %v2089_v42  ;;  %2937 = vperm.xlu0 %4625, %v6663_v7   ;;  %5185 = vrcp.f32 %v1297_v46  ;;  %v1299_v54 = vadd.f32 1.0, %v5158_v47  ;;  %v158_v7 = vld [vmem:[%s8819_s0 + $0x498] sm:$0xff]  ;;  %v4486_v44 = vmul.f32 -1.442695, %v161_v31  ;;  %v2097_v47 = vld [vmem:[%s8820_s1 + $0x230] sm:$0xff] }
 0x11c   :  { %v5162_v55 = vpop.eup %5161  ;;  %4107 = vst.msk [vmem:[%s8821_s2 + $0x1f8] sm:$0xff] %vm4043_vm0, %v3818_v48  ;;  %5187 = vrcp.f32 %v1300_v50  ;;  %v1302_v57 = vadd.f32 1.0, %v5160_v51  ;;  %v4483_v21 = vmul.f32 -1.442695, %v158_v7  ;;  %v166_v45 = vld [vmem:[%s8819_s0 + $0x4d8] sm:$0xff]  ;;  %v165_v49 = vld [vmem:[%s8819_s0 + $0x4d0] sm:$0xff] }
 0x11d   :  { %v5164_v58 = vpop.eup %5163  ;;  %4106 = vst.msk [vmem:[%s8821_s2 + $0x1f0] sm:$0xff] %vm4043_vm0, %v3817_v52  ;;  %v2643_v59 = vpop.permute.xlu1 %2642  ;;  %5189 = vrcp.f32 %v1299_v54  ;;  %v1301_v60 = vadd.f32 1.0, %v5162_v55  ;;  %v4489_v48 = vmul.f32 -1.442695, %v164_v35  ;;  %v4488_v52 = vmul.f32 -1.442695, %v163_v40 }
 0x11e   :  { %v5166_v62 = vpop.eup %5165  ;;  %v3820_v63 = vmul.f32 %v2643_v59, %v2092_v53  ;;  %v2638_v0 = vpop.permute.xlu0 %2637  ;;  %2952 = vperm.xlu1 %4626, %v6665_v11   ;;  %5191 = vrcp.f32 %v1302_v57  ;;  %v1304_v1 = vadd.f32 1.0, %v5164_v58  ;;  %v4481_v11 = vmul.f32 -1.442695, %v156_v61  ;;  %v168_v53 = vld [vmem:[%s8819_s0 + $0x4e8] sm:$0xff]  ;;  %v167_v58 = vld [vmem:[%s8819_s0 + $0x4e0] sm:$0xff] }
 0x11f   :  { %v5168_v3 = vpop.eup %5167  ;;  %v3819_v4 = vmul.f32 %v2638_v0, %v2091_v56  ;;  %2947 = vperm.xlu0 %4625, %v6670_v15   ;;  %5193 = vrcp.f32 %v1301_v60  ;;  %v1303_v6 = vadd.f32 1.0, %v5166_v62  ;;  %v4491_v57 = vmul.f32 -1.442695, %v166_v45  ;;  %v2100_v61 = vld [vmem:[%s8820_s1 + $0x248] sm:$0xff] }
 0x120   :  { %v5170_v8 = vpop.eup %5169  ;;  %4109 = vst.msk [vmem:[%s8821_s2 + $0x208] sm:$0xff] %vm4043_vm0, %v3820_v63  ;;  %5195 = vrcp.f32 %v1304_v1  ;;  %v1306_v10 = vadd.f32 1.0, %v5168_v3  ;;  %v4490_v62 = vmul.f32 -1.442695, %v165_v49  ;;  %v170_v63 = vld [vmem:[%s8819_s0 + $0x4f8] sm:$0xff]  ;;  %v2099_v1 = vld [vmem:[%s8820_s1 + $0x240] sm:$0xff] }
 0x121   :  { %v5172_v13 = vpop.eup %5171  ;;  %4108 = vst.msk [vmem:[%s8821_s2 + $0x200] sm:$0xff] %vm4043_vm0, %v3819_v4  ;;  %v2653_v14 = vpop.permute.xlu1 %2652  ;;  %5197 = vrcp.f32 %v1303_v6  ;;  %v1305_v15 = vadd.f32 1.0, %v5170_v8  ;;  %v4493_v2 = vmul.f32 -1.442695, %v168_v53  ;;  %v169_v3 = vld [vmem:[%s8819_s0 + $0x4f0] sm:$0xff]  ;;  %v2108_v53 = vld [vmem:[%s8820_s1 + $0x288] sm:$0xff] }
 0x122   :  { %v5174_v18 = vpop.eup %5173  ;;  %v3822_v19 = vmul.f32 %v2653_v14, %v2094_v5  ;;  %v2648_v20 = vpop.permute.xlu0 %2647  ;;  %2962 = vperm.xlu1 %4626, %v5172_v13   ;;  %5199 = vrcp.f32 %v1306_v10  ;;  %v4492_v6 = vmul.f32 -1.442695, %v167_v58  ;;  %v4495_v10 = vmul.f32 -1.442695, %v170_v63  ;;  %v2102_v13 = vld [vmem:[%s8820_s1 + $0x258] sm:$0xff] }
 0x123   :  { %v5176_v23 = vpop.eup %5175  ;;  %v3821_v24 = vmul.f32 %v2648_v20, %v2093_v9  ;;  %2957 = vperm.xlu0 %4625, %v5174_v18   ;;  %5201 = vrcp.f32 %v1305_v15  ;;  %v4494_v14 = vmul.f32 -1.442695, %v169_v3 }
 0x124   :  { %v5178_v28 = vpop.eup %5177  ;;  %4111 = vst.msk [vmem:[%s8821_s2 + $0x218] sm:$0xff] %vm4043_vm0, %v3822_v19  ;;  %5203 = vpow2.f32 %v4481_v11 }
 0x125   :  { %v5180_v32 = vpop.eup %5179  ;;  %4110 = vst.msk [vmem:[%s8821_s2 + $0x210] sm:$0xff] %vm4043_vm0, %v3821_v24  ;;  %v2663_v33 = vpop.permute.xlu1 %2662  ;;  %5205 = vpow2.f32 %v4480_v16  ;;  %v2101_v16 = vld [vmem:[%s8820_s1 + $0x250] sm:$0xff] }
 0x126   :  { %v5182_v36 = vpop.eup %5181  ;;  %v3824_v37 = vmul.f32 %v2663_v33, %v2096_v25  ;;  %v2658_v38 = vpop.permute.xlu0 %2657  ;;  %2972 = vperm.xlu1 %4626, %v5176_v23   ;;  %5207 = vpow2.f32 %v4483_v21  ;;  %v2104_v25 = vld [vmem:[%s8820_s1 + $0x268] sm:$0xff] }
 0x127   :  { %v5184_v41 = vpop.eup %5183  ;;  %v3823_v42 = vmul.f32 %v2658_v38, %v2095_v29  ;;  %2967 = vperm.xlu0 %4625, %v5178_v28   ;;  %5209 = vpow2.f32 %v4482_v26  ;;  %v2103_v28 = vld [vmem:[%s8820_s1 + $0x260] sm:$0xff] }
 0x128   :  { %v5186_v46 = vpop.eup %5185  ;;  %4113 = vst.msk [vmem:[%s8821_s2 + $0x228] sm:$0xff] %vm4043_vm0, %v3824_v37  ;;  %5211 = vpow2.f32 %v4485_v30 }
 0x129   :  { %v5188_v50 = vpop.eup %5187  ;;  %4112 = vst.msk [vmem:[%s8821_s2 + $0x220] sm:$0xff] %vm4043_vm0, %v3823_v42  ;;  %v2673_v51 = vpop.permute.xlu1 %2672  ;;  %5213 = vpow2.f32 %v4484_v34  ;;  %v2105_v42 = vld [vmem:[%s8820_s1 + $0x270] sm:$0xff] }
 0x12a   :  { %v5190_v54 = vpop.eup %5189  ;;  %v3826_v55 = vmul.f32 %v2673_v51, %v2098_v43  ;;  %v2668_v56 = vpop.permute.xlu0 %2667  ;;  %2982 = vperm.xlu1 %4626, %v5180_v32   ;;  %5215 = vpow2.f32 %v4487_v39  ;;  %v2106_v39 = vld [vmem:[%s8820_s1 + $0x278] sm:$0xff] }
 0x12b   :  { %v5192_v59 = vpop.eup %5191  ;;  %v3825_v60 = vmul.f32 %v2668_v56, %v2097_v47  ;;  %2977 = vperm.xlu0 %4625, %v5182_v36   ;;  %5217 = vpow2.f32 %v4486_v44  ;;  %v2107_v56 = vld [vmem:[%s8820_s1 + $0x280] sm:$0xff] }
 0x12c   :  { %v5194_v0 = vpop.eup %5193  ;;  %4115 = vst.msk [vmem:[%s8821_s2 + $0x238] sm:$0xff] %vm4043_vm0, %v3826_v55  ;;  %5219 = vpow2.f32 %v4489_v48 }
 0x12d   :  { %v6829_v4 = vpop.eup %5195  ;;  %4114 = vst.msk [vmem:[%s8821_s2 + $0x230] sm:$0xff] %vm4043_vm0, %v3825_v60  ;;  %v2683_v5 = vpop.permute.xlu1 %2682  ;;  %5221 = vpow2.f32 %v4488_v52 }
 0x12e   :  { %v6835_v7 = vpop.eup %5197  ;;  %v3828_v8 = vmul.f32 %v2683_v5, %v2100_v61  ;;  %v2678_v9 = vpop.permute.xlu0 %2677  ;;  %2992 = vperm.xlu1 %4626, %v5184_v41   ;;  %5223 = vpow2.f32 %v4491_v57  ;;  %v172_v61 = vld [vmem:[%s8819_s0 + $0x508] sm:$0xff]  ;;  %v2110_v5 = vld [vmem:[%s8820_s1 + $0x298] sm:$0xff] }
 0x12f   :  { %v6837_v11 = vpop.eup %5199  ;;  %v3827_v12 = vmul.f32 %v2678_v9, %v2099_v1  ;;  %2987 = vperm.xlu0 %4625, %v5186_v46   ;;  %5225 = vpow2.f32 %v4490_v62  ;;  %v2109_v9 = vld [vmem:[%s8820_s1 + $0x290] sm:$0xff] }
 0x130   :  { %v6842_v15 = vpop.eup %5201  ;;  %4117 = vst.msk [vmem:[%s8821_s2 + $0x248] sm:$0xff] %vm4043_vm0, %v3828_v8  ;;  %5227 = vpow2.f32 %v4493_v2  ;;  %v171_v2 = vld [vmem:[%s8819_s0 + $0x500] sm:$0xff] }
 0x131   :  { %v5204_v17 = vpop.eup %5203  ;;  %4116 = vst.msk [vmem:[%s8821_s2 + $0x240] sm:$0xff] %vm4043_vm0, %v3827_v12  ;;  %v2693_v18 = vpop.permute.xlu1 %2692  ;;  %5229 = vpow2.f32 %v4492_v6  ;;  %v173_v12 = vld [vmem:[%s8819_s0 + $0x510] sm:$0xff] }
 0x132   :  { %v5206_v19 = vpop.eup %5205  ;;  %v3830_v20 = vmul.f32 %v2693_v18, %v2102_v13  ;;  %v2688_v21 = vpop.permute.xlu0 %2687  ;;  %3002 = vperm.xlu1 %4626, %v5188_v50   ;;  %v1308_v22 = vadd.f32 1.0, %v5204_v17  ;;  %5231 = vpow2.f32 %v4495_v10  ;;  %v176_v17 = vld [vmem:[%s8819_s0 + $0x528] sm:$0xff] }
 0x133   :  { %v5208_v23 = vpop.eup %5207  ;;  %v3829_v24 = vmul.f32 %v2688_v21, %v2101_v16  ;;  %2997 = vperm.xlu0 %4625, %v5190_v54   ;;  %v1307_v26 = vadd.f32 1.0, %v5206_v19  ;;  %5233 = vpow2.f32 %v4494_v14  ;;  %v4496_v16 = vmul.f32 -1.442695, %v171_v2 }
 0x134   :  { %v5210_v27 = vpop.eup %5209  ;;  %4119 = vst.msk [vmem:[%s8821_s2 + $0x258] sm:$0xff] %vm4043_vm0, %v3830_v20  ;;  %5235 = vrcp.f32 %v1308_v22  ;;  %v1310_v29 = vadd.f32 1.0, %v5208_v23  ;;  %v175_v22 = vld [vmem:[%s8819_s0 + $0x520] sm:$0xff] }
 0x135   :  { %v5212_v30 = vpop.eup %5211  ;;  %4118 = vst.msk [vmem:[%s8821_s2 + $0x250] sm:$0xff] %vm4043_vm0, %v3829_v24  ;;  %v2703_v31 = vpop.permute.xlu1 %2702  ;;  %5237 = vrcp.f32 %v1307_v26  ;;  %v1309_v32 = vadd.f32 1.0, %v5210_v27  ;;  %v4498_v26 = vmul.f32 -1.442695, %v173_v12  ;;  %v178_v27 = vld [vmem:[%s8819_s0 + $0x538] sm:$0xff] }
 0x136   :  { %v5214_v33 = vpop.eup %5213  ;;  %v3832_v34 = vmul.f32 %v2703_v31, %v2104_v25  ;;  %v2698_v35 = vpop.permute.xlu0 %2697  ;;  %3012 = vperm.xlu1 %4626, %v5192_v59   ;;  %5239 = vrcp.f32 %v1310_v29  ;;  %v1312_v36 = vadd.f32 1.0, %v5212_v30  ;;  %v2112_v25 = vld [vmem:[%s8820_s1 + $0x2a8] sm:$0xff]  ;;  %v2111_v29 = vld [vmem:[%s8820_s1 + $0x2a0] sm:$0xff]  ;;  %v4501_v30 = vmul.f32 -1.442695, %v176_v17  ;;  %v177_v31 = vld [vmem:[%s8819_s0 + $0x530] sm:$0xff] }
 0x137   :  { %v5216_v37 = vpop.eup %5215  ;;  %v3831_v38 = vmul.f32 %v2698_v35, %v2103_v28  ;;  %3007 = vperm.xlu0 %4625, %v5194_v0   ;;  %5241 = vrcp.f32 %v1309_v32  ;;  %v1311_v40 = vadd.f32 1.0, %v5214_v33  ;;  %v180_v35 = vld [vmem:[%s8819_s0 + $0x548] sm:$0xff] }
 0x138   :  { %v5218_v41 = vpop.eup %5217  ;;  %4121 = vst.msk [vmem:[%s8821_s2 + $0x268] sm:$0xff] %vm4043_vm0, %v3832_v34  ;;  %5243 = vrcp.f32 %v1312_v36  ;;  %v1314_v43 = vadd.f32 1.0, %v5216_v37  ;;  %v4500_v34 = vmul.f32 -1.442695, %v175_v22 }
 0x139   :  { %v5220_v44 = vpop.eup %5219  ;;  %4120 = vst.msk [vmem:[%s8821_s2 + $0x260] sm:$0xff] %vm4043_vm0, %v3831_v38  ;;  %v2713_v45 = vpop.permute.xlu1 %2712  ;;  %5245 = vrcp.f32 %v1311_v40  ;;  %v1313_v46 = vadd.f32 1.0, %v5218_v41  ;;  %v179_v40 = vld [vmem:[%s8819_s0 + $0x540] sm:$0xff] }
 0x13a   :  { %v5222_v47 = vpop.eup %5221  ;;  %v3834_v48 = vmul.f32 %v2713_v45, %v2106_v39  ;;  %v2708_v49 = vpop.permute.xlu0 %2707  ;;  %3022 = vperm.xlu1 %4626, %v6829_v4   ;;  %5247 = vrcp.f32 %v1314_v43  ;;  %v1316_v50 = vadd.f32 1.0, %v5220_v44  ;;  %v4503_v39 = vmul.f32 -1.442695, %v178_v27  ;;  %v2114_v43 = vld [vmem:[%s8820_s1 + $0x2b8] sm:$0xff] }
 0x13b   :  { %v5224_v51 = vpop.eup %5223  ;;  %v3833_v52 = vmul.f32 %v2708_v49, %v2105_v42  ;;  %3017 = vperm.xlu0 %4625, %v6835_v7   ;;  %5249 = vrcp.f32 %v1313_v46  ;;  %v1315_v54 = vadd.f32 1.0, %v5222_v47  ;;  %v174_v7 = vld [vmem:[%s8819_s0 + $0x518] sm:$0xff]  ;;  %v4502_v44 = vmul.f32 -1.442695, %v177_v31  ;;  %v2113_v47 = vld [vmem:[%s8820_s1 + $0x2b0] sm:$0xff] }
 0x13c   :  { %v5226_v55 = vpop.eup %5225  ;;  %4123 = vst.msk [vmem:[%s8821_s2 + $0x278] sm:$0xff] %vm4043_vm0, %v3834_v48  ;;  %5251 = vrcp.f32 %v1316_v50  ;;  %v1318_v57 = vadd.f32 1.0, %v5224_v51  ;;  %v4499_v21 = vmul.f32 -1.442695, %v174_v7  ;;  %v182_v45 = vld [vmem:[%s8819_s0 + $0x558] sm:$0xff]  ;;  %v181_v49 = vld [vmem:[%s8819_s0 + $0x550] sm:$0xff] }
 0x13d   :  { %v5228_v58 = vpop.eup %5227  ;;  %4122 = vst.msk [vmem:[%s8821_s2 + $0x270] sm:$0xff] %vm4043_vm0, %v3833_v52  ;;  %v2723_v59 = vpop.permute.xlu1 %2722  ;;  %5253 = vrcp.f32 %v1315_v54  ;;  %v1317_v60 = vadd.f32 1.0, %v5226_v55  ;;  %v4505_v48 = vmul.f32 -1.442695, %v180_v35  ;;  %v4504_v52 = vmul.f32 -1.442695, %v179_v40 }
 0x13e   :  { %v5230_v62 = vpop.eup %5229  ;;  %v3836_v63 = vmul.f32 %v2723_v59, %v2108_v53  ;;  %v2718_v0 = vpop.permute.xlu0 %2717  ;;  %3032 = vperm.xlu1 %4626, %v6837_v11   ;;  %5255 = vrcp.f32 %v1318_v57  ;;  %v1320_v1 = vadd.f32 1.0, %v5228_v58  ;;  %v4497_v11 = vmul.f32 -1.442695, %v172_v61  ;;  %v184_v53 = vld [vmem:[%s8819_s0 + $0x568] sm:$0xff]  ;;  %v183_v58 = vld [vmem:[%s8819_s0 + $0x560] sm:$0xff] }
 0x13f   :  { %v5232_v3 = vpop.eup %5231  ;;  %v3835_v4 = vmul.f32 %v2718_v0, %v2107_v56  ;;  %3027 = vperm.xlu0 %4625, %v6842_v15   ;;  %5257 = vrcp.f32 %v1317_v60  ;;  %v1319_v6 = vadd.f32 1.0, %v5230_v62  ;;  %v4507_v57 = vmul.f32 -1.442695, %v182_v45  ;;  %v2116_v61 = vld [vmem:[%s8820_s1 + $0x2c8] sm:$0xff] }
 0x140   :  { %v5234_v8 = vpop.eup %5233  ;;  %4125 = vst.msk [vmem:[%s8821_s2 + $0x288] sm:$0xff] %vm4043_vm0, %v3836_v63  ;;  %5259 = vrcp.f32 %v1320_v1  ;;  %v1322_v10 = vadd.f32 1.0, %v5232_v3  ;;  %v4506_v62 = vmul.f32 -1.442695, %v181_v49  ;;  %v186_v63 = vld [vmem:[%s8819_s0 + $0x578] sm:$0xff]  ;;  %v2115_v1 = vld [vmem:[%s8820_s1 + $0x2c0] sm:$0xff] }
 0x141   :  { %v5236_v13 = vpop.eup %5235  ;;  %4124 = vst.msk [vmem:[%s8821_s2 + $0x280] sm:$0xff] %vm4043_vm0, %v3835_v4  ;;  %v2733_v14 = vpop.permute.xlu1 %2732  ;;  %5261 = vrcp.f32 %v1319_v6  ;;  %v1321_v15 = vadd.f32 1.0, %v5234_v8  ;;  %v4509_v2 = vmul.f32 -1.442695, %v184_v53  ;;  %v185_v3 = vld [vmem:[%s8819_s0 + $0x570] sm:$0xff]  ;;  %v2124_v53 = vld [vmem:[%s8820_s1 + $0x308] sm:$0xff] }
 0x142   :  { %v5238_v18 = vpop.eup %5237  ;;  %v3838_v19 = vmul.f32 %v2733_v14, %v2110_v5  ;;  %v2728_v20 = vpop.permute.xlu0 %2727  ;;  %3042 = vperm.xlu1 %4626, %v5236_v13   ;;  %5263 = vrcp.f32 %v1322_v10  ;;  %v4508_v6 = vmul.f32 -1.442695, %v183_v58  ;;  %v4511_v10 = vmul.f32 -1.442695, %v186_v63  ;;  %v2118_v13 = vld [vmem:[%s8820_s1 + $0x2d8] sm:$0xff] }
 0x143   :  { %v5240_v23 = vpop.eup %5239  ;;  %v3837_v24 = vmul.f32 %v2728_v20, %v2109_v9  ;;  %3037 = vperm.xlu0 %4625, %v5238_v18   ;;  %5265 = vrcp.f32 %v1321_v15  ;;  %v4510_v14 = vmul.f32 -1.442695, %v185_v3 }
 0x144   :  { %v5242_v28 = vpop.eup %5241  ;;  %4127 = vst.msk [vmem:[%s8821_s2 + $0x298] sm:$0xff] %vm4043_vm0, %v3838_v19  ;;  %5267 = vpow2.f32 %v4497_v11 }
 0x145   :  { %v5244_v32 = vpop.eup %5243  ;;  %4126 = vst.msk [vmem:[%s8821_s2 + $0x290] sm:$0xff] %vm4043_vm0, %v3837_v24  ;;  %v2743_v33 = vpop.permute.xlu1 %2742  ;;  %5269 = vpow2.f32 %v4496_v16  ;;  %v2117_v16 = vld [vmem:[%s8820_s1 + $0x2d0] sm:$0xff] }
 0x146   :  { %v5246_v36 = vpop.eup %5245  ;;  %v3840_v37 = vmul.f32 %v2743_v33, %v2112_v25  ;;  %v2738_v38 = vpop.permute.xlu0 %2737  ;;  %3052 = vperm.xlu1 %4626, %v5240_v23   ;;  %5271 = vpow2.f32 %v4499_v21  ;;  %v2120_v25 = vld [vmem:[%s8820_s1 + $0x2e8] sm:$0xff] }
 0x147   :  { %v5248_v41 = vpop.eup %5247  ;;  %v3839_v42 = vmul.f32 %v2738_v38, %v2111_v29  ;;  %3047 = vperm.xlu0 %4625, %v5242_v28   ;;  %5273 = vpow2.f32 %v4498_v26  ;;  %v2119_v28 = vld [vmem:[%s8820_s1 + $0x2e0] sm:$0xff] }
 0x148   :  { %v5250_v46 = vpop.eup %5249  ;;  %4129 = vst.msk [vmem:[%s8821_s2 + $0x2a8] sm:$0xff] %vm4043_vm0, %v3840_v37  ;;  %5275 = vpow2.f32 %v4501_v30 }
 0x149   :  { %v5252_v50 = vpop.eup %5251  ;;  %4128 = vst.msk [vmem:[%s8821_s2 + $0x2a0] sm:$0xff] %vm4043_vm0, %v3839_v42  ;;  %v2753_v51 = vpop.permute.xlu1 %2752  ;;  %5277 = vpow2.f32 %v4500_v34  ;;  %v2121_v42 = vld [vmem:[%s8820_s1 + $0x2f0] sm:$0xff] }
 0x14a   :  { %v5254_v54 = vpop.eup %5253  ;;  %v3842_v55 = vmul.f32 %v2753_v51, %v2114_v43  ;;  %v2748_v56 = vpop.permute.xlu0 %2747  ;;  %3062 = vperm.xlu1 %4626, %v5244_v32   ;;  %5279 = vpow2.f32 %v4503_v39  ;;  %v2122_v39 = vld [vmem:[%s8820_s1 + $0x2f8] sm:$0xff] }
 0x14b   :  { %v5256_v59 = vpop.eup %5255  ;;  %v3841_v60 = vmul.f32 %v2748_v56, %v2113_v47  ;;  %3057 = vperm.xlu0 %4625, %v5246_v36   ;;  %5281 = vpow2.f32 %v4502_v44  ;;  %v2123_v56 = vld [vmem:[%s8820_s1 + $0x300] sm:$0xff] }
 0x14c   :  { %v5258_v0 = vpop.eup %5257  ;;  %4131 = vst.msk [vmem:[%s8821_s2 + $0x2b8] sm:$0xff] %vm4043_vm0, %v3842_v55  ;;  %5283 = vpow2.f32 %v4505_v48 }
 0x14d   :  { %v7001_v4 = vpop.eup %5259  ;;  %4130 = vst.msk [vmem:[%s8821_s2 + $0x2b0] sm:$0xff] %vm4043_vm0, %v3841_v60  ;;  %v2763_v5 = vpop.permute.xlu1 %2762  ;;  %5285 = vpow2.f32 %v4504_v52 }
 0x14e   :  { %v7007_v7 = vpop.eup %5261  ;;  %v3844_v8 = vmul.f32 %v2763_v5, %v2116_v61  ;;  %v2758_v9 = vpop.permute.xlu0 %2757  ;;  %3072 = vperm.xlu1 %4626, %v5248_v41   ;;  %5287 = vpow2.f32 %v4507_v57  ;;  %v188_v61 = vld [vmem:[%s8819_s0 + $0x588] sm:$0xff]  ;;  %v2126_v5 = vld [vmem:[%s8820_s1 + $0x318] sm:$0xff] }
 0x14f   :  { %v7009_v11 = vpop.eup %5263  ;;  %v3843_v12 = vmul.f32 %v2758_v9, %v2115_v1  ;;  %3067 = vperm.xlu0 %4625, %v5250_v46   ;;  %5289 = vpow2.f32 %v4506_v62  ;;  %v2125_v9 = vld [vmem:[%s8820_s1 + $0x310] sm:$0xff] }
 0x150   :  { %v7014_v15 = vpop.eup %5265  ;;  %4133 = vst.msk [vmem:[%s8821_s2 + $0x2c8] sm:$0xff] %vm4043_vm0, %v3844_v8  ;;  %5291 = vpow2.f32 %v4509_v2  ;;  %v187_v2 = vld [vmem:[%s8819_s0 + $0x580] sm:$0xff] }
 0x151   :  { %v5268_v17 = vpop.eup %5267  ;;  %4132 = vst.msk [vmem:[%s8821_s2 + $0x2c0] sm:$0xff] %vm4043_vm0, %v3843_v12  ;;  %v2773_v18 = vpop.permute.xlu1 %2772  ;;  %5293 = vpow2.f32 %v4508_v6  ;;  %v189_v12 = vld [vmem:[%s8819_s0 + $0x590] sm:$0xff] }
 0x152   :  { %v5270_v19 = vpop.eup %5269  ;;  %v3846_v20 = vmul.f32 %v2773_v18, %v2118_v13  ;;  %v2768_v21 = vpop.permute.xlu0 %2767  ;;  %3082 = vperm.xlu1 %4626, %v5252_v50   ;;  %v1324_v22 = vadd.f32 1.0, %v5268_v17  ;;  %5295 = vpow2.f32 %v4511_v10  ;;  %v192_v17 = vld [vmem:[%s8819_s0 + $0x5a8] sm:$0xff] }
 0x153   :  { %v5272_v23 = vpop.eup %5271  ;;  %v3845_v24 = vmul.f32 %v2768_v21, %v2117_v16  ;;  %3077 = vperm.xlu0 %4625, %v5254_v54   ;;  %v1323_v26 = vadd.f32 1.0, %v5270_v19  ;;  %5297 = vpow2.f32 %v4510_v14  ;;  %v4512_v16 = vmul.f32 -1.442695, %v187_v2 }
 0x154   :  { %v5274_v27 = vpop.eup %5273  ;;  %4135 = vst.msk [vmem:[%s8821_s2 + $0x2d8] sm:$0xff] %vm4043_vm0, %v3846_v20  ;;  %5299 = vrcp.f32 %v1324_v22  ;;  %v1326_v29 = vadd.f32 1.0, %v5272_v23  ;;  %v191_v22 = vld [vmem:[%s8819_s0 + $0x5a0] sm:$0xff] }
 0x155   :  { %v5276_v30 = vpop.eup %5275  ;;  %4134 = vst.msk [vmem:[%s8821_s2 + $0x2d0] sm:$0xff] %vm4043_vm0, %v3845_v24  ;;  %v2783_v31 = vpop.permute.xlu1 %2782  ;;  %5301 = vrcp.f32 %v1323_v26  ;;  %v1325_v32 = vadd.f32 1.0, %v5274_v27  ;;  %v4514_v26 = vmul.f32 -1.442695, %v189_v12  ;;  %v194_v27 = vld [vmem:[%s8819_s0 + $0x5b8] sm:$0xff] }
 0x156   :  { %v5278_v33 = vpop.eup %5277  ;;  %v3848_v34 = vmul.f32 %v2783_v31, %v2120_v25  ;;  %v2778_v35 = vpop.permute.xlu0 %2777  ;;  %3092 = vperm.xlu1 %4626, %v5256_v59   ;;  %5303 = vrcp.f32 %v1326_v29  ;;  %v1328_v36 = vadd.f32 1.0, %v5276_v30  ;;  %v2128_v25 = vld [vmem:[%s8820_s1 + $0x328] sm:$0xff]  ;;  %v2127_v29 = vld [vmem:[%s8820_s1 + $0x320] sm:$0xff]  ;;  %v4517_v30 = vmul.f32 -1.442695, %v192_v17  ;;  %v193_v31 = vld [vmem:[%s8819_s0 + $0x5b0] sm:$0xff] }
 0x157   :  { %v5280_v37 = vpop.eup %5279  ;;  %v3847_v38 = vmul.f32 %v2778_v35, %v2119_v28  ;;  %3087 = vperm.xlu0 %4625, %v5258_v0   ;;  %5305 = vrcp.f32 %v1325_v32  ;;  %v1327_v40 = vadd.f32 1.0, %v5278_v33  ;;  %v196_v35 = vld [vmem:[%s8819_s0 + $0x5c8] sm:$0xff] }
 0x158   :  { %v5282_v41 = vpop.eup %5281  ;;  %4137 = vst.msk [vmem:[%s8821_s2 + $0x2e8] sm:$0xff] %vm4043_vm0, %v3848_v34  ;;  %5307 = vrcp.f32 %v1328_v36  ;;  %v1330_v43 = vadd.f32 1.0, %v5280_v37  ;;  %v4516_v34 = vmul.f32 -1.442695, %v191_v22 }
 0x159   :  { %v5284_v44 = vpop.eup %5283  ;;  %4136 = vst.msk [vmem:[%s8821_s2 + $0x2e0] sm:$0xff] %vm4043_vm0, %v3847_v38  ;;  %v2793_v45 = vpop.permute.xlu1 %2792  ;;  %5309 = vrcp.f32 %v1327_v40  ;;  %v1329_v46 = vadd.f32 1.0, %v5282_v41  ;;  %v195_v40 = vld [vmem:[%s8819_s0 + $0x5c0] sm:$0xff] }
 0x15a   :  { %v5286_v47 = vpop.eup %5285  ;;  %v3850_v48 = vmul.f32 %v2793_v45, %v2122_v39  ;;  %v2788_v49 = vpop.permute.xlu0 %2787  ;;  %3102 = vperm.xlu1 %4626, %v7001_v4   ;;  %5311 = vrcp.f32 %v1330_v43  ;;  %v1332_v50 = vadd.f32 1.0, %v5284_v44  ;;  %v4519_v39 = vmul.f32 -1.442695, %v194_v27  ;;  %v2130_v43 = vld [vmem:[%s8820_s1 + $0x338] sm:$0xff] }
 0x15b   :  { %v5288_v51 = vpop.eup %5287  ;;  %v3849_v52 = vmul.f32 %v2788_v49, %v2121_v42  ;;  %3097 = vperm.xlu0 %4625, %v7007_v7   ;;  %5313 = vrcp.f32 %v1329_v46  ;;  %v1331_v54 = vadd.f32 1.0, %v5286_v47  ;;  %v190_v7 = vld [vmem:[%s8819_s0 + $0x598] sm:$0xff]  ;;  %v4518_v44 = vmul.f32 -1.442695, %v193_v31  ;;  %v2129_v47 = vld [vmem:[%s8820_s1 + $0x330] sm:$0xff] }
 0x15c   :  { %v5290_v55 = vpop.eup %5289  ;;  %4139 = vst.msk [vmem:[%s8821_s2 + $0x2f8] sm:$0xff] %vm4043_vm0, %v3850_v48  ;;  %5315 = vrcp.f32 %v1332_v50  ;;  %v1334_v57 = vadd.f32 1.0, %v5288_v51  ;;  %v4515_v21 = vmul.f32 -1.442695, %v190_v7  ;;  %v198_v45 = vld [vmem:[%s8819_s0 + $0x5d8] sm:$0xff]  ;;  %v197_v49 = vld [vmem:[%s8819_s0 + $0x5d0] sm:$0xff] }
 0x15d   :  { %v5292_v58 = vpop.eup %5291  ;;  %4138 = vst.msk [vmem:[%s8821_s2 + $0x2f0] sm:$0xff] %vm4043_vm0, %v3849_v52  ;;  %v2803_v59 = vpop.permute.xlu1 %2802  ;;  %5317 = vrcp.f32 %v1331_v54  ;;  %v1333_v60 = vadd.f32 1.0, %v5290_v55  ;;  %v4521_v48 = vmul.f32 -1.442695, %v196_v35  ;;  %v4520_v52 = vmul.f32 -1.442695, %v195_v40 }
 0x15e   :  { %v5294_v62 = vpop.eup %5293  ;;  %v3852_v63 = vmul.f32 %v2803_v59, %v2124_v53  ;;  %v2798_v0 = vpop.permute.xlu0 %2797  ;;  %3112 = vperm.xlu1 %4626, %v7009_v11   ;;  %5319 = vrcp.f32 %v1334_v57  ;;  %v1336_v1 = vadd.f32 1.0, %v5292_v58  ;;  %v4513_v11 = vmul.f32 -1.442695, %v188_v61  ;;  %v200_v53 = vld [vmem:[%s8819_s0 + $0x5e8] sm:$0xff]  ;;  %v199_v58 = vld [vmem:[%s8819_s0 + $0x5e0] sm:$0xff] }
 0x15f   :  { %v5296_v3 = vpop.eup %5295  ;;  %v3851_v4 = vmul.f32 %v2798_v0, %v2123_v56  ;;  %3107 = vperm.xlu0 %4625, %v7014_v15   ;;  %5321 = vrcp.f32 %v1333_v60  ;;  %v1335_v6 = vadd.f32 1.0, %v5294_v62  ;;  %v4523_v57 = vmul.f32 -1.442695, %v198_v45  ;;  %v2132_v61 = vld [vmem:[%s8820_s1 + $0x348] sm:$0xff] }
 0x160   :  { %v5298_v8 = vpop.eup %5297  ;;  %4141 = vst.msk [vmem:[%s8821_s2 + $0x308] sm:$0xff] %vm4043_vm0, %v3852_v63  ;;  %5323 = vrcp.f32 %v1336_v1  ;;  %v1338_v10 = vadd.f32 1.0, %v5296_v3  ;;  %v4522_v62 = vmul.f32 -1.442695, %v197_v49  ;;  %v202_v63 = vld [vmem:[%s8819_s0 + $0x5f8] sm:$0xff]  ;;  %v2131_v1 = vld [vmem:[%s8820_s1 + $0x340] sm:$0xff] }
 0x161   :  { %v5300_v13 = vpop.eup %5299  ;;  %4140 = vst.msk [vmem:[%s8821_s2 + $0x300] sm:$0xff] %vm4043_vm0, %v3851_v4  ;;  %v2813_v14 = vpop.permute.xlu1 %2812  ;;  %5325 = vrcp.f32 %v1335_v6  ;;  %v1337_v15 = vadd.f32 1.0, %v5298_v8  ;;  %v4525_v2 = vmul.f32 -1.442695, %v200_v53  ;;  %v201_v3 = vld [vmem:[%s8819_s0 + $0x5f0] sm:$0xff]  ;;  %v2140_v53 = vld [vmem:[%s8820_s1 + $0x388] sm:$0xff] }
 0x162   :  { %v5302_v18 = vpop.eup %5301  ;;  %v3854_v19 = vmul.f32 %v2813_v14, %v2126_v5  ;;  %v2808_v20 = vpop.permute.xlu0 %2807  ;;  %3122 = vperm.xlu1 %4626, %v5300_v13   ;;  %5327 = vrcp.f32 %v1338_v10  ;;  %v4524_v6 = vmul.f32 -1.442695, %v199_v58  ;;  %v4527_v10 = vmul.f32 -1.442695, %v202_v63  ;;  %v2134_v13 = vld [vmem:[%s8820_s1 + $0x358] sm:$0xff] }
 0x163   :  { %v5304_v23 = vpop.eup %5303  ;;  %v3853_v24 = vmul.f32 %v2808_v20, %v2125_v9  ;;  %3117 = vperm.xlu0 %4625, %v5302_v18   ;;  %5329 = vrcp.f32 %v1337_v15  ;;  %v4526_v14 = vmul.f32 -1.442695, %v201_v3 }
 0x164   :  { %v5306_v28 = vpop.eup %5305  ;;  %4143 = vst.msk [vmem:[%s8821_s2 + $0x318] sm:$0xff] %vm4043_vm0, %v3854_v19  ;;  %5331 = vpow2.f32 %v4513_v11 }
 0x165   :  { %v5308_v32 = vpop.eup %5307  ;;  %4142 = vst.msk [vmem:[%s8821_s2 + $0x310] sm:$0xff] %vm4043_vm0, %v3853_v24  ;;  %v2823_v33 = vpop.permute.xlu1 %2822  ;;  %5333 = vpow2.f32 %v4512_v16  ;;  %v2133_v16 = vld [vmem:[%s8820_s1 + $0x350] sm:$0xff] }
 0x166   :  { %v5310_v36 = vpop.eup %5309  ;;  %v3856_v37 = vmul.f32 %v2823_v33, %v2128_v25  ;;  %v2818_v38 = vpop.permute.xlu0 %2817  ;;  %3132 = vperm.xlu1 %4626, %v5304_v23   ;;  %5335 = vpow2.f32 %v4515_v21  ;;  %v2136_v25 = vld [vmem:[%s8820_s1 + $0x368] sm:$0xff] }
 0x167   :  { %v5312_v41 = vpop.eup %5311  ;;  %v3855_v42 = vmul.f32 %v2818_v38, %v2127_v29  ;;  %3127 = vperm.xlu0 %4625, %v5306_v28   ;;  %5337 = vpow2.f32 %v4514_v26  ;;  %v2135_v28 = vld [vmem:[%s8820_s1 + $0x360] sm:$0xff] }
 0x168   :  { %v5314_v46 = vpop.eup %5313  ;;  %4145 = vst.msk [vmem:[%s8821_s2 + $0x328] sm:$0xff] %vm4043_vm0, %v3856_v37  ;;  %5339 = vpow2.f32 %v4517_v30 }
 0x169   :  { %v5316_v50 = vpop.eup %5315  ;;  %4144 = vst.msk [vmem:[%s8821_s2 + $0x320] sm:$0xff] %vm4043_vm0, %v3855_v42  ;;  %v2833_v51 = vpop.permute.xlu1 %2832  ;;  %5341 = vpow2.f32 %v4516_v34  ;;  %v2137_v42 = vld [vmem:[%s8820_s1 + $0x370] sm:$0xff] }
 0x16a   :  { %v5318_v54 = vpop.eup %5317  ;;  %v3858_v55 = vmul.f32 %v2833_v51, %v2130_v43  ;;  %v2828_v56 = vpop.permute.xlu0 %2827  ;;  %3142 = vperm.xlu1 %4626, %v5308_v32   ;;  %5343 = vpow2.f32 %v4519_v39  ;;  %v2138_v39 = vld [vmem:[%s8820_s1 + $0x378] sm:$0xff] }
 0x16b   :  { %v5320_v59 = vpop.eup %5319  ;;  %v3857_v60 = vmul.f32 %v2828_v56, %v2129_v47  ;;  %3137 = vperm.xlu0 %4625, %v5310_v36   ;;  %5345 = vpow2.f32 %v4518_v44  ;;  %v2139_v56 = vld [vmem:[%s8820_s1 + $0x380] sm:$0xff] }
 0x16c   :  { %v5322_v0 = vpop.eup %5321  ;;  %4147 = vst.msk [vmem:[%s8821_s2 + $0x338] sm:$0xff] %vm4043_vm0, %v3858_v55  ;;  %5347 = vpow2.f32 %v4521_v48 }
 0x16d   :  { %v7173_v4 = vpop.eup %5323  ;;  %4146 = vst.msk [vmem:[%s8821_s2 + $0x330] sm:$0xff] %vm4043_vm0, %v3857_v60  ;;  %v2843_v5 = vpop.permute.xlu1 %2842  ;;  %5349 = vpow2.f32 %v4520_v52 }
 0x16e   :  { %v7179_v7 = vpop.eup %5325  ;;  %v3860_v8 = vmul.f32 %v2843_v5, %v2132_v61  ;;  %v2838_v9 = vpop.permute.xlu0 %2837  ;;  %3152 = vperm.xlu1 %4626, %v5312_v41   ;;  %5351 = vpow2.f32 %v4523_v57  ;;  %v204_v61 = vld [vmem:[%s8819_s0 + $0x608] sm:$0xff]  ;;  %v2142_v5 = vld [vmem:[%s8820_s1 + $0x398] sm:$0xff] }
 0x16f   :  { %v7181_v11 = vpop.eup %5327  ;;  %v3859_v12 = vmul.f32 %v2838_v9, %v2131_v1  ;;  %3147 = vperm.xlu0 %4625, %v5314_v46   ;;  %5353 = vpow2.f32 %v4522_v62  ;;  %v2141_v9 = vld [vmem:[%s8820_s1 + $0x390] sm:$0xff] }
 0x170   :  { %v7186_v15 = vpop.eup %5329  ;;  %4149 = vst.msk [vmem:[%s8821_s2 + $0x348] sm:$0xff] %vm4043_vm0, %v3860_v8  ;;  %5355 = vpow2.f32 %v4525_v2  ;;  %v203_v2 = vld [vmem:[%s8819_s0 + $0x600] sm:$0xff] }
 0x171   :  { %v5332_v17 = vpop.eup %5331  ;;  %4148 = vst.msk [vmem:[%s8821_s2 + $0x340] sm:$0xff] %vm4043_vm0, %v3859_v12  ;;  %v2853_v18 = vpop.permute.xlu1 %2852  ;;  %5357 = vpow2.f32 %v4524_v6  ;;  %v205_v12 = vld [vmem:[%s8819_s0 + $0x610] sm:$0xff] }
 0x172   :  { %v5334_v19 = vpop.eup %5333  ;;  %v3862_v20 = vmul.f32 %v2853_v18, %v2134_v13  ;;  %v2848_v21 = vpop.permute.xlu0 %2847  ;;  %3162 = vperm.xlu1 %4626, %v5316_v50   ;;  %v1340_v22 = vadd.f32 1.0, %v5332_v17  ;;  %5359 = vpow2.f32 %v4527_v10  ;;  %v208_v17 = vld [vmem:[%s8819_s0 + $0x628] sm:$0xff] }
 0x173   :  { %v5336_v23 = vpop.eup %5335  ;;  %v3861_v24 = vmul.f32 %v2848_v21, %v2133_v16  ;;  %3157 = vperm.xlu0 %4625, %v5318_v54   ;;  %v1339_v26 = vadd.f32 1.0, %v5334_v19  ;;  %5361 = vpow2.f32 %v4526_v14  ;;  %v4528_v16 = vmul.f32 -1.442695, %v203_v2 }
 0x174   :  { %v5338_v27 = vpop.eup %5337  ;;  %4151 = vst.msk [vmem:[%s8821_s2 + $0x358] sm:$0xff] %vm4043_vm0, %v3862_v20  ;;  %5363 = vrcp.f32 %v1340_v22  ;;  %v1342_v29 = vadd.f32 1.0, %v5336_v23  ;;  %v207_v22 = vld [vmem:[%s8819_s0 + $0x620] sm:$0xff] }
 0x175   :  { %v5340_v30 = vpop.eup %5339  ;;  %4150 = vst.msk [vmem:[%s8821_s2 + $0x350] sm:$0xff] %vm4043_vm0, %v3861_v24  ;;  %v2863_v31 = vpop.permute.xlu1 %2862  ;;  %5365 = vrcp.f32 %v1339_v26  ;;  %v1341_v32 = vadd.f32 1.0, %v5338_v27  ;;  %v4530_v26 = vmul.f32 -1.442695, %v205_v12  ;;  %v210_v27 = vld [vmem:[%s8819_s0 + $0x638] sm:$0xff] }
 0x176   :  { %v5342_v33 = vpop.eup %5341  ;;  %v3864_v34 = vmul.f32 %v2863_v31, %v2136_v25  ;;  %v2858_v35 = vpop.permute.xlu0 %2857  ;;  %3172 = vperm.xlu1 %4626, %v5320_v59   ;;  %5367 = vrcp.f32 %v1342_v29  ;;  %v1344_v36 = vadd.f32 1.0, %v5340_v30  ;;  %v2144_v25 = vld [vmem:[%s8820_s1 + $0x3a8] sm:$0xff]  ;;  %v2143_v29 = vld [vmem:[%s8820_s1 + $0x3a0] sm:$0xff]  ;;  %v4533_v30 = vmul.f32 -1.442695, %v208_v17  ;;  %v209_v31 = vld [vmem:[%s8819_s0 + $0x630] sm:$0xff] }
 0x177   :  { %v5344_v37 = vpop.eup %5343  ;;  %v3863_v38 = vmul.f32 %v2858_v35, %v2135_v28  ;;  %3167 = vperm.xlu0 %4625, %v5322_v0   ;;  %5369 = vrcp.f32 %v1341_v32  ;;  %v1343_v40 = vadd.f32 1.0, %v5342_v33  ;;  %v212_v35 = vld [vmem:[%s8819_s0 + $0x648] sm:$0xff] }
 0x178   :  { %v5346_v41 = vpop.eup %5345  ;;  %4153 = vst.msk [vmem:[%s8821_s2 + $0x368] sm:$0xff] %vm4043_vm0, %v3864_v34  ;;  %5371 = vrcp.f32 %v1344_v36  ;;  %v1346_v43 = vadd.f32 1.0, %v5344_v37  ;;  %v4532_v34 = vmul.f32 -1.442695, %v207_v22 }
 0x179   :  { %v5348_v44 = vpop.eup %5347  ;;  %4152 = vst.msk [vmem:[%s8821_s2 + $0x360] sm:$0xff] %vm4043_vm0, %v3863_v38  ;;  %v2873_v45 = vpop.permute.xlu1 %2872  ;;  %5373 = vrcp.f32 %v1343_v40  ;;  %v1345_v46 = vadd.f32 1.0, %v5346_v41  ;;  %v211_v40 = vld [vmem:[%s8819_s0 + $0x640] sm:$0xff] }
 0x17a   :  { %v5350_v47 = vpop.eup %5349  ;;  %v3866_v48 = vmul.f32 %v2873_v45, %v2138_v39  ;;  %v2868_v49 = vpop.permute.xlu0 %2867  ;;  %3182 = vperm.xlu1 %4626, %v7173_v4   ;;  %5375 = vrcp.f32 %v1346_v43  ;;  %v1348_v50 = vadd.f32 1.0, %v5348_v44  ;;  %v4535_v39 = vmul.f32 -1.442695, %v210_v27  ;;  %v2146_v43 = vld [vmem:[%s8820_s1 + $0x3b8] sm:$0xff] }
 0x17b   :  { %v5352_v51 = vpop.eup %5351  ;;  %v3865_v52 = vmul.f32 %v2868_v49, %v2137_v42  ;;  %3177 = vperm.xlu0 %4625, %v7179_v7   ;;  %5377 = vrcp.f32 %v1345_v46  ;;  %v1347_v54 = vadd.f32 1.0, %v5350_v47  ;;  %v206_v7 = vld [vmem:[%s8819_s0 + $0x618] sm:$0xff]  ;;  %v4534_v44 = vmul.f32 -1.442695, %v209_v31  ;;  %v2145_v47 = vld [vmem:[%s8820_s1 + $0x3b0] sm:$0xff] }
 0x17c   :  { %v5354_v55 = vpop.eup %5353  ;;  %4155 = vst.msk [vmem:[%s8821_s2 + $0x378] sm:$0xff] %vm4043_vm0, %v3866_v48  ;;  %5379 = vrcp.f32 %v1348_v50  ;;  %v1350_v57 = vadd.f32 1.0, %v5352_v51  ;;  %v4531_v21 = vmul.f32 -1.442695, %v206_v7  ;;  %v214_v45 = vld [vmem:[%s8819_s0 + $0x658] sm:$0xff]  ;;  %v213_v49 = vld [vmem:[%s8819_s0 + $0x650] sm:$0xff] }
 0x17d   :  { %v5356_v58 = vpop.eup %5355  ;;  %4154 = vst.msk [vmem:[%s8821_s2 + $0x370] sm:$0xff] %vm4043_vm0, %v3865_v52  ;;  %v2883_v59 = vpop.permute.xlu1 %2882  ;;  %5381 = vrcp.f32 %v1347_v54  ;;  %v1349_v60 = vadd.f32 1.0, %v5354_v55  ;;  %v4537_v48 = vmul.f32 -1.442695, %v212_v35  ;;  %v4536_v52 = vmul.f32 -1.442695, %v211_v40 }
 0x17e   :  { %v5358_v62 = vpop.eup %5357  ;;  %v3868_v63 = vmul.f32 %v2883_v59, %v2140_v53  ;;  %v2878_v0 = vpop.permute.xlu0 %2877  ;;  %3192 = vperm.xlu1 %4626, %v7181_v11   ;;  %5383 = vrcp.f32 %v1350_v57  ;;  %v1352_v1 = vadd.f32 1.0, %v5356_v58  ;;  %v4529_v11 = vmul.f32 -1.442695, %v204_v61  ;;  %v216_v53 = vld [vmem:[%s8819_s0 + $0x668] sm:$0xff]  ;;  %v215_v58 = vld [vmem:[%s8819_s0 + $0x660] sm:$0xff] }
 0x17f   :  { %v5360_v3 = vpop.eup %5359  ;;  %v3867_v4 = vmul.f32 %v2878_v0, %v2139_v56  ;;  %3187 = vperm.xlu0 %4625, %v7186_v15   ;;  %5385 = vrcp.f32 %v1349_v60  ;;  %v1351_v6 = vadd.f32 1.0, %v5358_v62  ;;  %v4539_v57 = vmul.f32 -1.442695, %v214_v45  ;;  %v2148_v61 = vld [vmem:[%s8820_s1 + $0x3c8] sm:$0xff] }
 0x180   :  { %v5362_v8 = vpop.eup %5361  ;;  %4157 = vst.msk [vmem:[%s8821_s2 + $0x388] sm:$0xff] %vm4043_vm0, %v3868_v63  ;;  %5387 = vrcp.f32 %v1352_v1  ;;  %v1354_v10 = vadd.f32 1.0, %v5360_v3  ;;  %v4538_v62 = vmul.f32 -1.442695, %v213_v49  ;;  %v218_v63 = vld [vmem:[%s8819_s0 + $0x678] sm:$0xff]  ;;  %v2147_v1 = vld [vmem:[%s8820_s1 + $0x3c0] sm:$0xff] }
 0x181   :  { %v5364_v13 = vpop.eup %5363  ;;  %4156 = vst.msk [vmem:[%s8821_s2 + $0x380] sm:$0xff] %vm4043_vm0, %v3867_v4  ;;  %v2893_v14 = vpop.permute.xlu1 %2892  ;;  %5389 = vrcp.f32 %v1351_v6  ;;  %v1353_v15 = vadd.f32 1.0, %v5362_v8  ;;  %v4541_v2 = vmul.f32 -1.442695, %v216_v53  ;;  %v217_v3 = vld [vmem:[%s8819_s0 + $0x670] sm:$0xff]  ;;  %v2156_v53 = vld [vmem:[%s8820_s1 + $0x408] sm:$0xff] }
 0x182   :  { %v5366_v18 = vpop.eup %5365  ;;  %v3870_v19 = vmul.f32 %v2893_v14, %v2142_v5  ;;  %v2888_v20 = vpop.permute.xlu0 %2887  ;;  %3202 = vperm.xlu1 %4626, %v5364_v13   ;;  %5391 = vrcp.f32 %v1354_v10  ;;  %v4540_v6 = vmul.f32 -1.442695, %v215_v58  ;;  %v4543_v10 = vmul.f32 -1.442695, %v218_v63  ;;  %v2150_v13 = vld [vmem:[%s8820_s1 + $0x3d8] sm:$0xff] }
 0x183   :  { %v5368_v23 = vpop.eup %5367  ;;  %v3869_v24 = vmul.f32 %v2888_v20, %v2141_v9  ;;  %3197 = vperm.xlu0 %4625, %v5366_v18   ;;  %5393 = vrcp.f32 %v1353_v15  ;;  %v4542_v14 = vmul.f32 -1.442695, %v217_v3 }
 0x184   :  { %v5370_v28 = vpop.eup %5369  ;;  %4159 = vst.msk [vmem:[%s8821_s2 + $0x398] sm:$0xff] %vm4043_vm0, %v3870_v19  ;;  %5395 = vpow2.f32 %v4529_v11 }
 0x185   :  { %v5372_v32 = vpop.eup %5371  ;;  %4158 = vst.msk [vmem:[%s8821_s2 + $0x390] sm:$0xff] %vm4043_vm0, %v3869_v24  ;;  %v2903_v33 = vpop.permute.xlu1 %2902  ;;  %5397 = vpow2.f32 %v4528_v16  ;;  %v2149_v16 = vld [vmem:[%s8820_s1 + $0x3d0] sm:$0xff] }
 0x186   :  { %v5374_v36 = vpop.eup %5373  ;;  %v3872_v37 = vmul.f32 %v2903_v33, %v2144_v25  ;;  %v2898_v38 = vpop.permute.xlu0 %2897  ;;  %3212 = vperm.xlu1 %4626, %v5368_v23   ;;  %5399 = vpow2.f32 %v4531_v21  ;;  %v2152_v25 = vld [vmem:[%s8820_s1 + $0x3e8] sm:$0xff] }
 0x187   :  { %v5376_v41 = vpop.eup %5375  ;;  %v3871_v42 = vmul.f32 %v2898_v38, %v2143_v29  ;;  %3207 = vperm.xlu0 %4625, %v5370_v28   ;;  %5401 = vpow2.f32 %v4530_v26  ;;  %v2151_v28 = vld [vmem:[%s8820_s1 + $0x3e0] sm:$0xff] }
 0x188   :  { %v5378_v46 = vpop.eup %5377  ;;  %4161 = vst.msk [vmem:[%s8821_s2 + $0x3a8] sm:$0xff] %vm4043_vm0, %v3872_v37  ;;  %5403 = vpow2.f32 %v4533_v30 }
 0x189   :  { %v5380_v50 = vpop.eup %5379  ;;  %4160 = vst.msk [vmem:[%s8821_s2 + $0x3a0] sm:$0xff] %vm4043_vm0, %v3871_v42  ;;  %v2913_v51 = vpop.permute.xlu1 %2912  ;;  %5405 = vpow2.f32 %v4532_v34  ;;  %v2153_v42 = vld [vmem:[%s8820_s1 + $0x3f0] sm:$0xff] }
 0x18a   :  { %v5382_v54 = vpop.eup %5381  ;;  %v3874_v55 = vmul.f32 %v2913_v51, %v2146_v43  ;;  %v2908_v56 = vpop.permute.xlu0 %2907  ;;  %3222 = vperm.xlu1 %4626, %v5372_v32   ;;  %5407 = vpow2.f32 %v4535_v39  ;;  %v2154_v39 = vld [vmem:[%s8820_s1 + $0x3f8] sm:$0xff] }
 0x18b   :  { %v5384_v59 = vpop.eup %5383  ;;  %v3873_v60 = vmul.f32 %v2908_v56, %v2145_v47  ;;  %3217 = vperm.xlu0 %4625, %v5374_v36   ;;  %5409 = vpow2.f32 %v4534_v44  ;;  %v2155_v56 = vld [vmem:[%s8820_s1 + $0x400] sm:$0xff] }
 0x18c   :  { %v5386_v0 = vpop.eup %5385  ;;  %4163 = vst.msk [vmem:[%s8821_s2 + $0x3b8] sm:$0xff] %vm4043_vm0, %v3874_v55  ;;  %5411 = vpow2.f32 %v4537_v48 }
 0x18d   :  { %v7345_v4 = vpop.eup %5387  ;;  %4162 = vst.msk [vmem:[%s8821_s2 + $0x3b0] sm:$0xff] %vm4043_vm0, %v3873_v60  ;;  %v2923_v5 = vpop.permute.xlu1 %2922  ;;  %5413 = vpow2.f32 %v4536_v52 }
 0x18e   :  { %v7351_v7 = vpop.eup %5389  ;;  %v3876_v8 = vmul.f32 %v2923_v5, %v2148_v61  ;;  %v2918_v9 = vpop.permute.xlu0 %2917  ;;  %3232 = vperm.xlu1 %4626, %v5376_v41   ;;  %5415 = vpow2.f32 %v4539_v57  ;;  %v220_v61 = vld [vmem:[%s8819_s0 + $0x688] sm:$0xff]  ;;  %v2158_v5 = vld [vmem:[%s8820_s1 + $0x418] sm:$0xff] }
 0x18f   :  { %v7353_v11 = vpop.eup %5391  ;;  %v3875_v12 = vmul.f32 %v2918_v9, %v2147_v1  ;;  %3227 = vperm.xlu0 %4625, %v5378_v46   ;;  %5417 = vpow2.f32 %v4538_v62  ;;  %v2157_v9 = vld [vmem:[%s8820_s1 + $0x410] sm:$0xff] }
 0x190   :  { %v7358_v15 = vpop.eup %5393  ;;  %4165 = vst.msk [vmem:[%s8821_s2 + $0x3c8] sm:$0xff] %vm4043_vm0, %v3876_v8  ;;  %5419 = vpow2.f32 %v4541_v2  ;;  %v219_v2 = vld [vmem:[%s8819_s0 + $0x680] sm:$0xff] }
 0x191   :  { %v5396_v17 = vpop.eup %5395  ;;  %4164 = vst.msk [vmem:[%s8821_s2 + $0x3c0] sm:$0xff] %vm4043_vm0, %v3875_v12  ;;  %v2933_v18 = vpop.permute.xlu1 %2932  ;;  %5421 = vpow2.f32 %v4540_v6  ;;  %v221_v12 = vld [vmem:[%s8819_s0 + $0x690] sm:$0xff] }
 0x192   :  { %v5398_v19 = vpop.eup %5397  ;;  %v3878_v20 = vmul.f32 %v2933_v18, %v2150_v13  ;;  %v2928_v21 = vpop.permute.xlu0 %2927  ;;  %3242 = vperm.xlu1 %4626, %v5380_v50   ;;  %v1356_v22 = vadd.f32 1.0, %v5396_v17  ;;  %5423 = vpow2.f32 %v4543_v10  ;;  %v224_v17 = vld [vmem:[%s8819_s0 + $0x6a8] sm:$0xff] }
 0x193   :  { %v5400_v23 = vpop.eup %5399  ;;  %v3877_v24 = vmul.f32 %v2928_v21, %v2149_v16  ;;  %3237 = vperm.xlu0 %4625, %v5382_v54   ;;  %v1355_v26 = vadd.f32 1.0, %v5398_v19  ;;  %5425 = vpow2.f32 %v4542_v14  ;;  %v4544_v16 = vmul.f32 -1.442695, %v219_v2 }
 0x194   :  { %v5402_v27 = vpop.eup %5401  ;;  %4167 = vst.msk [vmem:[%s8821_s2 + $0x3d8] sm:$0xff] %vm4043_vm0, %v3878_v20  ;;  %5427 = vrcp.f32 %v1356_v22  ;;  %v1358_v29 = vadd.f32 1.0, %v5400_v23  ;;  %v223_v22 = vld [vmem:[%s8819_s0 + $0x6a0] sm:$0xff] }
 0x195   :  { %v5404_v30 = vpop.eup %5403  ;;  %4166 = vst.msk [vmem:[%s8821_s2 + $0x3d0] sm:$0xff] %vm4043_vm0, %v3877_v24  ;;  %v2943_v31 = vpop.permute.xlu1 %2942  ;;  %5429 = vrcp.f32 %v1355_v26  ;;  %v1357_v32 = vadd.f32 1.0, %v5402_v27  ;;  %v4546_v26 = vmul.f32 -1.442695, %v221_v12  ;;  %v226_v27 = vld [vmem:[%s8819_s0 + $0x6b8] sm:$0xff] }
 0x196   :  { %v5406_v33 = vpop.eup %5405  ;;  %v3880_v34 = vmul.f32 %v2943_v31, %v2152_v25  ;;  %v2938_v35 = vpop.permute.xlu0 %2937  ;;  %3252 = vperm.xlu1 %4626, %v5384_v59   ;;  %5431 = vrcp.f32 %v1358_v29  ;;  %v1360_v36 = vadd.f32 1.0, %v5404_v30  ;;  %v2160_v25 = vld [vmem:[%s8820_s1 + $0x428] sm:$0xff]  ;;  %v2159_v29 = vld [vmem:[%s8820_s1 + $0x420] sm:$0xff]  ;;  %v4549_v30 = vmul.f32 -1.442695, %v224_v17  ;;  %v225_v31 = vld [vmem:[%s8819_s0 + $0x6b0] sm:$0xff] }
 0x197   :  { %v5408_v37 = vpop.eup %5407  ;;  %v3879_v38 = vmul.f32 %v2938_v35, %v2151_v28  ;;  %3247 = vperm.xlu0 %4625, %v5386_v0   ;;  %5433 = vrcp.f32 %v1357_v32  ;;  %v1359_v40 = vadd.f32 1.0, %v5406_v33  ;;  %v228_v35 = vld [vmem:[%s8819_s0 + $0x6c8] sm:$0xff] }
 0x198   :  { %v5410_v41 = vpop.eup %5409  ;;  %4169 = vst.msk [vmem:[%s8821_s2 + $0x3e8] sm:$0xff] %vm4043_vm0, %v3880_v34  ;;  %5435 = vrcp.f32 %v1360_v36  ;;  %v1362_v43 = vadd.f32 1.0, %v5408_v37  ;;  %v4548_v34 = vmul.f32 -1.442695, %v223_v22 }
 0x199   :  { %v5412_v44 = vpop.eup %5411  ;;  %4168 = vst.msk [vmem:[%s8821_s2 + $0x3e0] sm:$0xff] %vm4043_vm0, %v3879_v38  ;;  %v2953_v45 = vpop.permute.xlu1 %2952  ;;  %5437 = vrcp.f32 %v1359_v40  ;;  %v1361_v46 = vadd.f32 1.0, %v5410_v41  ;;  %v227_v40 = vld [vmem:[%s8819_s0 + $0x6c0] sm:$0xff] }
 0x19a   :  { %v5414_v47 = vpop.eup %5413  ;;  %v3882_v48 = vmul.f32 %v2953_v45, %v2154_v39  ;;  %v2948_v49 = vpop.permute.xlu0 %2947  ;;  %3262 = vperm.xlu1 %4626, %v7345_v4   ;;  %5439 = vrcp.f32 %v1362_v43  ;;  %v1364_v50 = vadd.f32 1.0, %v5412_v44  ;;  %v4551_v39 = vmul.f32 -1.442695, %v226_v27  ;;  %v2162_v43 = vld [vmem:[%s8820_s1 + $0x438] sm:$0xff] }
 0x19b   :  { %v5416_v51 = vpop.eup %5415  ;;  %v3881_v52 = vmul.f32 %v2948_v49, %v2153_v42  ;;  %3257 = vperm.xlu0 %4625, %v7351_v7   ;;  %5441 = vrcp.f32 %v1361_v46  ;;  %v1363_v54 = vadd.f32 1.0, %v5414_v47  ;;  %v222_v7 = vld [vmem:[%s8819_s0 + $0x698] sm:$0xff]  ;;  %v4550_v44 = vmul.f32 -1.442695, %v225_v31  ;;  %v2161_v47 = vld [vmem:[%s8820_s1 + $0x430] sm:$0xff] }
 0x19c   :  { %v5418_v55 = vpop.eup %5417  ;;  %4171 = vst.msk [vmem:[%s8821_s2 + $0x3f8] sm:$0xff] %vm4043_vm0, %v3882_v48  ;;  %5443 = vrcp.f32 %v1364_v50  ;;  %v1366_v57 = vadd.f32 1.0, %v5416_v51  ;;  %v4547_v21 = vmul.f32 -1.442695, %v222_v7  ;;  %v230_v45 = vld [vmem:[%s8819_s0 + $0x6d8] sm:$0xff]  ;;  %v229_v49 = vld [vmem:[%s8819_s0 + $0x6d0] sm:$0xff] }
 0x19d   :  { %v5420_v58 = vpop.eup %5419  ;;  %4170 = vst.msk [vmem:[%s8821_s2 + $0x3f0] sm:$0xff] %vm4043_vm0, %v3881_v52  ;;  %v2963_v59 = vpop.permute.xlu1 %2962  ;;  %5445 = vrcp.f32 %v1363_v54  ;;  %v1365_v60 = vadd.f32 1.0, %v5418_v55  ;;  %v4553_v48 = vmul.f32 -1.442695, %v228_v35  ;;  %v4552_v52 = vmul.f32 -1.442695, %v227_v40 }
 0x19e   :  { %v5422_v62 = vpop.eup %5421  ;;  %v3884_v63 = vmul.f32 %v2963_v59, %v2156_v53  ;;  %v2958_v0 = vpop.permute.xlu0 %2957  ;;  %3272 = vperm.xlu1 %4626, %v7353_v11   ;;  %5447 = vrcp.f32 %v1366_v57  ;;  %v1368_v1 = vadd.f32 1.0, %v5420_v58  ;;  %v4545_v11 = vmul.f32 -1.442695, %v220_v61  ;;  %v232_v53 = vld [vmem:[%s8819_s0 + $0x6e8] sm:$0xff]  ;;  %v231_v58 = vld [vmem:[%s8819_s0 + $0x6e0] sm:$0xff] }
 0x19f   :  { %v5424_v3 = vpop.eup %5423  ;;  %v3883_v4 = vmul.f32 %v2958_v0, %v2155_v56  ;;  %3267 = vperm.xlu0 %4625, %v7358_v15   ;;  %5449 = vrcp.f32 %v1365_v60  ;;  %v1367_v6 = vadd.f32 1.0, %v5422_v62  ;;  %v4555_v57 = vmul.f32 -1.442695, %v230_v45  ;;  %v2164_v61 = vld [vmem:[%s8820_s1 + $0x448] sm:$0xff] }
 0x1a0   :  { %v5426_v8 = vpop.eup %5425  ;;  %4173 = vst.msk [vmem:[%s8821_s2 + $0x408] sm:$0xff] %vm4043_vm0, %v3884_v63  ;;  %5451 = vrcp.f32 %v1368_v1  ;;  %v1370_v10 = vadd.f32 1.0, %v5424_v3  ;;  %v4554_v62 = vmul.f32 -1.442695, %v229_v49  ;;  %v234_v63 = vld [vmem:[%s8819_s0 + $0x6f8] sm:$0xff]  ;;  %v2163_v1 = vld [vmem:[%s8820_s1 + $0x440] sm:$0xff] }
 0x1a1   :  { %v5428_v13 = vpop.eup %5427  ;;  %4172 = vst.msk [vmem:[%s8821_s2 + $0x400] sm:$0xff] %vm4043_vm0, %v3883_v4  ;;  %v2973_v14 = vpop.permute.xlu1 %2972  ;;  %5453 = vrcp.f32 %v1367_v6  ;;  %v1369_v15 = vadd.f32 1.0, %v5426_v8  ;;  %v4557_v2 = vmul.f32 -1.442695, %v232_v53  ;;  %v233_v3 = vld [vmem:[%s8819_s0 + $0x6f0] sm:$0xff]  ;;  %v2172_v53 = vld [vmem:[%s8820_s1 + $0x488] sm:$0xff] }
 0x1a2   :  { %v5430_v18 = vpop.eup %5429  ;;  %v3886_v19 = vmul.f32 %v2973_v14, %v2158_v5  ;;  %v2968_v20 = vpop.permute.xlu0 %2967  ;;  %3282 = vperm.xlu1 %4626, %v5428_v13   ;;  %5455 = vrcp.f32 %v1370_v10  ;;  %v4556_v6 = vmul.f32 -1.442695, %v231_v58  ;;  %v4559_v10 = vmul.f32 -1.442695, %v234_v63  ;;  %v2166_v13 = vld [vmem:[%s8820_s1 + $0x458] sm:$0xff] }
 0x1a3   :  { %v5432_v23 = vpop.eup %5431  ;;  %v3885_v24 = vmul.f32 %v2968_v20, %v2157_v9  ;;  %3277 = vperm.xlu0 %4625, %v5430_v18   ;;  %5457 = vrcp.f32 %v1369_v15  ;;  %v4558_v14 = vmul.f32 -1.442695, %v233_v3 }
 0x1a4   :  { %v5434_v28 = vpop.eup %5433  ;;  %4175 = vst.msk [vmem:[%s8821_s2 + $0x418] sm:$0xff] %vm4043_vm0, %v3886_v19  ;;  %5459 = vpow2.f32 %v4545_v11 }
 0x1a5   :  { %v5436_v32 = vpop.eup %5435  ;;  %4174 = vst.msk [vmem:[%s8821_s2 + $0x410] sm:$0xff] %vm4043_vm0, %v3885_v24  ;;  %v2983_v33 = vpop.permute.xlu1 %2982  ;;  %5461 = vpow2.f32 %v4544_v16  ;;  %v2165_v16 = vld [vmem:[%s8820_s1 + $0x450] sm:$0xff] }
 0x1a6   :  { %v5438_v36 = vpop.eup %5437  ;;  %v3888_v37 = vmul.f32 %v2983_v33, %v2160_v25  ;;  %v2978_v38 = vpop.permute.xlu0 %2977  ;;  %3292 = vperm.xlu1 %4626, %v5432_v23   ;;  %5463 = vpow2.f32 %v4547_v21  ;;  %v2168_v25 = vld [vmem:[%s8820_s1 + $0x468] sm:$0xff] }
 0x1a7   :  { %v5440_v41 = vpop.eup %5439  ;;  %v3887_v42 = vmul.f32 %v2978_v38, %v2159_v29  ;;  %3287 = vperm.xlu0 %4625, %v5434_v28   ;;  %5465 = vpow2.f32 %v4546_v26  ;;  %v2167_v28 = vld [vmem:[%s8820_s1 + $0x460] sm:$0xff] }
 0x1a8   :  { %v5442_v46 = vpop.eup %5441  ;;  %4177 = vst.msk [vmem:[%s8821_s2 + $0x428] sm:$0xff] %vm4043_vm0, %v3888_v37  ;;  %5467 = vpow2.f32 %v4549_v30 }
 0x1a9   :  { %v5444_v50 = vpop.eup %5443  ;;  %4176 = vst.msk [vmem:[%s8821_s2 + $0x420] sm:$0xff] %vm4043_vm0, %v3887_v42  ;;  %v2993_v51 = vpop.permute.xlu1 %2992  ;;  %5469 = vpow2.f32 %v4548_v34  ;;  %v2169_v42 = vld [vmem:[%s8820_s1 + $0x470] sm:$0xff] }
 0x1aa   :  { %v5446_v54 = vpop.eup %5445  ;;  %v3890_v55 = vmul.f32 %v2993_v51, %v2162_v43  ;;  %v2988_v56 = vpop.permute.xlu0 %2987  ;;  %3302 = vperm.xlu1 %4626, %v5436_v32   ;;  %5471 = vpow2.f32 %v4551_v39  ;;  %v2170_v39 = vld [vmem:[%s8820_s1 + $0x478] sm:$0xff] }
 0x1ab   :  { %v5448_v59 = vpop.eup %5447  ;;  %v3889_v60 = vmul.f32 %v2988_v56, %v2161_v47  ;;  %3297 = vperm.xlu0 %4625, %v5438_v36   ;;  %5473 = vpow2.f32 %v4550_v44  ;;  %v2171_v56 = vld [vmem:[%s8820_s1 + $0x480] sm:$0xff] }
 0x1ac   :  { %v5450_v0 = vpop.eup %5449  ;;  %4179 = vst.msk [vmem:[%s8821_s2 + $0x438] sm:$0xff] %vm4043_vm0, %v3890_v55  ;;  %5475 = vpow2.f32 %v4553_v48 }
 0x1ad   :  { %v7517_v4 = vpop.eup %5451  ;;  %4178 = vst.msk [vmem:[%s8821_s2 + $0x430] sm:$0xff] %vm4043_vm0, %v3889_v60  ;;  %v3003_v5 = vpop.permute.xlu1 %3002  ;;  %5477 = vpow2.f32 %v4552_v52 }
 0x1ae   :  { %v7523_v7 = vpop.eup %5453  ;;  %v3892_v8 = vmul.f32 %v3003_v5, %v2164_v61  ;;  %v2998_v9 = vpop.permute.xlu0 %2997  ;;  %3312 = vperm.xlu1 %4626, %v5440_v41   ;;  %5479 = vpow2.f32 %v4555_v57  ;;  %v236_v61 = vld [vmem:[%s8819_s0 + $0x708] sm:$0xff]  ;;  %v2174_v5 = vld [vmem:[%s8820_s1 + $0x498] sm:$0xff] }
 0x1af   :  { %v7525_v11 = vpop.eup %5455  ;;  %v3891_v12 = vmul.f32 %v2998_v9, %v2163_v1  ;;  %3307 = vperm.xlu0 %4625, %v5442_v46   ;;  %5481 = vpow2.f32 %v4554_v62  ;;  %v2173_v9 = vld [vmem:[%s8820_s1 + $0x490] sm:$0xff] }
 0x1b0   :  { %v7530_v15 = vpop.eup %5457  ;;  %4181 = vst.msk [vmem:[%s8821_s2 + $0x448] sm:$0xff] %vm4043_vm0, %v3892_v8  ;;  %5483 = vpow2.f32 %v4557_v2  ;;  %v235_v2 = vld [vmem:[%s8819_s0 + $0x700] sm:$0xff] }
 0x1b1   :  { %v5460_v17 = vpop.eup %5459  ;;  %4180 = vst.msk [vmem:[%s8821_s2 + $0x440] sm:$0xff] %vm4043_vm0, %v3891_v12  ;;  %v3013_v18 = vpop.permute.xlu1 %3012  ;;  %5485 = vpow2.f32 %v4556_v6  ;;  %v237_v12 = vld [vmem:[%s8819_s0 + $0x710] sm:$0xff] }
 0x1b2   :  { %v5462_v19 = vpop.eup %5461  ;;  %v3894_v20 = vmul.f32 %v3013_v18, %v2166_v13  ;;  %v3008_v21 = vpop.permute.xlu0 %3007  ;;  %3322 = vperm.xlu1 %4626, %v5444_v50   ;;  %v1372_v22 = vadd.f32 1.0, %v5460_v17  ;;  %5487 = vpow2.f32 %v4559_v10  ;;  %v240_v17 = vld [vmem:[%s8819_s0 + $0x728] sm:$0xff] }
 0x1b3   :  { %v5464_v23 = vpop.eup %5463  ;;  %v3893_v24 = vmul.f32 %v3008_v21, %v2165_v16  ;;  %3317 = vperm.xlu0 %4625, %v5446_v54   ;;  %v1371_v26 = vadd.f32 1.0, %v5462_v19  ;;  %5489 = vpow2.f32 %v4558_v14  ;;  %v4560_v16 = vmul.f32 -1.442695, %v235_v2 }
 0x1b4   :  { %v5466_v27 = vpop.eup %5465  ;;  %4183 = vst.msk [vmem:[%s8821_s2 + $0x458] sm:$0xff] %vm4043_vm0, %v3894_v20  ;;  %5491 = vrcp.f32 %v1372_v22  ;;  %v1374_v29 = vadd.f32 1.0, %v5464_v23  ;;  %v239_v22 = vld [vmem:[%s8819_s0 + $0x720] sm:$0xff] }
 0x1b5   :  { %v5468_v30 = vpop.eup %5467  ;;  %4182 = vst.msk [vmem:[%s8821_s2 + $0x450] sm:$0xff] %vm4043_vm0, %v3893_v24  ;;  %v3023_v31 = vpop.permute.xlu1 %3022  ;;  %5493 = vrcp.f32 %v1371_v26  ;;  %v1373_v32 = vadd.f32 1.0, %v5466_v27  ;;  %v4562_v26 = vmul.f32 -1.442695, %v237_v12  ;;  %v242_v27 = vld [vmem:[%s8819_s0 + $0x738] sm:$0xff] }
 0x1b6   :  { %v5470_v33 = vpop.eup %5469  ;;  %v3896_v34 = vmul.f32 %v3023_v31, %v2168_v25  ;;  %v3018_v35 = vpop.permute.xlu0 %3017  ;;  %3332 = vperm.xlu1 %4626, %v5448_v59   ;;  %5495 = vrcp.f32 %v1374_v29  ;;  %v1376_v36 = vadd.f32 1.0, %v5468_v30  ;;  %v2176_v25 = vld [vmem:[%s8820_s1 + $0x4a8] sm:$0xff]  ;;  %v2175_v29 = vld [vmem:[%s8820_s1 + $0x4a0] sm:$0xff]  ;;  %v4565_v30 = vmul.f32 -1.442695, %v240_v17  ;;  %v241_v31 = vld [vmem:[%s8819_s0 + $0x730] sm:$0xff] }
 0x1b7   :  { %v5472_v37 = vpop.eup %5471  ;;  %v3895_v38 = vmul.f32 %v3018_v35, %v2167_v28  ;;  %3327 = vperm.xlu0 %4625, %v5450_v0   ;;  %5497 = vrcp.f32 %v1373_v32  ;;  %v1375_v40 = vadd.f32 1.0, %v5470_v33  ;;  %v244_v35 = vld [vmem:[%s8819_s0 + $0x748] sm:$0xff] }
 0x1b8   :  { %v5474_v41 = vpop.eup %5473  ;;  %4185 = vst.msk [vmem:[%s8821_s2 + $0x468] sm:$0xff] %vm4043_vm0, %v3896_v34  ;;  %5499 = vrcp.f32 %v1376_v36  ;;  %v1378_v43 = vadd.f32 1.0, %v5472_v37  ;;  %v4564_v34 = vmul.f32 -1.442695, %v239_v22 }
 0x1b9   :  { %v5476_v44 = vpop.eup %5475  ;;  %4184 = vst.msk [vmem:[%s8821_s2 + $0x460] sm:$0xff] %vm4043_vm0, %v3895_v38  ;;  %v3033_v45 = vpop.permute.xlu1 %3032  ;;  %5501 = vrcp.f32 %v1375_v40  ;;  %v1377_v46 = vadd.f32 1.0, %v5474_v41  ;;  %v243_v40 = vld [vmem:[%s8819_s0 + $0x740] sm:$0xff] }
 0x1ba   :  { %v5478_v47 = vpop.eup %5477  ;;  %v3898_v48 = vmul.f32 %v3033_v45, %v2170_v39  ;;  %v3028_v49 = vpop.permute.xlu0 %3027  ;;  %3342 = vperm.xlu1 %4626, %v7517_v4   ;;  %5503 = vrcp.f32 %v1378_v43  ;;  %v1380_v50 = vadd.f32 1.0, %v5476_v44  ;;  %v4567_v39 = vmul.f32 -1.442695, %v242_v27  ;;  %v2178_v43 = vld [vmem:[%s8820_s1 + $0x4b8] sm:$0xff] }
 0x1bb   :  { %v5480_v51 = vpop.eup %5479  ;;  %v3897_v52 = vmul.f32 %v3028_v49, %v2169_v42  ;;  %3337 = vperm.xlu0 %4625, %v7523_v7   ;;  %5505 = vrcp.f32 %v1377_v46  ;;  %v1379_v54 = vadd.f32 1.0, %v5478_v47  ;;  %v238_v7 = vld [vmem:[%s8819_s0 + $0x718] sm:$0xff]  ;;  %v4566_v44 = vmul.f32 -1.442695, %v241_v31  ;;  %v2177_v47 = vld [vmem:[%s8820_s1 + $0x4b0] sm:$0xff] }
 0x1bc   :  { %v5482_v55 = vpop.eup %5481  ;;  %4187 = vst.msk [vmem:[%s8821_s2 + $0x478] sm:$0xff] %vm4043_vm0, %v3898_v48  ;;  %5507 = vrcp.f32 %v1380_v50  ;;  %v1382_v57 = vadd.f32 1.0, %v5480_v51  ;;  %v4563_v21 = vmul.f32 -1.442695, %v238_v7  ;;  %v246_v45 = vld [vmem:[%s8819_s0 + $0x758] sm:$0xff]  ;;  %v245_v49 = vld [vmem:[%s8819_s0 + $0x750] sm:$0xff] }
 0x1bd   :  { %v5484_v58 = vpop.eup %5483  ;;  %4186 = vst.msk [vmem:[%s8821_s2 + $0x470] sm:$0xff] %vm4043_vm0, %v3897_v52  ;;  %v3043_v59 = vpop.permute.xlu1 %3042  ;;  %5509 = vrcp.f32 %v1379_v54  ;;  %v1381_v60 = vadd.f32 1.0, %v5482_v55  ;;  %v4569_v48 = vmul.f32 -1.442695, %v244_v35  ;;  %v4568_v52 = vmul.f32 -1.442695, %v243_v40 }
 0x1be   :  { %v5486_v62 = vpop.eup %5485  ;;  %v3900_v63 = vmul.f32 %v3043_v59, %v2172_v53  ;;  %v3038_v0 = vpop.permute.xlu0 %3037  ;;  %3352 = vperm.xlu1 %4626, %v7525_v11   ;;  %5511 = vrcp.f32 %v1382_v57  ;;  %v1384_v1 = vadd.f32 1.0, %v5484_v58  ;;  %v4561_v11 = vmul.f32 -1.442695, %v236_v61  ;;  %v248_v53 = vld [vmem:[%s8819_s0 + $0x768] sm:$0xff]  ;;  %v247_v58 = vld [vmem:[%s8819_s0 + $0x760] sm:$0xff] }
 0x1bf   :  { %v5488_v3 = vpop.eup %5487  ;;  %v3899_v4 = vmul.f32 %v3038_v0, %v2171_v56  ;;  %3347 = vperm.xlu0 %4625, %v7530_v15   ;;  %5513 = vrcp.f32 %v1381_v60  ;;  %v1383_v6 = vadd.f32 1.0, %v5486_v62  ;;  %v4571_v57 = vmul.f32 -1.442695, %v246_v45  ;;  %v2180_v61 = vld [vmem:[%s8820_s1 + $0x4c8] sm:$0xff] }
 0x1c0   :  { %v5490_v8 = vpop.eup %5489  ;;  %4189 = vst.msk [vmem:[%s8821_s2 + $0x488] sm:$0xff] %vm4043_vm0, %v3900_v63  ;;  %5515 = vrcp.f32 %v1384_v1  ;;  %v1386_v10 = vadd.f32 1.0, %v5488_v3  ;;  %v4570_v62 = vmul.f32 -1.442695, %v245_v49  ;;  %v250_v63 = vld [vmem:[%s8819_s0 + $0x778] sm:$0xff]  ;;  %v2179_v1 = vld [vmem:[%s8820_s1 + $0x4c0] sm:$0xff] }
 0x1c1   :  { %v5492_v13 = vpop.eup %5491  ;;  %4188 = vst.msk [vmem:[%s8821_s2 + $0x480] sm:$0xff] %vm4043_vm0, %v3899_v4  ;;  %v3053_v14 = vpop.permute.xlu1 %3052  ;;  %5517 = vrcp.f32 %v1383_v6  ;;  %v1385_v15 = vadd.f32 1.0, %v5490_v8  ;;  %v4573_v2 = vmul.f32 -1.442695, %v248_v53  ;;  %v249_v3 = vld [vmem:[%s8819_s0 + $0x770] sm:$0xff]  ;;  %v2188_v53 = vld [vmem:[%s8820_s1 + $0x508] sm:$0xff] }
 0x1c2   :  { %v5494_v18 = vpop.eup %5493  ;;  %v3902_v19 = vmul.f32 %v3053_v14, %v2174_v5  ;;  %v3048_v20 = vpop.permute.xlu0 %3047  ;;  %3362 = vperm.xlu1 %4626, %v5492_v13   ;;  %5519 = vrcp.f32 %v1386_v10  ;;  %v4572_v6 = vmul.f32 -1.442695, %v247_v58  ;;  %v4575_v10 = vmul.f32 -1.442695, %v250_v63  ;;  %v2182_v13 = vld [vmem:[%s8820_s1 + $0x4d8] sm:$0xff] }
 0x1c3   :  { %v5496_v23 = vpop.eup %5495  ;;  %v3901_v24 = vmul.f32 %v3048_v20, %v2173_v9  ;;  %3357 = vperm.xlu0 %4625, %v5494_v18   ;;  %5521 = vrcp.f32 %v1385_v15  ;;  %v4574_v14 = vmul.f32 -1.442695, %v249_v3 }
 0x1c4   :  { %v5498_v28 = vpop.eup %5497  ;;  %4191 = vst.msk [vmem:[%s8821_s2 + $0x498] sm:$0xff] %vm4043_vm0, %v3902_v19  ;;  %5523 = vpow2.f32 %v4561_v11 }
 0x1c5   :  { %v5500_v32 = vpop.eup %5499  ;;  %4190 = vst.msk [vmem:[%s8821_s2 + $0x490] sm:$0xff] %vm4043_vm0, %v3901_v24  ;;  %v3063_v33 = vpop.permute.xlu1 %3062  ;;  %5525 = vpow2.f32 %v4560_v16  ;;  %v2181_v16 = vld [vmem:[%s8820_s1 + $0x4d0] sm:$0xff] }
 0x1c6   :  { %v5502_v36 = vpop.eup %5501  ;;  %v3904_v37 = vmul.f32 %v3063_v33, %v2176_v25  ;;  %v3058_v38 = vpop.permute.xlu0 %3057  ;;  %3372 = vperm.xlu1 %4626, %v5496_v23   ;;  %5527 = vpow2.f32 %v4563_v21  ;;  %v2184_v25 = vld [vmem:[%s8820_s1 + $0x4e8] sm:$0xff] }
 0x1c7   :  { %v5504_v41 = vpop.eup %5503  ;;  %v3903_v42 = vmul.f32 %v3058_v38, %v2175_v29  ;;  %3367 = vperm.xlu0 %4625, %v5498_v28   ;;  %5529 = vpow2.f32 %v4562_v26  ;;  %v2183_v28 = vld [vmem:[%s8820_s1 + $0x4e0] sm:$0xff] }
 0x1c8   :  { %v5506_v46 = vpop.eup %5505  ;;  %4193 = vst.msk [vmem:[%s8821_s2 + $0x4a8] sm:$0xff] %vm4043_vm0, %v3904_v37  ;;  %5531 = vpow2.f32 %v4565_v30 }
 0x1c9   :  { %v5508_v50 = vpop.eup %5507  ;;  %4192 = vst.msk [vmem:[%s8821_s2 + $0x4a0] sm:$0xff] %vm4043_vm0, %v3903_v42  ;;  %v3073_v51 = vpop.permute.xlu1 %3072  ;;  %5533 = vpow2.f32 %v4564_v34  ;;  %v2185_v42 = vld [vmem:[%s8820_s1 + $0x4f0] sm:$0xff] }
 0x1ca   :  { %v5510_v54 = vpop.eup %5509  ;;  %v3906_v55 = vmul.f32 %v3073_v51, %v2178_v43  ;;  %v3068_v56 = vpop.permute.xlu0 %3067  ;;  %3382 = vperm.xlu1 %4626, %v5500_v32   ;;  %5535 = vpow2.f32 %v4567_v39  ;;  %v2186_v39 = vld [vmem:[%s8820_s1 + $0x4f8] sm:$0xff] }
 0x1cb   :  { %v5512_v59 = vpop.eup %5511  ;;  %v3905_v60 = vmul.f32 %v3068_v56, %v2177_v47  ;;  %3377 = vperm.xlu0 %4625, %v5502_v36   ;;  %5537 = vpow2.f32 %v4566_v44  ;;  %v2187_v56 = vld [vmem:[%s8820_s1 + $0x500] sm:$0xff] }
 0x1cc   :  { %v5514_v0 = vpop.eup %5513  ;;  %4195 = vst.msk [vmem:[%s8821_s2 + $0x4b8] sm:$0xff] %vm4043_vm0, %v3906_v55  ;;  %5539 = vpow2.f32 %v4569_v48 }
 0x1cd   :  { %v7689_v4 = vpop.eup %5515  ;;  %4194 = vst.msk [vmem:[%s8821_s2 + $0x4b0] sm:$0xff] %vm4043_vm0, %v3905_v60  ;;  %v3083_v5 = vpop.permute.xlu1 %3082  ;;  %5541 = vpow2.f32 %v4568_v52 }
 0x1ce   :  { %v7695_v7 = vpop.eup %5517  ;;  %v3908_v8 = vmul.f32 %v3083_v5, %v2180_v61  ;;  %v3078_v9 = vpop.permute.xlu0 %3077  ;;  %3392 = vperm.xlu1 %4626, %v5504_v41   ;;  %5543 = vpow2.f32 %v4571_v57  ;;  %v252_v61 = vld [vmem:[%s8819_s0 + $0x788] sm:$0xff]  ;;  %v2190_v5 = vld [vmem:[%s8820_s1 + $0x518] sm:$0xff] }
 0x1cf   :  { %v7697_v11 = vpop.eup %5519  ;;  %v3907_v12 = vmul.f32 %v3078_v9, %v2179_v1  ;;  %3387 = vperm.xlu0 %4625, %v5506_v46   ;;  %5545 = vpow2.f32 %v4570_v62  ;;  %v2189_v9 = vld [vmem:[%s8820_s1 + $0x510] sm:$0xff] }
 0x1d0   :  { %v7702_v15 = vpop.eup %5521  ;;  %4197 = vst.msk [vmem:[%s8821_s2 + $0x4c8] sm:$0xff] %vm4043_vm0, %v3908_v8  ;;  %5547 = vpow2.f32 %v4573_v2  ;;  %v251_v2 = vld [vmem:[%s8819_s0 + $0x780] sm:$0xff] }
 0x1d1   :  { %v5524_v17 = vpop.eup %5523  ;;  %4196 = vst.msk [vmem:[%s8821_s2 + $0x4c0] sm:$0xff] %vm4043_vm0, %v3907_v12  ;;  %v3093_v18 = vpop.permute.xlu1 %3092  ;;  %5549 = vpow2.f32 %v4572_v6  ;;  %v253_v12 = vld [vmem:[%s8819_s0 + $0x790] sm:$0xff] }
 0x1d2   :  { %v5526_v19 = vpop.eup %5525  ;;  %v3910_v20 = vmul.f32 %v3093_v18, %v2182_v13  ;;  %v3088_v21 = vpop.permute.xlu0 %3087  ;;  %3402 = vperm.xlu1 %4626, %v5508_v50   ;;  %v1388_v22 = vadd.f32 1.0, %v5524_v17  ;;  %5551 = vpow2.f32 %v4575_v10  ;;  %v256_v17 = vld [vmem:[%s8819_s0 + $0x7a8] sm:$0xff] }
 0x1d3   :  { %v5528_v23 = vpop.eup %5527  ;;  %v3909_v24 = vmul.f32 %v3088_v21, %v2181_v16  ;;  %3397 = vperm.xlu0 %4625, %v5510_v54   ;;  %v1387_v26 = vadd.f32 1.0, %v5526_v19  ;;  %5553 = vpow2.f32 %v4574_v14  ;;  %v4576_v16 = vmul.f32 -1.442695, %v251_v2 }
 0x1d4   :  { %v5530_v27 = vpop.eup %5529  ;;  %4199 = vst.msk [vmem:[%s8821_s2 + $0x4d8] sm:$0xff] %vm4043_vm0, %v3910_v20  ;;  %5555 = vrcp.f32 %v1388_v22  ;;  %v1390_v29 = vadd.f32 1.0, %v5528_v23  ;;  %v255_v22 = vld [vmem:[%s8819_s0 + $0x7a0] sm:$0xff] }
 0x1d5   :  { %v5532_v30 = vpop.eup %5531  ;;  %4198 = vst.msk [vmem:[%s8821_s2 + $0x4d0] sm:$0xff] %vm4043_vm0, %v3909_v24  ;;  %v3103_v31 = vpop.permute.xlu1 %3102  ;;  %5557 = vrcp.f32 %v1387_v26  ;;  %v1389_v32 = vadd.f32 1.0, %v5530_v27  ;;  %v4578_v26 = vmul.f32 -1.442695, %v253_v12  ;;  %v258_v27 = vld [vmem:[%s8819_s0 + $0x7b8] sm:$0xff] }
 0x1d6   :  { %v5534_v33 = vpop.eup %5533  ;;  %v3912_v34 = vmul.f32 %v3103_v31, %v2184_v25  ;;  %v3098_v35 = vpop.permute.xlu0 %3097  ;;  %3412 = vperm.xlu1 %4626, %v5512_v59   ;;  %5559 = vrcp.f32 %v1390_v29  ;;  %v1392_v36 = vadd.f32 1.0, %v5532_v30  ;;  %v2192_v25 = vld [vmem:[%s8820_s1 + $0x528] sm:$0xff]  ;;  %v2191_v29 = vld [vmem:[%s8820_s1 + $0x520] sm:$0xff]  ;;  %v4581_v30 = vmul.f32 -1.442695, %v256_v17  ;;  %v257_v31 = vld [vmem:[%s8819_s0 + $0x7b0] sm:$0xff] }
 0x1d7   :  { %v5536_v37 = vpop.eup %5535  ;;  %v3911_v38 = vmul.f32 %v3098_v35, %v2183_v28  ;;  %3407 = vperm.xlu0 %4625, %v5514_v0   ;;  %5561 = vrcp.f32 %v1389_v32  ;;  %v1391_v40 = vadd.f32 1.0, %v5534_v33  ;;  %v260_v35 = vld [vmem:[%s8819_s0 + $0x7c8] sm:$0xff] }
 0x1d8   :  { %v5538_v41 = vpop.eup %5537  ;;  %4201 = vst.msk [vmem:[%s8821_s2 + $0x4e8] sm:$0xff] %vm4043_vm0, %v3912_v34  ;;  %5563 = vrcp.f32 %v1392_v36  ;;  %v1394_v43 = vadd.f32 1.0, %v5536_v37  ;;  %v4580_v34 = vmul.f32 -1.442695, %v255_v22 }
 0x1d9   :  { %v5540_v44 = vpop.eup %5539  ;;  %4200 = vst.msk [vmem:[%s8821_s2 + $0x4e0] sm:$0xff] %vm4043_vm0, %v3911_v38  ;;  %v3113_v45 = vpop.permute.xlu1 %3112  ;;  %5565 = vrcp.f32 %v1391_v40  ;;  %v1393_v46 = vadd.f32 1.0, %v5538_v41  ;;  %v259_v40 = vld [vmem:[%s8819_s0 + $0x7c0] sm:$0xff] }
 0x1da   :  { %v5542_v47 = vpop.eup %5541  ;;  %v3914_v48 = vmul.f32 %v3113_v45, %v2186_v39  ;;  %v3108_v49 = vpop.permute.xlu0 %3107  ;;  %3422 = vperm.xlu1 %4626, %v7689_v4   ;;  %5567 = vrcp.f32 %v1394_v43  ;;  %v1396_v50 = vadd.f32 1.0, %v5540_v44  ;;  %v4583_v39 = vmul.f32 -1.442695, %v258_v27  ;;  %v2194_v43 = vld [vmem:[%s8820_s1 + $0x538] sm:$0xff] }
 0x1db   :  { %v5544_v51 = vpop.eup %5543  ;;  %v3913_v52 = vmul.f32 %v3108_v49, %v2185_v42  ;;  %3417 = vperm.xlu0 %4625, %v7695_v7   ;;  %5569 = vrcp.f32 %v1393_v46  ;;  %v1395_v54 = vadd.f32 1.0, %v5542_v47  ;;  %v254_v7 = vld [vmem:[%s8819_s0 + $0x798] sm:$0xff]  ;;  %v4582_v44 = vmul.f32 -1.442695, %v257_v31  ;;  %v2193_v47 = vld [vmem:[%s8820_s1 + $0x530] sm:$0xff] }
 0x1dc   :  { %v5546_v55 = vpop.eup %5545  ;;  %4203 = vst.msk [vmem:[%s8821_s2 + $0x4f8] sm:$0xff] %vm4043_vm0, %v3914_v48  ;;  %5571 = vrcp.f32 %v1396_v50  ;;  %v1398_v57 = vadd.f32 1.0, %v5544_v51  ;;  %v4579_v21 = vmul.f32 -1.442695, %v254_v7  ;;  %v262_v45 = vld [vmem:[%s8819_s0 + $0x7d8] sm:$0xff]  ;;  %v261_v49 = vld [vmem:[%s8819_s0 + $0x7d0] sm:$0xff] }
 0x1dd   :  { %v5548_v58 = vpop.eup %5547  ;;  %4202 = vst.msk [vmem:[%s8821_s2 + $0x4f0] sm:$0xff] %vm4043_vm0, %v3913_v52  ;;  %v3123_v59 = vpop.permute.xlu1 %3122  ;;  %5573 = vrcp.f32 %v1395_v54  ;;  %v1397_v60 = vadd.f32 1.0, %v5546_v55  ;;  %v4585_v48 = vmul.f32 -1.442695, %v260_v35  ;;  %v4584_v52 = vmul.f32 -1.442695, %v259_v40 }
 0x1de   :  { %v5550_v62 = vpop.eup %5549  ;;  %v3916_v63 = vmul.f32 %v3123_v59, %v2188_v53  ;;  %v3118_v0 = vpop.permute.xlu0 %3117  ;;  %3432 = vperm.xlu1 %4626, %v7697_v11   ;;  %5575 = vrcp.f32 %v1398_v57  ;;  %v1400_v1 = vadd.f32 1.0, %v5548_v58  ;;  %v4577_v11 = vmul.f32 -1.442695, %v252_v61  ;;  %v264_v53 = vld [vmem:[%s8819_s0 + $0x7e8] sm:$0xff]  ;;  %v263_v58 = vld [vmem:[%s8819_s0 + $0x7e0] sm:$0xff] }
 0x1df   :  { %v5552_v3 = vpop.eup %5551  ;;  %v3915_v4 = vmul.f32 %v3118_v0, %v2187_v56  ;;  %3427 = vperm.xlu0 %4625, %v7702_v15   ;;  %5577 = vrcp.f32 %v1397_v60  ;;  %v1399_v6 = vadd.f32 1.0, %v5550_v62  ;;  %v4587_v57 = vmul.f32 -1.442695, %v262_v45  ;;  %v2196_v61 = vld [vmem:[%s8820_s1 + $0x548] sm:$0xff] }
 0x1e0   :  { %v5554_v8 = vpop.eup %5553  ;;  %4205 = vst.msk [vmem:[%s8821_s2 + $0x508] sm:$0xff] %vm4043_vm0, %v3916_v63  ;;  %5579 = vrcp.f32 %v1400_v1  ;;  %v1402_v10 = vadd.f32 1.0, %v5552_v3  ;;  %v4586_v62 = vmul.f32 -1.442695, %v261_v49  ;;  %v266_v63 = vld [vmem:[%s8819_s0 + $0x7f8] sm:$0xff]  ;;  %v2195_v1 = vld [vmem:[%s8820_s1 + $0x540] sm:$0xff] }
 0x1e1   :  { %v5556_v13 = vpop.eup %5555  ;;  %4204 = vst.msk [vmem:[%s8821_s2 + $0x500] sm:$0xff] %vm4043_vm0, %v3915_v4  ;;  %v3133_v14 = vpop.permute.xlu1 %3132  ;;  %5581 = vrcp.f32 %v1399_v6  ;;  %v1401_v15 = vadd.f32 1.0, %v5554_v8  ;;  %v4589_v2 = vmul.f32 -1.442695, %v264_v53  ;;  %v265_v3 = vld [vmem:[%s8819_s0 + $0x7f0] sm:$0xff]  ;;  %v2204_v53 = vld [vmem:[%s8820_s1 + $0x588] sm:$0xff] }
 0x1e2   :  { %v5558_v18 = vpop.eup %5557  ;;  %v3918_v19 = vmul.f32 %v3133_v14, %v2190_v5  ;;  %v3128_v20 = vpop.permute.xlu0 %3127  ;;  %3442 = vperm.xlu1 %4626, %v5556_v13   ;;  %5583 = vrcp.f32 %v1402_v10  ;;  %v4588_v6 = vmul.f32 -1.442695, %v263_v58  ;;  %v4591_v10 = vmul.f32 -1.442695, %v266_v63  ;;  %v2198_v13 = vld [vmem:[%s8820_s1 + $0x558] sm:$0xff] }
 0x1e3   :  { %v5560_v23 = vpop.eup %5559  ;;  %v3917_v24 = vmul.f32 %v3128_v20, %v2189_v9  ;;  %3437 = vperm.xlu0 %4625, %v5558_v18   ;;  %5585 = vrcp.f32 %v1401_v15  ;;  %v4590_v14 = vmul.f32 -1.442695, %v265_v3 }
 0x1e4   :  { %v5562_v28 = vpop.eup %5561  ;;  %4207 = vst.msk [vmem:[%s8821_s2 + $0x518] sm:$0xff] %vm4043_vm0, %v3918_v19  ;;  %5587 = vpow2.f32 %v4577_v11 }
 0x1e5   :  { %v5564_v32 = vpop.eup %5563  ;;  %4206 = vst.msk [vmem:[%s8821_s2 + $0x510] sm:$0xff] %vm4043_vm0, %v3917_v24  ;;  %v3143_v33 = vpop.permute.xlu1 %3142  ;;  %5589 = vpow2.f32 %v4576_v16  ;;  %v2197_v16 = vld [vmem:[%s8820_s1 + $0x550] sm:$0xff] }
 0x1e6   :  { %v5566_v36 = vpop.eup %5565  ;;  %v3920_v37 = vmul.f32 %v3143_v33, %v2192_v25  ;;  %v3138_v38 = vpop.permute.xlu0 %3137  ;;  %3452 = vperm.xlu1 %4626, %v5560_v23   ;;  %5591 = vpow2.f32 %v4579_v21  ;;  %v2200_v25 = vld [vmem:[%s8820_s1 + $0x568] sm:$0xff] }
 0x1e7   :  { %v5568_v41 = vpop.eup %5567  ;;  %v3919_v42 = vmul.f32 %v3138_v38, %v2191_v29  ;;  %3447 = vperm.xlu0 %4625, %v5562_v28   ;;  %5593 = vpow2.f32 %v4578_v26  ;;  %v2199_v28 = vld [vmem:[%s8820_s1 + $0x560] sm:$0xff] }
 0x1e8   :  { %v5570_v46 = vpop.eup %5569  ;;  %4209 = vst.msk [vmem:[%s8821_s2 + $0x528] sm:$0xff] %vm4043_vm0, %v3920_v37  ;;  %5595 = vpow2.f32 %v4581_v30 }
 0x1e9   :  { %v5572_v50 = vpop.eup %5571  ;;  %4208 = vst.msk [vmem:[%s8821_s2 + $0x520] sm:$0xff] %vm4043_vm0, %v3919_v42  ;;  %v3153_v51 = vpop.permute.xlu1 %3152  ;;  %5597 = vpow2.f32 %v4580_v34  ;;  %v2201_v42 = vld [vmem:[%s8820_s1 + $0x570] sm:$0xff] }
 0x1ea   :  { %v5574_v54 = vpop.eup %5573  ;;  %v3922_v55 = vmul.f32 %v3153_v51, %v2194_v43  ;;  %v3148_v56 = vpop.permute.xlu0 %3147  ;;  %3462 = vperm.xlu1 %4626, %v5564_v32   ;;  %5599 = vpow2.f32 %v4583_v39  ;;  %v2202_v39 = vld [vmem:[%s8820_s1 + $0x578] sm:$0xff] }
 0x1eb   :  { %v5576_v59 = vpop.eup %5575  ;;  %v3921_v60 = vmul.f32 %v3148_v56, %v2193_v47  ;;  %3457 = vperm.xlu0 %4625, %v5566_v36   ;;  %5601 = vpow2.f32 %v4582_v44  ;;  %v2203_v56 = vld [vmem:[%s8820_s1 + $0x580] sm:$0xff] }
 0x1ec   :  { %v5578_v0 = vpop.eup %5577  ;;  %4211 = vst.msk [vmem:[%s8821_s2 + $0x538] sm:$0xff] %vm4043_vm0, %v3922_v55  ;;  %5603 = vpow2.f32 %v4585_v48 }
 0x1ed   :  { %v7861_v4 = vpop.eup %5579  ;;  %4210 = vst.msk [vmem:[%s8821_s2 + $0x530] sm:$0xff] %vm4043_vm0, %v3921_v60  ;;  %v3163_v5 = vpop.permute.xlu1 %3162  ;;  %5605 = vpow2.f32 %v4584_v52 }
 0x1ee   :  { %v7867_v7 = vpop.eup %5581  ;;  %v3924_v8 = vmul.f32 %v3163_v5, %v2196_v61  ;;  %v3158_v9 = vpop.permute.xlu0 %3157  ;;  %3472 = vperm.xlu1 %4626, %v5568_v41   ;;  %5607 = vpow2.f32 %v4587_v57  ;;  %v268_v61 = vld [vmem:[%s8819_s0 + $0x808] sm:$0xff]  ;;  %v2206_v5 = vld [vmem:[%s8820_s1 + $0x598] sm:$0xff] }
 0x1ef   :  { %v7869_v11 = vpop.eup %5583  ;;  %v3923_v12 = vmul.f32 %v3158_v9, %v2195_v1  ;;  %3467 = vperm.xlu0 %4625, %v5570_v46   ;;  %5609 = vpow2.f32 %v4586_v62  ;;  %v2205_v9 = vld [vmem:[%s8820_s1 + $0x590] sm:$0xff] }
 0x1f0   :  { %v7874_v15 = vpop.eup %5585  ;;  %4213 = vst.msk [vmem:[%s8821_s2 + $0x548] sm:$0xff] %vm4043_vm0, %v3924_v8  ;;  %5611 = vpow2.f32 %v4589_v2  ;;  %v267_v2 = vld [vmem:[%s8819_s0 + $0x800] sm:$0xff] }
 0x1f1   :  { %v5588_v17 = vpop.eup %5587  ;;  %4212 = vst.msk [vmem:[%s8821_s2 + $0x540] sm:$0xff] %vm4043_vm0, %v3923_v12  ;;  %v3173_v18 = vpop.permute.xlu1 %3172  ;;  %5613 = vpow2.f32 %v4588_v6  ;;  %v269_v12 = vld [vmem:[%s8819_s0 + $0x810] sm:$0xff] }
 0x1f2   :  { %v5590_v19 = vpop.eup %5589  ;;  %v3926_v20 = vmul.f32 %v3173_v18, %v2198_v13  ;;  %v3168_v21 = vpop.permute.xlu0 %3167  ;;  %3482 = vperm.xlu1 %4626, %v5572_v50   ;;  %v1404_v22 = vadd.f32 1.0, %v5588_v17  ;;  %5615 = vpow2.f32 %v4591_v10  ;;  %v272_v17 = vld [vmem:[%s8819_s0 + $0x828] sm:$0xff] }
 0x1f3   :  { %v5592_v23 = vpop.eup %5591  ;;  %v3925_v24 = vmul.f32 %v3168_v21, %v2197_v16  ;;  %3477 = vperm.xlu0 %4625, %v5574_v54   ;;  %v1403_v26 = vadd.f32 1.0, %v5590_v19  ;;  %5617 = vpow2.f32 %v4590_v14  ;;  %v4592_v16 = vmul.f32 -1.442695, %v267_v2 }
 0x1f4   :  { %v5594_v27 = vpop.eup %5593  ;;  %4215 = vst.msk [vmem:[%s8821_s2 + $0x558] sm:$0xff] %vm4043_vm0, %v3926_v20  ;;  %5619 = vrcp.f32 %v1404_v22  ;;  %v1406_v29 = vadd.f32 1.0, %v5592_v23  ;;  %v271_v22 = vld [vmem:[%s8819_s0 + $0x820] sm:$0xff] }
 0x1f5   :  { %v5596_v30 = vpop.eup %5595  ;;  %4214 = vst.msk [vmem:[%s8821_s2 + $0x550] sm:$0xff] %vm4043_vm0, %v3925_v24  ;;  %v3183_v31 = vpop.permute.xlu1 %3182  ;;  %5621 = vrcp.f32 %v1403_v26  ;;  %v1405_v32 = vadd.f32 1.0, %v5594_v27  ;;  %v4594_v26 = vmul.f32 -1.442695, %v269_v12  ;;  %v274_v27 = vld [vmem:[%s8819_s0 + $0x838] sm:$0xff]  ;;  %v2213_v12 = vld [vmem:[%s8820_s1 + $0x5d0] sm:$0xff] }
 0x1f6   :  { %v5598_v33 = vpop.eup %5597  ;;  %v3928_v34 = vmul.f32 %v3183_v31, %v2200_v25  ;;  %v3178_v35 = vpop.permute.xlu0 %3177  ;;  %3492 = vperm.xlu1 %4626, %v5576_v59   ;;  %5623 = vrcp.f32 %v1406_v29  ;;  %v1408_v36 = vadd.f32 1.0, %v5596_v30  ;;  %v2208_v25 = vld [vmem:[%s8820_s1 + $0x5a8] sm:$0xff]  ;;  %v2207_v29 = vld [vmem:[%s8820_s1 + $0x5a0] sm:$0xff]  ;;  %v4597_v30 = vmul.f32 -1.442695, %v272_v17  ;;  %v273_v31 = vld [vmem:[%s8819_s0 + $0x830] sm:$0xff] }
 0x1f7   :  { %v5600_v37 = vpop.eup %5599  ;;  %v3927_v38 = vmul.f32 %v3178_v35, %v2199_v28  ;;  %3487 = vperm.xlu0 %4625, %v5578_v0   ;;  %5625 = vrcp.f32 %v1405_v32  ;;  %v1407_v40 = vadd.f32 1.0, %v5598_v33  ;;  %v276_v35 = vld [vmem:[%s8819_s0 + $0x848] sm:$0xff] }
 0x1f8   :  { %v5602_v41 = vpop.eup %5601  ;;  %4217 = vst.msk [vmem:[%s8821_s2 + $0x568] sm:$0xff] %vm4043_vm0, %v3928_v34  ;;  %5627 = vrcp.f32 %v1408_v36  ;;  %v1410_v43 = vadd.f32 1.0, %v5600_v37  ;;  %v4596_v34 = vmul.f32 -1.442695, %v271_v22 }
 0x1f9   :  { %v5604_v44 = vpop.eup %5603  ;;  %4216 = vst.msk [vmem:[%s8821_s2 + $0x560] sm:$0xff] %vm4043_vm0, %v3927_v38  ;;  %v3193_v45 = vpop.permute.xlu1 %3192  ;;  %5629 = vrcp.f32 %v1407_v40  ;;  %v1409_v46 = vadd.f32 1.0, %v5602_v41  ;;  %v275_v40 = vld [vmem:[%s8819_s0 + $0x840] sm:$0xff] }
 0x1fa   :  { %v5606_v47 = vpop.eup %5605  ;;  %v3930_v48 = vmul.f32 %v3193_v45, %v2202_v39  ;;  %v3188_v49 = vpop.permute.xlu0 %3187  ;;  %3502 = vperm.xlu1 %4626, %v7861_v4   ;;  %5631 = vrcp.f32 %v1410_v43  ;;  %v1412_v50 = vadd.f32 1.0, %v5604_v44  ;;  %v4599_v39 = vmul.f32 -1.442695, %v274_v27  ;;  %v2210_v43 = vld [vmem:[%s8820_s1 + $0x5b8] sm:$0xff] }
 0x1fb   :  { %v5608_v51 = vpop.eup %5607  ;;  %v3929_v52 = vmul.f32 %v3188_v49, %v2201_v42  ;;  %3497 = vperm.xlu0 %4625, %v7867_v7   ;;  %5633 = vrcp.f32 %v1409_v46  ;;  %v1411_v54 = vadd.f32 1.0, %v5606_v47  ;;  %v270_v7 = vld [vmem:[%s8819_s0 + $0x818] sm:$0xff]  ;;  %v4598_v44 = vmul.f32 -1.442695, %v273_v31  ;;  %v2209_v47 = vld [vmem:[%s8820_s1 + $0x5b0] sm:$0xff] }
 0x1fc   :  { %v5610_v55 = vpop.eup %5609  ;;  %4219 = vst.msk [vmem:[%s8821_s2 + $0x578] sm:$0xff] %vm4043_vm0, %v3930_v48  ;;  %5635 = vrcp.f32 %v1412_v50  ;;  %v1414_v57 = vadd.f32 1.0, %v5608_v51  ;;  %v4595_v21 = vmul.f32 -1.442695, %v270_v7  ;;  %v278_v45 = vld [vmem:[%s8819_s0 + $0x858] sm:$0xff]  ;;  %v277_v49 = vld [vmem:[%s8819_s0 + $0x850] sm:$0xff] }
 0x1fd   :  { %v5612_v58 = vpop.eup %5611  ;;  %4218 = vst.msk [vmem:[%s8821_s2 + $0x570] sm:$0xff] %vm4043_vm0, %v3929_v52  ;;  %v3203_v59 = vpop.permute.xlu1 %3202  ;;  %5637 = vrcp.f32 %v1411_v54  ;;  %v1413_v60 = vadd.f32 1.0, %v5610_v55  ;;  %v4601_v48 = vmul.f32 -1.442695, %v276_v35  ;;  %v4600_v52 = vmul.f32 -1.442695, %v275_v40 }
 0x1fe   :  { %v5614_v62 = vpop.eup %5613  ;;  %v3932_v63 = vmul.f32 %v3203_v59, %v2204_v53  ;;  %v3198_v0 = vpop.permute.xlu0 %3197  ;;  %3512 = vperm.xlu1 %4626, %v7869_v11   ;;  %5639 = vrcp.f32 %v1414_v57  ;;  %v1416_v1 = vadd.f32 1.0, %v5612_v58  ;;  %v4593_v11 = vmul.f32 -1.442695, %v268_v61  ;;  %v280_v53 = vld [vmem:[%s8819_s0 + $0x868] sm:$0xff]  ;;  %v279_v58 = vld [vmem:[%s8819_s0 + $0x860] sm:$0xff] }
 0x1ff   :  { %v5616_v3 = vpop.eup %5615  ;;  %v3931_v4 = vmul.f32 %v3198_v0, %v2203_v56  ;;  %3507 = vperm.xlu0 %4625, %v7874_v15   ;;  %5641 = vrcp.f32 %v1413_v60  ;;  %v1415_v6 = vadd.f32 1.0, %v5614_v62  ;;  %v4603_v57 = vmul.f32 -1.442695, %v278_v45  ;;  %v2212_v61 = vld [vmem:[%s8820_s1 + $0x5c8] sm:$0xff]  ;;  %v2211_v0 = vld [vmem:[%s8820_s1 + $0x5c0] sm:$0xff] }
 0x200   :  { %v5618_v8 = vpop.eup %5617  ;;  %4221 = vst.msk [vmem:[%s8821_s2 + $0x588] sm:$0xff] %vm4043_vm0, %v3932_v63  ;;  %5643 = vrcp.f32 %v1416_v1  ;;  %v1418_v10 = vadd.f32 1.0, %v5616_v3  ;;  %v4602_v62 = vmul.f32 -1.442695, %v277_v49  ;;  %v4605_v1 = vmul.f32 -1.442695, %v280_v53 }
 0x201   :  { %v5620_v13 = vpop.eup %5619  ;;  %4220 = vst.msk [vmem:[%s8821_s2 + $0x580] sm:$0xff] %vm4043_vm0, %v3931_v4  ;;  %v3213_v14 = vpop.permute.xlu1 %3212  ;;  %5645 = vrcp.f32 %v1415_v6  ;;  %v1417_v15 = vadd.f32 1.0, %v5618_v8  ;;  %v4604_v4 = vmul.f32 -1.442695, %v279_v58  ;;  %v2220_v53 = vld [vmem:[%s8820_s1 + $0x608] sm:$0xff] }
 0x202   :  { %v5622_v18 = vpop.eup %5621  ;;  %v3934_v19 = vmul.f32 %v3213_v14, %v2206_v5  ;;  %v3208_v20 = vpop.permute.xlu0 %3207  ;;  %3522 = vperm.xlu1 %4626, %v5620_v13   ;;  %5647 = vrcp.f32 %v1418_v10  ;;  %v2214_v10 = vld [vmem:[%s8820_s1 + $0x5d8] sm:$0xff] }
 0x203   :  { %v5624_v23 = vpop.eup %5623  ;;  %v3933_v24 = vmul.f32 %v3208_v20, %v2205_v9  ;;  %3517 = vperm.xlu0 %4625, %v5622_v18   ;;  %5649 = vrcp.f32 %v1417_v15  ;;  %v282_v15 = vld [vmem:[%s8819_s0 + $0x878] sm:$0xff]  ;;  %v281_v20 = vld [vmem:[%s8819_s0 + $0x870] sm:$0xff] }
 0x204   :  { %v5626_v28 = vpop.eup %5625  ;;  %4223 = vst.msk [vmem:[%s8821_s2 + $0x598] sm:$0xff] %vm4043_vm0, %v3934_v19  ;;  %5651 = vpow2.f32 %v4593_v11 }
 0x205   :  { %v5628_v32 = vpop.eup %5627  ;;  %4222 = vst.msk [vmem:[%s8821_s2 + $0x590] sm:$0xff] %vm4043_vm0, %v3933_v24  ;;  %v3223_v33 = vpop.permute.xlu1 %3222  ;;  %5653 = vpow2.f32 %v4592_v16 }
 0x206   :  { %v5630_v36 = vpop.eup %5629  ;;  %v3936_v37 = vmul.f32 %v3223_v33, %v2208_v25  ;;  %v3218_v38 = vpop.permute.xlu0 %3217  ;;  %3532 = vperm.xlu1 %4626, %v5624_v23   ;;  %5655 = vpow2.f32 %v4595_v21  ;;  %v2216_v23 = vld [vmem:[%s8820_s1 + $0x5e8] sm:$0xff] }
 0x207   :  { %v5632_v41 = vpop.eup %5631  ;;  %v3935_v42 = vmul.f32 %v3218_v38, %v2207_v29  ;;  %3527 = vperm.xlu0 %4625, %v5626_v28   ;;  %5657 = vpow2.f32 %v4594_v26  ;;  %v2215_v26 = vld [vmem:[%s8820_s1 + $0x5e0] sm:$0xff]  ;;  %v4607_v28 = vmul.f32 -1.442695, %v282_v15 }
 0x208   :  { %v5634_v46 = vpop.eup %5633  ;;  %4225 = vst.msk [vmem:[%s8821_s2 + $0x5a8] sm:$0xff] %vm4043_vm0, %v3936_v37  ;;  %5659 = vpow2.f32 %v4597_v30 }
 0x209   :  { %v5636_v50 = vpop.eup %5635  ;;  %4224 = vst.msk [vmem:[%s8821_s2 + $0x5a0] sm:$0xff] %vm4043_vm0, %v3935_v42  ;;  %v3233_v51 = vpop.permute.xlu1 %3232  ;;  %5661 = vpow2.f32 %v4596_v34  ;;  %v2217_v42 = vld [vmem:[%s8820_s1 + $0x5f0] sm:$0xff] }
 0x20a   :  { %v5638_v54 = vpop.eup %5637  ;;  %v3938_v55 = vmul.f32 %v3233_v51, %v2210_v43  ;;  %v3228_v56 = vpop.permute.xlu0 %3227  ;;  %3542 = vperm.xlu1 %4626, %v5628_v32   ;;  %5663 = vpow2.f32 %v4599_v39  ;;  %v4606_v32 = vmul.f32 -1.442695, %v281_v20  ;;  %v2218_v39 = vld [vmem:[%s8820_s1 + $0x5f8] sm:$0xff] }
 0x20b   :  { %v5640_v59 = vpop.eup %5639  ;;  %v3937_v60 = vmul.f32 %v3228_v56, %v2209_v47  ;;  %3537 = vperm.xlu0 %4625, %v5630_v36   ;;  %5665 = vpow2.f32 %v4598_v44  ;;  %v2219_v56 = vld [vmem:[%s8820_s1 + $0x600] sm:$0xff] }
 0x20c   :  { %v5642_v63 = vpop.eup %5641  ;;  %4227 = vst.msk [vmem:[%s8821_s2 + $0x5b8] sm:$0xff] %vm4043_vm0, %v3938_v55  ;;  %5667 = vpow2.f32 %v4601_v48 }
 0x20d   :  { %v8027_v2 = vpop.eup %5643  ;;  %4226 = vst.msk [vmem:[%s8821_s2 + $0x5b0] sm:$0xff] %vm4043_vm0, %v3937_v60  ;;  %v3243_v3 = vpop.permute.xlu1 %3242  ;;  %5669 = vpow2.f32 %v4600_v52 }
 0x20e   :  { %v8033_v5 = vpop.eup %5645  ;;  %v3940_v6 = vmul.f32 %v3243_v3, %v2212_v61  ;;  %v3238_v7 = vpop.permute.xlu0 %3237  ;;  %3552 = vperm.xlu1 %4626, %v5632_v41   ;;  %5671 = vpow2.f32 %v4603_v57  ;;  %v284_v61 = vld [vmem:[%s8819_s0 + $0x888] sm:$0xff] }
 0x20f   :  { %v8035_v8 = vpop.eup %5647  ;;  %v3939_v9 = vmul.f32 %v3238_v7, %v2211_v0  ;;  %3547 = vperm.xlu0 %4625, %v5634_v46   ;;  %5673 = vpow2.f32 %v4602_v62  ;;  %v2221_v7 = vld [vmem:[%s8820_s1 + $0x610] sm:$0xff] }
 0x210   :  { %v8040_v11 = vpop.eup %5649  ;;  %4229 = vst.msk [vmem:[%s8821_s2 + $0x5c8] sm:$0xff] %vm4043_vm0, %v3940_v6  ;;  %5675 = vpow2.f32 %v4605_v1  ;;  %v286_v6 = vld [vmem:[%s8819_s0 + $0x898] sm:$0xff] }
 0x211   :  { %v5652_v13 = vpop.eup %5651  ;;  %4228 = vst.msk [vmem:[%s8821_s2 + $0x5c0] sm:$0xff] %vm4043_vm0, %v3939_v9  ;;  %v3253_v14 = vpop.permute.xlu1 %3252  ;;  %5677 = vpow2.f32 %v4604_v4  ;;  %v2222_v4 = vld [vmem:[%s8820_s1 + $0x618] sm:$0xff]  ;;  %v285_v9 = vld [vmem:[%s8819_s0 + $0x890] sm:$0xff] }
 0x212   :  { %v5654_v16 = vpop.eup %5653  ;;  %v3942_v17 = vmul.f32 %v3253_v14, %v2214_v10  ;;  %v3248_v18 = vpop.permute.xlu0 %3247  ;;  %3562 = vperm.xlu1 %4626, %v5636_v50   ;;  %v1420_v19 = vadd.f32 1.0, %v5652_v13  ;;  %v288_v13 = vld [vmem:[%s8819_s0 + $0x8a8] sm:$0xff] }
 0x213   :  { %v5656_v21 = vpop.eup %5655  ;;  %v3941_v22 = vmul.f32 %v3248_v18, %v2213_v12  ;;  %3557 = vperm.xlu0 %4625, %v5638_v54   ;;  %v1419_v24 = vadd.f32 1.0, %v5654_v16  ;;  %v287_v18 = vld [vmem:[%s8819_s0 + $0x8a0] sm:$0xff] }
 0x214   :  { %v5658_v25 = vpop.eup %5657  ;;  %4231 = vst.msk [vmem:[%s8821_s2 + $0x5d8] sm:$0xff] %vm4043_vm0, %v3942_v17  ;;  %5679 = vrcp.f32 %v1420_v19  ;;  %v1422_v27 = vadd.f32 1.0, %v5656_v21  ;;  %v4611_v17 = vmul.f32 -1.442695, %v286_v6  ;;  %v2224_v21 = vld [vmem:[%s8820_s1 + $0x628] sm:$0xff] }
 0x215   :  { %v5660_v29 = vpop.eup %5659  ;;  %4230 = vst.msk [vmem:[%s8821_s2 + $0x5d0] sm:$0xff] %vm4043_vm0, %v3941_v22  ;;  %v3263_v30 = vpop.permute.xlu1 %3262  ;;  %5681 = vrcp.f32 %v1419_v24  ;;  %v1421_v31 = vadd.f32 1.0, %v5658_v25  ;;  %v4610_v22 = vmul.f32 -1.442695, %v285_v9  ;;  %v2223_v25 = vld [vmem:[%s8820_s1 + $0x620] sm:$0xff] }
 0x216   :  { %v5662_v33 = vpop.eup %5661  ;;  %v3944_v34 = vmul.f32 %v3263_v30, %v2216_v23  ;;  %v3258_v35 = vpop.permute.xlu0 %3257  ;;  %3572 = vperm.xlu1 %4626, %v5640_v59   ;;  %5683 = vrcp.f32 %v1422_v27  ;;  %v1424_v36 = vadd.f32 1.0, %v5660_v29  ;;  %v290_v23 = vld [vmem:[%s8819_s0 + $0x8b8] sm:$0xff]  ;;  %v289_v27 = vld [vmem:[%s8819_s0 + $0x8b0] sm:$0xff]  ;;  %v4612_v30 = vmul.f32 -1.442695, %v287_v18 }
 0x217   :  { %v5664_v37 = vpop.eup %5663  ;;  %v3943_v38 = vmul.f32 %v3258_v35, %v2215_v26  ;;  %3567 = vperm.xlu0 %4625, %v5642_v63   ;;  %5685 = vrcp.f32 %v1421_v31  ;;  %v1423_v40 = vadd.f32 1.0, %v5662_v33  ;;  %v4613_v26 = vmul.f32 -1.442695, %v288_v13  ;;  %v298_v13 = vld [vmem:[%s8819_s0 + $0x8f8] sm:$0xff]  ;;  %v297_v18 = vld [vmem:[%s8819_s0 + $0x8f0] sm:$0xff] }
 0x218   :  { %v5666_v41 = vpop.eup %5665  ;;  %4233 = vst.msk [vmem:[%s8821_s2 + $0x5e8] sm:$0xff] %vm4043_vm0, %v3944_v34  ;;  %v1426_v43 = vadd.f32 1.0, %v5664_v37  ;;  %5687 = vpow2.f32 %v4607_v28  ;;  %v4615_v34 = vmul.f32 -1.442695, %v290_v23  ;;  %v2226_v37 = vld [vmem:[%s8820_s1 + $0x638] sm:$0xff] }
 0x219   :  { %v5668_v44 = vpop.eup %5667  ;;  %4232 = vst.msk [vmem:[%s8821_s2 + $0x5e0] sm:$0xff] %vm4043_vm0, %v3943_v38  ;;  %v3273_v45 = vpop.permute.xlu1 %3272  ;;  %v1425_v46 = vadd.f32 1.0, %v5666_v41  ;;  %5689 = vpow2.f32 %v4606_v32  ;;  %v4614_v38 = vmul.f32 -1.442695, %v289_v27  ;;  %v2225_v41 = vld [vmem:[%s8820_s1 + $0x630] sm:$0xff] }
 0x21a   :  { %v5670_v47 = vpop.eup %5669  ;;  %v3946_v48 = vmul.f32 %v3273_v45, %v2218_v39  ;;  %v3268_v49 = vpop.permute.xlu0 %3267  ;;  %3582 = vperm.xlu1 %4626, %v8027_v2   ;;  %5691 = vrcp.f32 %v1424_v36  ;;  %v1428_v50 = vadd.f32 1.0, %v5668_v44  ;;  %v283_v2 = vld [vmem:[%s8819_s0 + $0x880] sm:$0xff]  ;;  %v292_v39 = vld [vmem:[%s8819_s0 + $0x8c8] sm:$0xff] }
 0x21b   :  { %v5672_v51 = vpop.eup %5671  ;;  %v3945_v52 = vmul.f32 %v3268_v49, %v2217_v42  ;;  %3577 = vperm.xlu0 %4625, %v8033_v5   ;;  %5693 = vrcp.f32 %v1423_v40  ;;  %v1427_v54 = vadd.f32 1.0, %v5670_v47  ;;  %v4608_v12 = vmul.f32 -1.442695, %v283_v2  ;;  %v294_v47 = vld [vmem:[%s8819_s0 + $0x8d8] sm:$0xff] }
 0x21c   :  { %v5674_v55 = vpop.eup %5673  ;;  %4235 = vst.msk [vmem:[%s8821_s2 + $0x5f8] sm:$0xff] %vm4043_vm0, %v3946_v48  ;;  %5695 = vrcp.f32 %v1426_v43  ;;  %v1430_v57 = vadd.f32 1.0, %v5672_v51  ;;  %v291_v43 = vld [vmem:[%s8819_s0 + $0x8c0] sm:$0xff]  ;;  %v4617_v51 = vmul.f32 -1.442695, %v292_v39 }
 0x21d   :  { %v5676_v58 = vpop.eup %5675  ;;  %4234 = vst.msk [vmem:[%s8821_s2 + $0x5f0] sm:$0xff] %vm4043_vm0, %v3945_v52  ;;  %v3283_v59 = vpop.permute.xlu1 %3282  ;;  %5697 = vrcp.f32 %v1425_v46  ;;  %v1429_v60 = vadd.f32 1.0, %v5674_v55  ;;  %v293_v52 = vld [vmem:[%s8819_s0 + $0x8d0] sm:$0xff]  ;;  %v2228_v55 = vld [vmem:[%s8820_s1 + $0x648] sm:$0xff] }
 0x21e   :  { %v5678_v62 = vpop.eup %5677  ;;  %v3948_v63 = vmul.f32 %v3283_v59, %v2220_v53  ;;  %v3278_v0 = vpop.permute.xlu0 %3277  ;;  %3592 = vperm.xlu1 %4626, %v8035_v8   ;;  %5699 = vrcp.f32 %v1428_v50  ;;  %v1432_v1 = vadd.f32 1.0, %v5676_v58  ;;  %v4609_v8 = vmul.f32 -1.442695, %v284_v61  ;;  %v2227_v59 = vld [vmem:[%s8820_s1 + $0x640] sm:$0xff] }
 0x21f   :  { %v3947_v3 = vmul.f32 %v3278_v0, %v2219_v56  ;;  %3587 = vperm.xlu0 %4625, %v8040_v11   ;;  %5701 = vrcp.f32 %v1427_v54  ;;  %v1431_v5 = vadd.f32 1.0, %v5678_v62  ;;  %v4616_v56 = vmul.f32 -1.442695, %v291_v43  ;;  %v295_v61 = vld [vmem:[%s8819_s0 + $0x8e0] sm:$0xff] }
 0x220   :  { %4237 = vst.msk [vmem:[%s8821_s2 + $0x608] sm:$0xff] %vm4043_vm0, %v3948_v63  ;;  %5703 = vrcp.f32 %v1430_v57  ;;  %v296_v57 = vld [vmem:[%s8819_s0 + $0x8e8] sm:$0xff]  ;;  %v4618_v0 = vmul.f32 -1.442695, %v293_v52  ;;  %v2235_v52 = vld [vmem:[%s8820_s1 + $0x680] sm:$0xff] }
 0x221   :  { %v5680_v10 = vpop.eup %5679  ;;  %4236 = vst.msk [vmem:[%s8821_s2 + $0x600] sm:$0xff] %vm4043_vm0, %v3947_v3  ;;  %v3293_v11 = vpop.permute.xlu1 %3292  ;;  %5705 = vrcp.f32 %v1429_v60  ;;  %v4619_v60 = vmul.f32 -1.442695, %v294_v47 }
 0x222   :  { %v5682_v14 = vpop.eup %5681  ;;  %v3950_v15 = vmul.f32 %v3293_v11, %v2222_v4  ;;  %v3288_v16 = vpop.permute.xlu0 %3287  ;;  %3602 = vperm.xlu1 %4626, %v5680_v10   ;;  %5707 = vrcp.f32 %v1432_v1  ;;  %v4621_v4 = vmul.f32 -1.442695, %v296_v57  ;;  %v2229_v10 = vld [vmem:[%s8820_s1 + $0x650] sm:$0xff] }
 0x223   :  { %v5684_v19 = vpop.eup %5683  ;;  %v3949_v20 = vmul.f32 %v3288_v16, %v2221_v7  ;;  %3597 = vperm.xlu0 %4625, %v5682_v14   ;;  %5709 = vrcp.f32 %v1431_v5  ;;  %v2230_v7 = vld [vmem:[%s8820_s1 + $0x658] sm:$0xff] }
 0x224   :  { %v5686_v24 = vpop.eup %5685  ;;  %4239 = vst.msk [vmem:[%s8821_s2 + $0x618] sm:$0xff] %vm4043_vm0, %v3950_v15  ;;  %5711 = vpow2.f32 %v4609_v8  ;;  %v4620_v8 = vmul.f32 -1.442695, %v295_v61  ;;  %v2238_v61 = vld [vmem:[%s8820_s1 + $0x698] sm:$0xff] }
 0x225   :  { %v5688_v28 = vpop.eup %5687  ;;  %4238 = vst.msk [vmem:[%s8821_s2 + $0x610] sm:$0xff] %vm4043_vm0, %v3949_v20  ;;  %v3303_v29 = vpop.permute.xlu1 %3302  ;;  %5713 = vpow2.f32 %v4608_v12 }
 0x226   :  { %v5690_v31 = vpop.eup %5689  ;;  %v3952_v32 = vmul.f32 %v3303_v29, %v2224_v21  ;;  %v3298_v33 = vpop.permute.xlu0 %3297  ;;  %3612 = vperm.xlu1 %4626, %v5684_v19   ;;  %5715 = vpow2.f32 %v4611_v17  ;;  %v1434_v42 = vadd.f32 1.0, %v5688_v28  ;;  %v2232_v21 = vld [vmem:[%s8820_s1 + $0x668] sm:$0xff] }
 0x227   :  { %v5692_v35 = vpop.eup %5691  ;;  %v3951_v36 = vmul.f32 %v3298_v33, %v2223_v25  ;;  %3607 = vperm.xlu0 %4625, %v5686_v24   ;;  %5717 = vpow2.f32 %v4610_v22  ;;  %v1433_v46 = vadd.f32 1.0, %v5690_v31  ;;  %v2231_v24 = vld [vmem:[%s8820_s1 + $0x660] sm:$0xff] }
 0x228   :  { %v5694_v40 = vpop.eup %5693  ;;  %4241 = vst.msk [vmem:[%s8821_s2 + $0x628] sm:$0xff] %vm4043_vm0, %v3952_v32  ;;  %5719 = vpow2.f32 %v4613_v26  ;;  %v4623_v26 = vmul.f32 -1.442695, %v298_v13 }
 0x229   :  { %v5696_v44 = vpop.eup %5695  ;;  %4240 = vst.msk [vmem:[%s8821_s2 + $0x620] sm:$0xff] %vm4043_vm0, %v3951_v36  ;;  %v3313_v45 = vpop.permute.xlu1 %3312  ;;  %5721 = vpow2.f32 %v4612_v30  ;;  %v4622_v30 = vmul.f32 -1.442695, %v297_v18 }
 0x22a   :  { %v5698_v48 = vpop.eup %5697  ;;  %v3954_v49 = vmul.f32 %v3313_v45, %v2226_v37  ;;  %v3308_v50 = vpop.permute.xlu0 %3307  ;;  %3622 = vperm.xlu1 %4626, %v5692_v35   ;;  %5723 = vpow2.f32 %v4615_v34  ;;  %v2234_v37 = vld [vmem:[%s8820_s1 + $0x678] sm:$0xff] }
 0x22b   :  { %v5700_v53 = vpop.eup %5699  ;;  %v3953_v54 = vmul.f32 %v3308_v50, %v2225_v41  ;;  %3617 = vperm.xlu0 %4625, %v5694_v40   ;;  %5725 = vpow2.f32 %v4614_v38  ;;  %v2233_v40 = vld [vmem:[%s8820_s1 + $0x670] sm:$0xff] }
 0x22c   :  { %v5702_v58 = vpop.eup %5701  ;;  %4243 = vst.msk [vmem:[%s8821_s2 + $0x638] sm:$0xff] %vm4043_vm0, %v3954_v49  ;;  %5727 = vrcp.f32 %v1434_v42  ;;  %v2236_v49 = vld [vmem:[%s8820_s1 + $0x688] sm:$0xff] }
 0x22d   :  { %v5704_v62 = vpop.eup %5703  ;;  %4242 = vst.msk [vmem:[%s8821_s2 + $0x630] sm:$0xff] %vm4043_vm0, %v3953_v54  ;;  %v3323_v63 = vpop.permute.xlu1 %3322  ;;  %5729 = vrcp.f32 %v1433_v46 }
 0x22e   :  { %v5706_v1 = vpop.eup %5705  ;;  %v3956_v2 = vmul.f32 %v3323_v63, %v2228_v55  ;;  %v3318_v3 = vpop.permute.xlu0 %3317  ;;  %3632 = vperm.xlu1 %4626, %v5696_v44   ;;  %5731 = vpow2.f32 %v4617_v51 }
 0x22f   :  { %v5708_v5 = vpop.eup %5707  ;;  %v3955_v6 = vmul.f32 %v3318_v3, %v2227_v59  ;;  %3627 = vperm.xlu0 %4625, %v5698_v48   ;;  %5733 = vpow2.f32 %v4616_v56 }
 0x230   :  { %v5710_v9 = vpop.eup %5709  ;;  %4245 = vst.msk [vmem:[%s8821_s2 + $0x648] sm:$0xff] %vm4043_vm0, %v3956_v2  ;;  %5735 = vpow2.f32 %v4619_v60 }
 0x231   :  { %v5712_v11 = vpop.eup %5711  ;;  %4244 = vst.msk [vmem:[%s8821_s2 + $0x640] sm:$0xff] %vm4043_vm0, %v3955_v6  ;;  %v3333_v12 = vpop.permute.xlu1 %3332  ;;  %5737 = vpow2.f32 %v4618_v0  ;;  %v2237_v0 = vld [vmem:[%s8820_s1 + $0x690] sm:$0xff] }
 0x232   :  { %v5714_v14 = vpop.eup %5713  ;;  %v3958_v15 = vmul.f32 %v3333_v12, %v2230_v7  ;;  %v3328_v16 = vpop.permute.xlu0 %3327  ;;  %3642 = vperm.xlu1 %4626, %v5700_v53   ;;  %v1436_v17 = vadd.f32 1.0, %v5712_v11  ;;  %5739 = vpow2.f32 %v4621_v4  ;;  %v2239_v12 = vld [vmem:[%s8820_s1 + $0x6a0] sm:$0xff] }
 0x233   :  { %v5716_v19 = vpop.eup %5715  ;;  %v3957_v20 = vmul.f32 %v3328_v16, %v2229_v10  ;;  %3637 = vperm.xlu0 %4625, %v5702_v58   ;;  %v1435_v22 = vadd.f32 1.0, %v5714_v14  ;;  %5741 = vpow2.f32 %v4620_v8 }
 0x234   :  { %v5718_v23 = vpop.eup %5717  ;;  %4247 = vst.msk [vmem:[%s8821_s2 + $0x658] sm:$0xff] %vm4043_vm0, %v3958_v15  ;;  %5743 = vrcp.f32 %v1436_v17  ;;  %v1438_v25 = vadd.f32 1.0, %v5716_v19 }
 0x235   :  { %v5720_v27 = vpop.eup %5719  ;;  %4246 = vst.msk [vmem:[%s8821_s2 + $0x650] sm:$0xff] %vm4043_vm0, %v3957_v20  ;;  %v3343_v28 = vpop.permute.xlu1 %3342  ;;  %5745 = vrcp.f32 %v1435_v22  ;;  %v1437_v29 = vadd.f32 1.0, %v5718_v23 }
 0x236   :  { %v5722_v31 = vpop.eup %5721  ;;  %v3960_v32 = vmul.f32 %v3343_v28, %v2232_v21  ;;  %v3338_v33 = vpop.permute.xlu0 %3337  ;;  %3652 = vperm.xlu1 %4626, %v5704_v62   ;;  %5747 = vrcp.f32 %v1438_v25  ;;  %v1440_v34 = vadd.f32 1.0, %v5720_v27  ;;  %v2242_v21 = vld [vmem:[%s8820_s1 + $0x6b8] sm:$0xff] }
 0x237   :  { %v5724_v35 = vpop.eup %5723  ;;  %v3959_v36 = vmul.f32 %v3338_v33, %v2231_v24  ;;  %3647 = vperm.xlu0 %4625, %v5706_v1   ;;  %5749 = vrcp.f32 %v1437_v29  ;;  %v1439_v38 = vadd.f32 1.0, %v5722_v31  ;;  %v2241_v24 = vld [vmem:[%s8820_s1 + $0x6b0] sm:$0xff]  ;;  %v2244_v31 = vld [vmem:[%s8820_s1 + $0x6c8] sm:$0xff] }
 0x238   :  { %v5726_v39 = vpop.eup %5725  ;;  %4249 = vst.msk [vmem:[%s8821_s2 + $0x668] sm:$0xff] %vm4043_vm0, %v3960_v32  ;;  %5751 = vpow2.f32 %v4623_v26  ;;  %v1442_v46 = vadd.f32 1.0, %v5724_v35 }
 0x239   :  { %v5728_v41 = vpop.eup %5727  ;;  %4248 = vst.msk [vmem:[%s8821_s2 + $0x660] sm:$0xff] %vm4043_vm0, %v3959_v36  ;;  %v3353_v42 = vpop.permute.xlu1 %3352  ;;  %5753 = vpow2.f32 %v4622_v30  ;;  %v1441_v50 = vadd.f32 1.0, %v5726_v39 }
 0x23a   :  { %v5730_v43 = vpop.eup %5729  ;;  %v3962_v44 = vmul.f32 %v3353_v42, %v2234_v37  ;;  %v3348_v45 = vpop.permute.xlu0 %3347  ;;  %3662 = vperm.xlu1 %4626, %v5708_v5   ;;  %5755 = vrcp.f32 %v1440_v34  ;;  %v2243_v34 = vld [vmem:[%s8820_s1 + $0x6c0] sm:$0xff]  ;;  %v2245_v42 = vld [vmem:[%s8820_s1 + $0x6d0] sm:$0xff] }
 0x23b   :  { %v5732_v47 = vpop.eup %5731  ;;  %v3961_v48 = vmul.f32 %v3348_v45, %v2233_v40  ;;  %3657 = vperm.xlu0 %4625, %v5710_v9   ;;  %5757 = vrcp.f32 %v1439_v38  ;;  %v2240_v9 = vld [vmem:[%s8820_s1 + $0x6a8] sm:$0xff]  ;;  %v2246_v40 = vld [vmem:[%s8820_s1 + $0x6d8] sm:$0xff] }
 0x23c   :  { %v5734_v51 = vpop.eup %5733  ;;  %4251 = vst.msk [vmem:[%s8821_s2 + $0x678] sm:$0xff] %vm4043_vm0, %v3962_v44  ;;  %5759 = vrcp.f32 %v1442_v46  ;;  %v1444_v58 = vadd.f32 1.0, %v5732_v47 }
 0x23d   :  { %v5736_v53 = vpop.eup %5735  ;;  %4250 = vst.msk [vmem:[%s8821_s2 + $0x670] sm:$0xff] %vm4043_vm0, %v3961_v48  ;;  %v3363_v54 = vpop.permute.xlu1 %3362  ;;  %5761 = vrcp.f32 %v1441_v50  ;;  %v1443_v62 = vadd.f32 1.0, %v5734_v51  ;;  %v2248_v48 = vld [vmem:[%s8820_s1 + $0x6e8] sm:$0xff]  ;;  %v2247_v50 = vld [vmem:[%s8820_s1 + $0x6e0] sm:$0xff] }
 0x23e   :  { %v5738_v55 = vpop.eup %5737  ;;  %v3964_v56 = vmul.f32 %v3363_v54, %v2236_v49  ;;  %v3358_v57 = vpop.permute.xlu0 %3357  ;;  %3672 = vperm.xlu1 %4626, %v5728_v41   ;;  %5763 = vrcp.f32 %v1444_v58  ;;  %v1446_v6 = vadd.f32 1.0, %v5736_v53  ;;  %v2249_v58 = vld [vmem:[%s8820_s1 + $0x6f0] sm:$0xff] }
 0x23f   :  { %v5740_v59 = vpop.eup %5739  ;;  %v3963_v60 = vmul.f32 %v3358_v57, %v2235_v52  ;;  %3667 = vperm.xlu0 %4625, %v5730_v43   ;;  %5765 = vrcp.f32 %v1443_v62  ;;  %v1445_v10 = vadd.f32 1.0, %v5738_v55 }
 0x240   :  { %v5742_v63 = vpop.eup %5741  ;;  %4253 = vst.msk [vmem:[%s8821_s2 + $0x688] sm:$0xff] %vm4043_vm0, %v3964_v56  ;;  %5767 = vrcp.f32 %v1446_v6  ;;  %v1448_v18 = vadd.f32 1.0, %v5740_v59  ;;  %v2250_v56 = vld [vmem:[%s8820_s1 + $0x6f8] sm:$0xff] }
 0x241   :  { %v5744_v1 = vpop.eup %5743  ;;  %4252 = vst.msk [vmem:[%s8821_s2 + $0x680] sm:$0xff] %vm4043_vm0, %v3963_v60  ;;  %v3373_v2 = vpop.permute.xlu1 %3372  ;;  %5769 = vrcp.f32 %v1445_v10  ;;  %v1447_v22 = vadd.f32 1.0, %v5742_v63 }
 0x242   :  { %v5746_v3 = vpop.eup %5745  ;;  %v3966_v4 = vmul.f32 %v3373_v2, %v2238_v61  ;;  %v3368_v5 = vpop.permute.xlu0 %3367  ;;  %3682 = vperm.xlu1 %4626, %v5744_v1   ;;  %5771 = vrcp.f32 %v1448_v18  ;;  %v2251_v2 = vld [vmem:[%s8820_s1 + $0x700] sm:$0xff] }
 0x243   :  { %v5748_v7 = vpop.eup %5747  ;;  %v3965_v8 = vmul.f32 %v3368_v5, %v2237_v0  ;;  %3677 = vperm.xlu0 %4625, %v5746_v3   ;;  %5773 = vrcp.f32 %v1447_v22  ;;  %v2252_v0 = vld [vmem:[%s8820_s1 + $0x708] sm:$0xff] }
 0x244   :  { %v5750_v11 = vpop.eup %5749  ;;  %4255 = vst.msk [vmem:[%s8821_s2 + $0x698] sm:$0xff] %vm4043_vm0, %v3966_v4 }
 0x245   :  { %v5752_v13 = vpop.eup %5751  ;;  %4254 = vst.msk [vmem:[%s8821_s2 + $0x690] sm:$0xff] %vm4043_vm0, %v3965_v8  ;;  %v3383_v14 = vpop.permute.xlu1 %3382  ;;  %v2253_v8 = vld [vmem:[%s8820_s1 + $0x710] sm:$0xff] }
 0x246   :  { %v5754_v15 = vpop.eup %5753  ;;  %v3968_v16 = vmul.f32 %v3383_v14, %v2240_v9  ;;  %v3378_v17 = vpop.permute.xlu0 %3377  ;;  %3692 = vperm.xlu1 %4626, %v5748_v7   ;;  %v1450_v28 = vadd.f32 1.0, %v5752_v13  ;;  %v2254_v7 = vld [vmem:[%s8820_s1 + $0x718] sm:$0xff]  ;;  %v2256_v13 = vld [vmem:[%s8820_s1 + $0x728] sm:$0xff]  ;;  %v2255_v14 = vld [vmem:[%s8820_s1 + $0x720] sm:$0xff] }
 0x247   :  { %v5756_v19 = vpop.eup %5755  ;;  %v3967_v20 = vmul.f32 %v3378_v17, %v2239_v12  ;;  %3687 = vperm.xlu0 %4625, %v5750_v11   ;;  %v1449_v32 = vadd.f32 1.0, %v5754_v15 }
 0x248   :  { %v5758_v23 = vpop.eup %5757  ;;  %4257 = vst.msk [vmem:[%s8821_s2 + $0x6a8] sm:$0xff] %vm4043_vm0, %v3968_v16  ;;  %5775 = vrcp.f32 %v1450_v28 }
 0x249   :  { %4256 = vst.msk [vmem:[%s8821_s2 + $0x6a0] sm:$0xff] %vm4043_vm0, %v3967_v20  ;;  %v3393_v25 = vpop.permute.xlu1 %3392  ;;  %v5760_v29 = vpop.eup %5759  ;;  %5777 = vrcp.f32 %v1449_v32  ;;  %v2257_v20 = vld [vmem:[%s8820_s1 + $0x730] sm:$0xff] }
 0x24a   :  { %v3970_v26 = vmul.f32 %v3393_v25, %v2242_v21  ;;  %v3388_v27 = vpop.permute.xlu0 %3387  ;;  %3702 = vperm.xlu1 %4626, %v5756_v19   ;;  %v5762_v33 = vpop.eup %5761  ;;  %v2258_v19 = vld [vmem:[%s8820_s1 + $0x738] sm:$0xff]  ;;  %v2260_v25 = vld [vmem:[%s8820_s1 + $0x748] sm:$0xff]  ;;  %v2261_v32 = vld [vmem:[%s8820_s1 + $0x750] sm:$0xff] }
 0x24b   :  { %v3969_v30 = vmul.f32 %v3388_v27, %v2241_v24  ;;  %3697 = vperm.xlu0 %4625, %v5758_v23   ;;  %v5764_v38 = vpop.eup %5763 }
 0x24c   :  { %4259 = vst.msk [vmem:[%s8821_s2 + $0x6b8] sm:$0xff] %vm4043_vm0, %v3970_v26  ;;  %v5766_v41 = vpop.eup %5765  ;;  %v2259_v26 = vld [vmem:[%s8820_s1 + $0x740] sm:$0xff] }
 0x24d   :  { %4258 = vst.msk [vmem:[%s8821_s2 + $0x6b0] sm:$0xff] %vm4043_vm0, %v3969_v30  ;;  %v3403_v35 = vpop.permute.xlu1 %3402  ;;  %v5768_v46 = vpop.eup %5767 }
 0x24e   :  { %v3972_v36 = vmul.f32 %v3403_v35, %v2244_v31  ;;  %v3398_v37 = vpop.permute.xlu0 %3397  ;;  %3712 = vperm.xlu1 %4626, %v5760_v29   ;;  %v5770_v49 = vpop.eup %5769  ;;  %v2262_v31 = vld [vmem:[%s8820_s1 + $0x758] sm:$0xff] }
 0x24f   :  { %v3971_v39 = vmul.f32 %v3398_v37, %v2243_v34  ;;  %3707 = vperm.xlu0 %4625, %v5762_v33   ;;  %v5772_v54 = vpop.eup %5771  ;;  %v2264_v37 = vld [vmem:[%s8820_s1 + $0x768] sm:$0xff] }
 0x250   :  { %4261 = vst.msk [vmem:[%s8821_s2 + $0x6c8] sm:$0xff] %vm4043_vm0, %v3972_v36  ;;  %v5774_v57 = vpop.eup %5773 }
 0x251   :  { %4260 = vst.msk [vmem:[%s8821_s2 + $0x6c0] sm:$0xff] %vm4043_vm0, %v3971_v39  ;;  %v3413_v43 = vpop.permute.xlu1 %3412 }
 0x252   :  { %v3974_v44 = vmul.f32 %v3413_v43, %v2246_v40  ;;  %v3408_v45 = vpop.permute.xlu0 %3407  ;;  %3722 = vperm.xlu1 %4626, %v5764_v38   ;;  %v2263_v38 = vld [vmem:[%s8820_s1 + $0x760] sm:$0xff]  ;;  %v2266_v43 = vld [vmem:[%s8820_s1 + $0x778] sm:$0xff] }
 0x253   :  { %v3973_v47 = vmul.f32 %v3408_v45, %v2245_v42  ;;  %3717 = vperm.xlu0 %4625, %v5766_v41  }
 0x254   :  { %4263 = vst.msk [vmem:[%s8821_s2 + $0x6d8] sm:$0xff] %vm4043_vm0, %v3974_v44  ;;  %v2265_v44 = vld [vmem:[%s8820_s1 + $0x770] sm:$0xff] }
 0x255   :  { %4262 = vst.msk [vmem:[%s8821_s2 + $0x6d0] sm:$0xff] %vm4043_vm0, %v3973_v47  ;;  %v3423_v51 = vpop.permute.xlu1 %3422  ;;  %v5776_v62 = vpop.eup %5775 }
 0x256   :  { %v3976_v52 = vmul.f32 %v3423_v51, %v2248_v48  ;;  %v3418_v53 = vpop.permute.xlu0 %3417  ;;  %3732 = vperm.xlu1 %4626, %v5768_v46   ;;  %v5778_v1 = vpop.eup %5777 }
 0x257   :  { %v3975_v55 = vmul.f32 %v3418_v53, %v2247_v50  ;;  %3727 = vperm.xlu0 %4625, %v5770_v49   ;;  %v2268_v49 = vld [vmem:[%s8820_s1 + $0x788] sm:$0xff]  ;;  %v2267_v50 = vld [vmem:[%s8820_s1 + $0x780] sm:$0xff] }
 0x258   :  { %4265 = vst.msk [vmem:[%s8821_s2 + $0x6e8] sm:$0xff] %vm4043_vm0, %v3976_v52 }
 0x259   :  { %4264 = vst.msk [vmem:[%s8821_s2 + $0x6e0] sm:$0xff] %vm4043_vm0, %v3975_v55  ;;  %v3433_v59 = vpop.permute.xlu1 %3432  ;;  %v2270_v55 = vld [vmem:[%s8820_s1 + $0x798] sm:$0xff] }
 0x25a   :  { %v3978_v60 = vmul.f32 %v3433_v59, %v2250_v56  ;;  %v3428_v61 = vpop.permute.xlu0 %3427  ;;  %3742 = vperm.xlu1 %4626, %v5772_v54   ;;  %v2269_v56 = vld [vmem:[%s8820_s1 + $0x790] sm:$0xff] }
 0x25b   :  { %v3977_v63 = vmul.f32 %v3428_v61, %v2249_v58  ;;  %3737 = vperm.xlu0 %4625, %v5774_v57   ;;  %v2272_v61 = vld [vmem:[%s8820_s1 + $0x7a8] sm:$0xff] }
 0x25c   :  { %4267 = vst.msk [vmem:[%s8821_s2 + $0x6f8] sm:$0xff] %vm4043_vm0, %v3978_v60 }
 0x25d   :  { %4266 = vst.msk [vmem:[%s8821_s2 + $0x6f0] sm:$0xff] %vm4043_vm0, %v3977_v63  ;;  %v3443_v3 = vpop.permute.xlu1 %3442 }
 0x25e   :  { %v3980_v4 = vmul.f32 %v3443_v3, %v2252_v0  ;;  %v3438_v5 = vpop.permute.xlu0 %3437  ;;  %3752 = vperm.xlu1 %4626, %v5776_v62   ;;  %v2271_v62 = vld [vmem:[%s8820_s1 + $0x7a0] sm:$0xff]  ;;  %v2274_v3 = vld [vmem:[%s8820_s1 + $0x7b8] sm:$0xff] }
 0x25f   :  { %v3979_v6 = vmul.f32 %v3438_v5, %v2251_v2  ;;  %3747 = vperm.xlu0 %4625, %v5778_v1  }
 0x260   :  { %4269 = vst.msk [vmem:[%s8821_s2 + $0x708] sm:$0xff] %vm4043_vm0, %v3980_v4  ;;  %v2273_v4 = vld [vmem:[%s8820_s1 + $0x7b0] sm:$0xff] }
 0x261   :  { %4268 = vst.msk [vmem:[%s8821_s2 + $0x700] sm:$0xff] %vm4043_vm0, %v3979_v6  ;;  %v3453_v9 = vpop.permute.xlu1 %3452 }
 0x262   :  { %v3982_v10 = vmul.f32 %v3453_v9, %v2254_v7  ;;  %v3448_v11 = vpop.permute.xlu0 %3447  ;;  %v2276_v9 = vld [vmem:[%s8820_s1 + $0x7c8] sm:$0xff] }
 0x263   :  { %v3981_v12 = vmul.f32 %v3448_v11, %v2253_v8 }
 0x264   :  { %4271 = vst.msk [vmem:[%s8821_s2 + $0x718] sm:$0xff] %vm4043_vm0, %v3982_v10  ;;  %v2275_v10 = vld [vmem:[%s8820_s1 + $0x7c0] sm:$0xff] }
 0x265   :  { %4270 = vst.msk [vmem:[%s8821_s2 + $0x710] sm:$0xff] %vm4043_vm0, %v3981_v12  ;;  %v3463_v15 = vpop.permute.xlu1 %3462 }
 0x266   :  { %v3984_v16 = vmul.f32 %v3463_v15, %v2256_v13  ;;  %v3458_v17 = vpop.permute.xlu0 %3457  ;;  %v2278_v15 = vld [vmem:[%s8820_s1 + $0x7d8] sm:$0xff] }
 0x267   :  { %v3983_v18 = vmul.f32 %v3458_v17, %v2255_v14 }
 0x268   :  { %4273 = vst.msk [vmem:[%s8821_s2 + $0x728] sm:$0xff] %vm4043_vm0, %v3984_v16  ;;  %v2277_v16 = vld [vmem:[%s8820_s1 + $0x7d0] sm:$0xff] }
 0x269   :  { %4272 = vst.msk [vmem:[%s8821_s2 + $0x720] sm:$0xff] %vm4043_vm0, %v3983_v18  ;;  %v3473_v21 = vpop.permute.xlu1 %3472 }
 0x26a   :  { %v3986_v22 = vmul.f32 %v3473_v21, %v2258_v19  ;;  %v3468_v23 = vpop.permute.xlu0 %3467  ;;  %v2280_v21 = vld [vmem:[%s8820_s1 + $0x7e8] sm:$0xff] }
 0x26b   :  { %v3985_v24 = vmul.f32 %v3468_v23, %v2257_v20 }
 0x26c   :  { %4275 = vst.msk [vmem:[%s8821_s2 + $0x738] sm:$0xff] %vm4043_vm0, %v3986_v22  ;;  %v2279_v22 = vld [vmem:[%s8820_s1 + $0x7e0] sm:$0xff] }
 0x26d   :  { %4274 = vst.msk [vmem:[%s8821_s2 + $0x730] sm:$0xff] %vm4043_vm0, %v3985_v24  ;;  %v3483_v27 = vpop.permute.xlu1 %3482 }
 0x26e   :  { %v3988_v28 = vmul.f32 %v3483_v27, %v2260_v25  ;;  %v3478_v29 = vpop.permute.xlu0 %3477  ;;  %v2282_v27 = vld [vmem:[%s8820_s1 + $0x7f8] sm:$0xff] }
 0x26f   :  { %v3987_v30 = vmul.f32 %v3478_v29, %v2259_v26 }
 0x270   :  { %4277 = vst.msk [vmem:[%s8821_s2 + $0x748] sm:$0xff] %vm4043_vm0, %v3988_v28  ;;  %v2281_v28 = vld [vmem:[%s8820_s1 + $0x7f0] sm:$0xff] }
 0x271   :  { %4276 = vst.msk [vmem:[%s8821_s2 + $0x740] sm:$0xff] %vm4043_vm0, %v3987_v30  ;;  %v3493_v33 = vpop.permute.xlu1 %3492 }
 0x272   :  { %v3990_v34 = vmul.f32 %v3493_v33, %v2262_v31  ;;  %v3488_v35 = vpop.permute.xlu0 %3487  ;;  %v2284_v33 = vld [vmem:[%s8820_s1 + $0x808] sm:$0xff] }
 0x273   :  { %v3989_v36 = vmul.f32 %v3488_v35, %v2261_v32 }
 0x274   :  { %4279 = vst.msk [vmem:[%s8821_s2 + $0x758] sm:$0xff] %vm4043_vm0, %v3990_v34  ;;  %v2283_v34 = vld [vmem:[%s8820_s1 + $0x800] sm:$0xff] }
 0x275   :  { %4278 = vst.msk [vmem:[%s8821_s2 + $0x750] sm:$0xff] %vm4043_vm0, %v3989_v36  ;;  %v3503_v39 = vpop.permute.xlu1 %3502 }
 0x276   :  { %v3992_v40 = vmul.f32 %v3503_v39, %v2264_v37  ;;  %v3498_v41 = vpop.permute.xlu0 %3497  ;;  %v2286_v39 = vld [vmem:[%s8820_s1 + $0x818] sm:$0xff] }
 0x277   :  { %v3991_v42 = vmul.f32 %v3498_v41, %v2263_v38 }
 0x278   :  { %4281 = vst.msk [vmem:[%s8821_s2 + $0x768] sm:$0xff] %vm4043_vm0, %v3992_v40  ;;  %v2285_v40 = vld [vmem:[%s8820_s1 + $0x810] sm:$0xff] }
 0x279   :  { %4280 = vst.msk [vmem:[%s8821_s2 + $0x760] sm:$0xff] %vm4043_vm0, %v3991_v42  ;;  %v3513_v45 = vpop.permute.xlu1 %3512 }
 0x27a   :  { %v3994_v46 = vmul.f32 %v3513_v45, %v2266_v43  ;;  %v3508_v47 = vpop.permute.xlu0 %3507  ;;  %v2288_v45 = vld [vmem:[%s8820_s1 + $0x828] sm:$0xff] }
 0x27b   :  { %v3993_v48 = vmul.f32 %v3508_v47, %v2265_v44 }
 0x27c   :  { %4283 = vst.msk [vmem:[%s8821_s2 + $0x778] sm:$0xff] %vm4043_vm0, %v3994_v46  ;;  %v2287_v46 = vld [vmem:[%s8820_s1 + $0x820] sm:$0xff] }
 0x27d   :  { %4282 = vst.msk [vmem:[%s8821_s2 + $0x770] sm:$0xff] %vm4043_vm0, %v3993_v48  ;;  %v3523_v51 = vpop.permute.xlu1 %3522 }
 0x27e   :  { %v3996_v52 = vmul.f32 %v3523_v51, %v2268_v49  ;;  %v3518_v53 = vpop.permute.xlu0 %3517  ;;  %v2290_v51 = vld [vmem:[%s8820_s1 + $0x838] sm:$0xff] }
 0x27f   :  { %v3995_v54 = vmul.f32 %v3518_v53, %v2267_v50 }
 0x280   :  { %4285 = vst.msk [vmem:[%s8821_s2 + $0x788] sm:$0xff] %vm4043_vm0, %v3996_v52  ;;  %v2289_v52 = vld [vmem:[%s8820_s1 + $0x830] sm:$0xff] }
 0x281   :  { %4284 = vst.msk [vmem:[%s8821_s2 + $0x780] sm:$0xff] %vm4043_vm0, %v3995_v54  ;;  %v3533_v57 = vpop.permute.xlu1 %3532 }
 0x282   :  { %v3998_v58 = vmul.f32 %v3533_v57, %v2270_v55  ;;  %v3528_v59 = vpop.permute.xlu0 %3527  ;;  %v2292_v57 = vld [vmem:[%s8820_s1 + $0x848] sm:$0xff] }
 0x283   :  { %v3997_v60 = vmul.f32 %v3528_v59, %v2269_v56 }
 0x284   :  { %4287 = vst.msk [vmem:[%s8821_s2 + $0x798] sm:$0xff] %vm4043_vm0, %v3998_v58  ;;  %v2291_v58 = vld [vmem:[%s8820_s1 + $0x840] sm:$0xff] }
 0x285   :  { %4286 = vst.msk [vmem:[%s8821_s2 + $0x790] sm:$0xff] %vm4043_vm0, %v3997_v60  ;;  %v3543_v63 = vpop.permute.xlu1 %3542 }
 0x286   :  { %v4000_v0 = vmul.f32 %v3543_v63, %v2272_v61  ;;  %v3538_v1 = vpop.permute.xlu0 %3537  ;;  %v2294_v63 = vld [vmem:[%s8820_s1 + $0x858] sm:$0xff] }
 0x287   :  { %v3999_v2 = vmul.f32 %v3538_v1, %v2271_v62 }
 0x288   :  { %4289 = vst.msk [vmem:[%s8821_s2 + $0x7a8] sm:$0xff] %vm4043_vm0, %v4000_v0  ;;  %v2293_v0 = vld [vmem:[%s8820_s1 + $0x850] sm:$0xff] }
 0x289   :  { %4288 = vst.msk [vmem:[%s8821_s2 + $0x7a0] sm:$0xff] %vm4043_vm0, %v3999_v2  ;;  %v3553_v5 = vpop.permute.xlu1 %3552 }
 0x28a   :  { %v4002_v6 = vmul.f32 %v3553_v5, %v2274_v3  ;;  %v3548_v7 = vpop.permute.xlu0 %3547  ;;  %v2296_v5 = vld [vmem:[%s8820_s1 + $0x868] sm:$0xff] }
 0x28b   :  { %v4001_v8 = vmul.f32 %v3548_v7, %v2273_v4 }
 0x28c   :  { %4291 = vst.msk [vmem:[%s8821_s2 + $0x7b8] sm:$0xff] %vm4043_vm0, %v4002_v6  ;;  %v2295_v6 = vld [vmem:[%s8820_s1 + $0x860] sm:$0xff] }
 0x28d   :  { %4290 = vst.msk [vmem:[%s8821_s2 + $0x7b0] sm:$0xff] %vm4043_vm0, %v4001_v8  ;;  %v3563_v11 = vpop.permute.xlu1 %3562 }
 0x28e   :  { %v4004_v12 = vmul.f32 %v3563_v11, %v2276_v9  ;;  %v3558_v13 = vpop.permute.xlu0 %3557  ;;  %v2298_v11 = vld [vmem:[%s8820_s1 + $0x878] sm:$0xff] }
 0x28f   :  { %v4003_v14 = vmul.f32 %v3558_v13, %v2275_v10 }
 0x290   :  { %4293 = vst.msk [vmem:[%s8821_s2 + $0x7c8] sm:$0xff] %vm4043_vm0, %v4004_v12  ;;  %v2297_v12 = vld [vmem:[%s8820_s1 + $0x870] sm:$0xff] }
 0x291   :  { %4292 = vst.msk [vmem:[%s8821_s2 + $0x7c0] sm:$0xff] %vm4043_vm0, %v4003_v14  ;;  %v3573_v17 = vpop.permute.xlu1 %3572 }
 0x292   :  { %v4006_v18 = vmul.f32 %v3573_v17, %v2278_v15  ;;  %v3568_v19 = vpop.permute.xlu0 %3567  ;;  %v2300_v17 = vld [vmem:[%s8820_s1 + $0x888] sm:$0xff] }
 0x293   :  { %v4005_v20 = vmul.f32 %v3568_v19, %v2277_v16 }
 0x294   :  { %4295 = vst.msk [vmem:[%s8821_s2 + $0x7d8] sm:$0xff] %vm4043_vm0, %v4006_v18  ;;  %v2299_v18 = vld [vmem:[%s8820_s1 + $0x880] sm:$0xff] }
 0x295   :  { %4294 = vst.msk [vmem:[%s8821_s2 + $0x7d0] sm:$0xff] %vm4043_vm0, %v4005_v20  ;;  %v3583_v23 = vpop.permute.xlu1 %3582 }
 0x296   :  { %v4008_v24 = vmul.f32 %v3583_v23, %v2280_v21  ;;  %v3578_v25 = vpop.permute.xlu0 %3577  ;;  %v2302_v23 = vld [vmem:[%s8820_s1 + $0x898] sm:$0xff] }
 0x297   :  { %v4007_v26 = vmul.f32 %v3578_v25, %v2279_v22 }
 0x298   :  { %4297 = vst.msk [vmem:[%s8821_s2 + $0x7e8] sm:$0xff] %vm4043_vm0, %v4008_v24  ;;  %v2301_v24 = vld [vmem:[%s8820_s1 + $0x890] sm:$0xff] }
 0x299   :  { %4296 = vst.msk [vmem:[%s8821_s2 + $0x7e0] sm:$0xff] %vm4043_vm0, %v4007_v26  ;;  %v3593_v29 = vpop.permute.xlu1 %3592 }
 0x29a   :  { %v4010_v30 = vmul.f32 %v3593_v29, %v2282_v27  ;;  %v3588_v31 = vpop.permute.xlu0 %3587  ;;  %v2304_v29 = vld [vmem:[%s8820_s1 + $0x8a8] sm:$0xff] }
 0x29b   :  { %v4009_v32 = vmul.f32 %v3588_v31, %v2281_v28 }
 0x29c   :  { %4299 = vst.msk [vmem:[%s8821_s2 + $0x7f8] sm:$0xff] %vm4043_vm0, %v4010_v30  ;;  %v2303_v30 = vld [vmem:[%s8820_s1 + $0x8a0] sm:$0xff] }
 0x29d   :  { %4298 = vst.msk [vmem:[%s8821_s2 + $0x7f0] sm:$0xff] %vm4043_vm0, %v4009_v32  ;;  %v3603_v35 = vpop.permute.xlu1 %3602 }
 0x29e   :  { %v4012_v36 = vmul.f32 %v3603_v35, %v2284_v33  ;;  %v3598_v37 = vpop.permute.xlu0 %3597  ;;  %v2306_v35 = vld [vmem:[%s8820_s1 + $0x8b8] sm:$0xff] }
 0x29f   :  { %v4011_v38 = vmul.f32 %v3598_v37, %v2283_v34 }
 0x2a0   :  { %4301 = vst.msk [vmem:[%s8821_s2 + $0x808] sm:$0xff] %vm4043_vm0, %v4012_v36  ;;  %v2305_v36 = vld [vmem:[%s8820_s1 + $0x8b0] sm:$0xff] }
 0x2a1   :  { %4300 = vst.msk [vmem:[%s8821_s2 + $0x800] sm:$0xff] %vm4043_vm0, %v4011_v38  ;;  %v3613_v41 = vpop.permute.xlu1 %3612 }
 0x2a2   :  { %v4014_v42 = vmul.f32 %v3613_v41, %v2286_v39  ;;  %v3608_v43 = vpop.permute.xlu0 %3607  ;;  %v2308_v41 = vld [vmem:[%s8820_s1 + $0x8c8] sm:$0xff] }
 0x2a3   :  { %v4013_v44 = vmul.f32 %v3608_v43, %v2285_v40 }
 0x2a4   :  { %4303 = vst.msk [vmem:[%s8821_s2 + $0x818] sm:$0xff] %vm4043_vm0, %v4014_v42  ;;  %v2307_v42 = vld [vmem:[%s8820_s1 + $0x8c0] sm:$0xff] }
 0x2a5   :  { %4302 = vst.msk [vmem:[%s8821_s2 + $0x810] sm:$0xff] %vm4043_vm0, %v4013_v44  ;;  %v3623_v47 = vpop.permute.xlu1 %3622 }
 0x2a6   :  { %v4016_v48 = vmul.f32 %v3623_v47, %v2288_v45  ;;  %v3618_v49 = vpop.permute.xlu0 %3617  ;;  %v2310_v47 = vld [vmem:[%s8820_s1 + $0x8d8] sm:$0xff] }
 0x2a7   :  { %v4015_v50 = vmul.f32 %v3618_v49, %v2287_v46 }
 0x2a8   :  { %4305 = vst.msk [vmem:[%s8821_s2 + $0x828] sm:$0xff] %vm4043_vm0, %v4016_v48  ;;  %v2309_v48 = vld [vmem:[%s8820_s1 + $0x8d0] sm:$0xff] }
 0x2a9   :  { %4304 = vst.msk [vmem:[%s8821_s2 + $0x820] sm:$0xff] %vm4043_vm0, %v4015_v50  ;;  %v3633_v53 = vpop.permute.xlu1 %3632 }
 0x2aa   :  { %v4018_v54 = vmul.f32 %v3633_v53, %v2290_v51  ;;  %v3628_v55 = vpop.permute.xlu0 %3627  ;;  %v2312_v53 = vld [vmem:[%s8820_s1 + $0x8e8] sm:$0xff] }
 0x2ab   :  { %v4017_v56 = vmul.f32 %v3628_v55, %v2289_v52 }
 0x2ac   :  { %4307 = vst.msk [vmem:[%s8821_s2 + $0x838] sm:$0xff] %vm4043_vm0, %v4018_v54  ;;  %v2311_v54 = vld [vmem:[%s8820_s1 + $0x8e0] sm:$0xff] }
 0x2ad   :  { %4306 = vst.msk [vmem:[%s8821_s2 + $0x830] sm:$0xff] %vm4043_vm0, %v4017_v56  ;;  %v3643_v59 = vpop.permute.xlu1 %3642 }
 0x2ae   :  { %v4020_v60 = vmul.f32 %v3643_v59, %v2292_v57  ;;  %v3638_v61 = vpop.permute.xlu0 %3637  ;;  %v2314_v59 = vld [vmem:[%s8820_s1 + $0x8f8] sm:$0xff] }
 0x2af   :  { %v4019_v62 = vmul.f32 %v3638_v61, %v2291_v58 }
 0x2b0   :  { %4309 = vst.msk [vmem:[%s8821_s2 + $0x848] sm:$0xff] %vm4043_vm0, %v4020_v60  ;;  %v2313_v60 = vld [vmem:[%s8820_s1 + $0x8f0] sm:$0xff] }
 0x2b1   :  { %4308 = vst.msk [vmem:[%s8821_s2 + $0x840] sm:$0xff] %vm4043_vm0, %v4019_v62  ;;  %v3653_v1 = vpop.permute.xlu1 %3652 }
 0x2b2   :  { %v4022_v2 = vmul.f32 %v3653_v1, %v2294_v63  ;;  %v3648_v3 = vpop.permute.xlu0 %3647 }
 0x2b3   :  { %v4021_v4 = vmul.f32 %v3648_v3, %v2293_v0 }
 0x2b4   :  { %4311 = vst.msk [vmem:[%s8821_s2 + $0x858] sm:$0xff] %vm4043_vm0, %v4022_v2 }
 0x2b5   :  { %4310 = vst.msk [vmem:[%s8821_s2 + $0x850] sm:$0xff] %vm4043_vm0, %v4021_v4  ;;  %v3663_v7 = vpop.permute.xlu1 %3662 }
 0x2b6   :  { %v4024_v8 = vmul.f32 %v3663_v7, %v2296_v5  ;;  %v3658_v9 = vpop.permute.xlu0 %3657 }
 0x2b7   :  { %v4023_v10 = vmul.f32 %v3658_v9, %v2295_v6 }
 0x2b8   :  { %4313 = vst.msk [vmem:[%s8821_s2 + $0x868] sm:$0xff] %vm4043_vm0, %v4024_v8 }
 0x2b9   :  { %4312 = vst.msk [vmem:[%s8821_s2 + $0x860] sm:$0xff] %vm4043_vm0, %v4023_v10  ;;  %v3673_v13 = vpop.permute.xlu1 %3672 }
 0x2ba   :  { %v4026_v14 = vmul.f32 %v3673_v13, %v2298_v11  ;;  %v3668_v15 = vpop.permute.xlu0 %3667 }
 0x2bb   :  { %v4025_v16 = vmul.f32 %v3668_v15, %v2297_v12 }
 0x2bc   :  { %4315 = vst.msk [vmem:[%s8821_s2 + $0x878] sm:$0xff] %vm4043_vm0, %v4026_v14 }
 0x2bd   :  { %4314 = vst.msk [vmem:[%s8821_s2 + $0x870] sm:$0xff] %vm4043_vm0, %v4025_v16  ;;  %v3683_v19 = vpop.permute.xlu1 %3682 }
 0x2be   :  { %v4028_v20 = vmul.f32 %v3683_v19, %v2300_v17  ;;  %v3678_v21 = vpop.permute.xlu0 %3677 }
 0x2bf   :  { %v4027_v22 = vmul.f32 %v3678_v21, %v2299_v18 }
 0x2c0   :  { %4317 = vst.msk [vmem:[%s8821_s2 + $0x888] sm:$0xff] %vm4043_vm0, %v4028_v20 }
 0x2c1   :  { %4316 = vst.msk [vmem:[%s8821_s2 + $0x880] sm:$0xff] %vm4043_vm0, %v4027_v22  ;;  %v3693_v25 = vpop.permute.xlu1 %3692 }
 0x2c2   :  { %v4030_v26 = vmul.f32 %v3693_v25, %v2302_v23  ;;  %v3688_v27 = vpop.permute.xlu0 %3687 }
 0x2c3   :  { %v4029_v28 = vmul.f32 %v3688_v27, %v2301_v24 }
 0x2c4   :  { %4319 = vst.msk [vmem:[%s8821_s2 + $0x898] sm:$0xff] %vm4043_vm0, %v4030_v26 }
 0x2c5   :  { %4318 = vst.msk [vmem:[%s8821_s2 + $0x890] sm:$0xff] %vm4043_vm0, %v4029_v28  ;;  %v3703_v31 = vpop.permute.xlu1 %3702 }
 0x2c6   :  { %v4032_v32 = vmul.f32 %v3703_v31, %v2304_v29  ;;  %v3698_v33 = vpop.permute.xlu0 %3697 }
 0x2c7   :  { %v4031_v34 = vmul.f32 %v3698_v33, %v2303_v30 }
 0x2c8   :  { %4321 = vst.msk [vmem:[%s8821_s2 + $0x8a8] sm:$0xff] %vm4043_vm0, %v4032_v32 }
 0x2c9   :  { %4320 = vst.msk [vmem:[%s8821_s2 + $0x8a0] sm:$0xff] %vm4043_vm0, %v4031_v34  ;;  %v3713_v37 = vpop.permute.xlu1 %3712 }
 0x2ca   :  { %v4034_v38 = vmul.f32 %v3713_v37, %v2306_v35  ;;  %v3708_v39 = vpop.permute.xlu0 %3707 }
 0x2cb   :  { %v4033_v40 = vmul.f32 %v3708_v39, %v2305_v36 }
 0x2cc   :  { %4323 = vst.msk [vmem:[%s8821_s2 + $0x8b8] sm:$0xff] %vm4043_vm0, %v4034_v38 }
 0x2cd   :  { %4322 = vst.msk [vmem:[%s8821_s2 + $0x8b0] sm:$0xff] %vm4043_vm0, %v4033_v40  ;;  %v3723_v43 = vpop.permute.xlu1 %3722 }
 0x2ce   :  { %v4036_v44 = vmul.f32 %v3723_v43, %v2308_v41  ;;  %v3718_v45 = vpop.permute.xlu0 %3717 }
 0x2cf   :  { %v4035_v46 = vmul.f32 %v3718_v45, %v2307_v42 }
 0x2d0   :  { %4325 = vst.msk [vmem:[%s8821_s2 + $0x8c8] sm:$0xff] %vm4043_vm0, %v4036_v44 }
 0x2d1   :  { %4324 = vst.msk [vmem:[%s8821_s2 + $0x8c0] sm:$0xff] %vm4043_vm0, %v4035_v46  ;;  %v3733_v49 = vpop.permute.xlu1 %3732 }
 0x2d2   :  { %v4038_v50 = vmul.f32 %v3733_v49, %v2310_v47  ;;  %v3728_v51 = vpop.permute.xlu0 %3727 }
 0x2d3   :  { %v4037_v52 = vmul.f32 %v3728_v51, %v2309_v48 }
 0x2d4   :  { %4327 = vst.msk [vmem:[%s8821_s2 + $0x8d8] sm:$0xff] %vm4043_vm0, %v4038_v50 }
 0x2d5   :  { %4326 = vst.msk [vmem:[%s8821_s2 + $0x8d0] sm:$0xff] %vm4043_vm0, %v4037_v52  ;;  %v3743_v55 = vpop.permute.xlu1 %3742 }
 0x2d6   :  { %v4040_v56 = vmul.f32 %v3743_v55, %v2312_v53  ;;  %v3738_v57 = vpop.permute.xlu0 %3737 }
 0x2d7   :  { %v4039_v58 = vmul.f32 %v3738_v57, %v2311_v54 }
 0x2d8   :  { %4329 = vst.msk [vmem:[%s8821_s2 + $0x8e8] sm:$0xff] %vm4043_vm0, %v4040_v56 }
 0x2d9   :  { %4328 = vst.msk [vmem:[%s8821_s2 + $0x8e0] sm:$0xff] %vm4043_vm0, %v4039_v58  ;;  %v3753_v61 = vpop.permute.xlu1 %3752 }
 0x2da   :  { %v4042_v62 = vmul.f32 %v3753_v61, %v2314_v59  ;;  %v3748_v63 = vpop.permute.xlu0 %3747 }
 0x2db   :  { %v4041_v0 = vmul.f32 %v3748_v63, %v2313_v60 }
 0x2dc   :  { %4331 = vst.msk [vmem:[%s8821_s2 + $0x8f8] sm:$0xff] %vm4043_vm0, %v4042_v62 }
 0x2dd   :  { %4330 = vst.msk [vmem:[%s8821_s2 + $0x8f0] sm:$0xff] %vm4043_vm0, %v4041_v0 }

</bundles_post_ra>
